<compile_context>
chip_gen: v6e
topology: v6e:2x2x1
jax: 0.10.0
libtpu: 0.0.40
codegen_flags: <defaults>
</compile_context>

<pallas_src>
import jax
import jax.numpy as jnp
from jax.experimental import pallas as pl
from jax.experimental.pallas import tpu as pltpu

LATENT_DIM = 10
HIDDEN_DIM = 128
IMG_DIM = 28 * 28          # 784
IMG_DIM_PAD = 896          # 7 * 128 -> used only for 128-aligned packing slots
BN_EPS = 1e-5

_DIMS = [LATENT_DIM, HIDDEN_DIM, HIDDEN_DIM * 2, HIDDEN_DIM * 4, HIDDEN_DIM * 8, IMG_DIM]
_BN_FEATS = _DIMS[1:5]     # 128, 256, 512, 1024

# Packed small-vector layout:
#   [g1, be1, g2, be2, g3, be3, g4, be4, s4, s5_pad, b5_pad]
# Every slot length is a multiple of 128 -> every offset is lane-aligned.
_VEC_OFFSETS = {}
_off = 0
for _i, _n in enumerate(_BN_FEATS):
    _VEC_OFFSETS[f"g{_i + 1}"] = (_off, _n); _off += _n
    _VEC_OFFSETS[f"be{_i + 1}"] = (_off, _n); _off += _n
_VEC_OFFSETS["s4"] = (_off, _BN_FEATS[-1]); _off += _BN_FEATS[-1]
_VEC_OFFSETS["s5"] = (_off, IMG_DIM_PAD); _off += IMG_DIM_PAD
_VEC_OFFSETS["b5"] = (_off, IMG_DIM_PAD); _off += IMG_DIM_PAD
VEC_TOTAL = _off           # 6656 = 52 * 128


def _vec_slice(vec_ref, name, length=None):
    off, n = _VEC_OFFSETS[name]
    n = n if length is None else length
    return vec_ref[:, off:off + n]          # (1, n) f32, static lane-aligned start


def _linear_bn_relu(h, w_bf16, vec_ref, layer, scale=None):
    """Linear (bias dropped: cancelled by training-mode BN) -> BN -> ReLU.

    `w_bf16` is a bf16 value (either a bf16 weight ref load, or an int8 weight
    upcast on the VPU).  `scale` is the optional per-output-column int8 dequant
    scale; applying it to the matmul output is exact and ~1000x cheaper than
    scaling the weight matrix.
    """
    y = jnp.dot(h.astype(jnp.bfloat16), w_bf16, preferred_element_type=jnp.float32)
    if scale is not None:
        y = y * scale
    mu = jnp.mean(y, axis=0, keepdims=True)
    var = jnp.mean((y - mu) * (y - mu), axis=0, keepdims=True)
    y_hat = (y - mu) * jax.lax.rsqrt(var + BN_EPS)
    y_hat = y_hat * _vec_slice(vec_ref, f"g{layer}") + _vec_slice(vec_ref, f"be{layer}")
    return jnp.maximum(y_hat, 0.0)


def generator_kernel(x_ref, w1, w2, w3, w4, w5, vec_ref, o_ref):
    h = x_ref[...]                                           # (B, 10) f32
    h = _linear_bn_relu(h, w1[...], vec_ref, 1)              # bf16 weight
    h = _linear_bn_relu(h, w2[...], vec_ref, 2)              # bf16 weight
    h = _linear_bn_relu(h, w3[...], vec_ref, 3)              # bf16 weight
    h = _linear_bn_relu(h, w4[...].astype(jnp.bfloat16),     # int8 -> bf16 (VPU)
                        vec_ref, 4, scale=_vec_slice(vec_ref, "s4"))
    z = jnp.dot(h.astype(jnp.bfloat16), w5[...].astype(jnp.bfloat16),
                preferred_element_type=jnp.float32)          # (B, 784) f32 acc
    o_ref[...] = (z * _vec_slice(vec_ref, "s5", IMG_DIM)     # fold int8 scale
                  + _vec_slice(vec_ref, "b5", IMG_DIM))      # + final bias


# ----------------------------------------------------------------------------
# Parameter construction / packing
# ----------------------------------------------------------------------------

def _quant_int8_cols(w):
    """Symmetric per-output-column int8 quantization: w ~= w_q * scale."""
    amax = jnp.max(jnp.abs(w), axis=0, keepdims=True)                 # (1, out)
    scale = jnp.maximum(amax, 1e-12) / 127.0
    w_q = jnp.clip(jnp.round(w / scale), -127.0, 127.0).astype(jnp.int8)
    return w_q, scale.astype(jnp.float32)


def init_params(key):
    """PyTorch-like f32 parameters: 4 x (w, b, gamma, beta) blocks + (w5, b5)."""
    blocks = []
    for i in range(4):
        in_d, out_d = _DIMS[i], _DIMS[i + 1]
        key, kw, kb = jax.random.split(key, 3)
        bound = 1.0 / float(in_d) ** 0.5
        w = jax.random.uniform(kw, (in_d, out_d), jnp.float32, -bound, bound)
        b = jax.random.uniform(kb, (1, out_d), jnp.float32, -bound, bound)
        g = jnp.ones((1, out_d), jnp.float32)
        be = jnp.zeros((1, out_d), jnp.float32)
        blocks.append((w, b, g, be))
    in_d, out_d = _DIMS[4], _DIMS[5]
    key, kw, kb = jax.random.split(key, 3)
    bound = 1.0 / float(in_d) ** 0.5
    w5 = jax.random.uniform(kw, (in_d, out_d), jnp.float32, -bound, bound)
    b5 = jax.random.uniform(kb, (1, out_d), jnp.float32, -bound, bound)
    return blocks, (w5, b5)


def pack_params(blocks, final):
    """Kernel operands: w1..w3 bf16, w4/w5 int8 (pre-BN biases dropped,
    w5 kept at its natural (1024, 784) shape), plus one packed f32 vector."""
    w1 = blocks[0][0].astype(jnp.bfloat16)
    w2 = blocks[1][0].astype(jnp.bfloat16)
    w3 = blocks[2][0].astype(jnp.bfloat16)
    w4_q, s4 = _quant_int8_cols(blocks[3][0])
    w5, b5 = final
    w5_q, s5 = _quant_int8_cols(w5)

    vec = jnp.zeros((1, VEC_TOTAL), jnp.float32)
    for i, (_, _, g, be) in enumerate(blocks):
        og, _ = _VEC_OFFSETS[f"g{i + 1}"]
        ob, _ = _VEC_OFFSETS[f"be{i + 1}"]
        vec = vec.at[:, og:og + g.shape[1]].set(g)
        vec = vec.at[:, ob:ob + be.shape[1]].set(be)
    o4, _ = _VEC_OFFSETS["s4"]
    vec = vec.at[:, o4:o4 + s4.shape[1]].set(s4)
    o5, _ = _VEC_OFFSETS["s5"]
    vec = vec.at[:, o5:o5 + IMG_DIM].set(s5)
    ob5, _ = _VEC_OFFSETS["b5"]
    vec = vec.at[:, ob5:ob5 + IMG_DIM].set(b5)
    return (w1, w2, w3, w4_q, w5_q), vec


# ----------------------------------------------------------------------------
# Pallas entry point
# ----------------------------------------------------------------------------

def generator_forward(x, ws, vec):
    batch = x.shape[0]
    vmem = pl.BlockSpec(memory_space=pltpu.MemorySpace.VMEM)
    return pl.pallas_call(
        generator_kernel,
        out_shape=jax.ShapeDtypeStruct((batch, IMG_DIM), jnp.float32),
        in_specs=[vmem] * (1 + len(ws) + 1),
        out_specs=vmem,
        compiler_params=pltpu.CompilerParams(vmem_limit_bytes=8 << 20),
    )(x, *ws, vec)


# ----------------------------------------------------------------------------
# Pure-JAX reference with the exact PyTorch structure (incl. the pre-BN biases,
# which cancel in training-mode BN), using the SAME quantized weights and the
# same bf16 activation rounding the kernel applies before each matmul.
# ----------------------------------------------------------------------------

def generator_ref(x, blocks, final):
    h = x
    for i, (w, b, g, be) in enumerate(blocks):
        hq = h.astype(jnp.bfloat16).astype(jnp.float32)
        if i < 3:
            wq = w.astype(jnp.bfloat16).astype(jnp.float32)
            y = hq @ wq + b
        else:
            w_q, s = _quant_int8_cols(w)
            y = (hq @ w_q.astype(jnp.float32)) * s + b
        mu = jnp.mean(y, axis=0, keepdims=True)
        var = jnp.mean((y - mu) ** 2, axis=0, keepdims=True)
        h = jnp.maximum((y - mu) / jnp.sqrt(var + BN_EPS) * g + be, 0.0)
    w5, b5 = final
    hq = h.astype(jnp.bfloat16).astype(jnp.float32)
    w5_q, s5 = _quant_int8_cols(w5)
    return (hq @ w5_q.astype(jnp.float32)) * s5 + b5


if __name__ == "__main__":
    key = jax.random.PRNGKey(0)
    k_params, k_x = jax.random.split(key)

    blocks, final = init_params(k_params)
    ws, vec = pack_params(blocks, final)

    batch = 8
    x = jax.random.normal(k_x, (batch, LATENT_DIM), jnp.float32)

    out = generator_forward(x, ws, vec)
    out = jax.block_until_ready(out)

    ref = generator_ref(x, blocks, final)
    assert out.shape == (batch, IMG_DIM)
    max_err = float(jnp.max(jnp.abs(out - ref)))
    assert jnp.allclose(out, ref, atol=2e-2, rtol=2e-2), max_err

    print("KERNEL_OK")
</pallas_src>

<mosaic_0001>
module attributes {stable_mosaic.version = 11 : i64} {
  func.func @generator_kernel(%arg0: memref<8x10xf32, #tpu.memory_space<vmem>>, %arg1: memref<10x128xbf16, #tpu.memory_space<vmem>>, %arg2: memref<128x256xbf16, #tpu.memory_space<vmem>>, %arg3: memref<256x512xbf16, #tpu.memory_space<vmem>>, %arg4: memref<512x1024xi8, #tpu.memory_space<vmem>>, %arg5: memref<1024x784xi8, #tpu.memory_space<vmem>>, %arg6: memref<1x6656xf32, #tpu.memory_space<vmem>>, %arg7: memref<8x784xf32, #tpu.memory_space<vmem>>) attributes {dimension_semantics = [], scalar_prefetch = 0 : i64, scratch_operands = 0 : i64, tpu.core_type = #tpu.core_type<tc>} {
    %c0 = arith.constant 0 : index
    %c0_0 = arith.constant 0 : index
    %0 = vector.load %arg0[%c0, %c0_0] : memref<8x10xf32, #tpu.memory_space<vmem>>, vector<8x10xf32>
    %c0_1 = arith.constant 0 : index
    %c0_2 = arith.constant 0 : index
    %1 = vector.load %arg1[%c0_1, %c0_2] : memref<10x128xbf16, #tpu.memory_space<vmem>>, vector<10x128xbf16>
    %2 = arith.truncf %0 : vector<8x10xf32> to vector<8x10xbf16>
    %cst = arith.constant dense<0.000000e+00> : vector<8x128xf32>
    %3 = tpu.matmul %2, %1, %cst {dimension_numbers = #tpu.dot_dimension_numbers<[1], [0], [0], [1], [0, 0, 1, 1], [], []>} : vector<8x10xbf16>, vector<10x128xbf16>, vector<8x128xf32> -> vector<8x128xf32>
    %cst_3 = arith.constant dense<0.000000e+00> : vector<128xf32>
    %4 = vector.multi_reduction <add>, %3, %cst_3 [0] : vector<8x128xf32> to vector<128xf32>
    %5 = vector.shape_cast %4 : vector<128xf32> to vector<1x128xf32>
    %cst_4 = arith.constant 8.000000e+00 : f32
    %6 = vector.broadcast %cst_4 : f32 to vector<1x128xf32>
    %7 = arith.divf %5, %6 : vector<1x128xf32>
    %8 = vector.broadcast %7 : vector<1x128xf32> to vector<8x128xf32>
    %9 = arith.subf %3, %8 : vector<8x128xf32>
    %10 = vector.broadcast %7 : vector<1x128xf32> to vector<8x128xf32>
    %11 = arith.subf %3, %10 : vector<8x128xf32>
    %12 = arith.mulf %9, %11 : vector<8x128xf32>
    %cst_5 = arith.constant dense<0.000000e+00> : vector<128xf32>
    %13 = vector.multi_reduction <add>, %12, %cst_5 [0] : vector<8x128xf32> to vector<128xf32>
    %14 = vector.shape_cast %13 : vector<128xf32> to vector<1x128xf32>
    %cst_6 = arith.constant 8.000000e+00 : f32
    %15 = vector.broadcast %cst_6 : f32 to vector<1x128xf32>
    %16 = arith.divf %14, %15 : vector<1x128xf32>
    %17 = vector.broadcast %7 : vector<1x128xf32> to vector<8x128xf32>
    %18 = arith.subf %3, %17 : vector<8x128xf32>
    %cst_7 = arith.constant 9.99999974E-6 : f32
    %19 = vector.broadcast %cst_7 : f32 to vector<1x128xf32>
    %20 = arith.addf %16, %19 : vector<1x128xf32>
    %21 = math.rsqrt %20 : vector<1x128xf32>
    %22 = vector.broadcast %21 : vector<1x128xf32> to vector<8x128xf32>
    %23 = arith.mulf %18, %22 : vector<8x128xf32>
    %c0_8 = arith.constant 0 : index
    %c0_9 = arith.constant 0 : index
    %24 = vector.load %arg6[%c0_8, %c0_9] : memref<1x6656xf32, #tpu.memory_space<vmem>>, vector<1x128xf32>
    %25 = vector.broadcast %24 : vector<1x128xf32> to vector<8x128xf32>
    %26 = arith.mulf %23, %25 : vector<8x128xf32>
    %c0_10 = arith.constant 0 : index
    %c128 = arith.constant 128 : index
    %27 = vector.load %arg6[%c0_10, %c128] : memref<1x6656xf32, #tpu.memory_space<vmem>>, vector<1x128xf32>
    %28 = vector.broadcast %27 : vector<1x128xf32> to vector<8x128xf32>
    %29 = arith.addf %26, %28 : vector<8x128xf32>
    %cst_11 = arith.constant 0.000000e+00 : f32
    %30 = vector.broadcast %cst_11 : f32 to vector<8x128xf32>
    %31 = arith.maximumf %29, %30 : vector<8x128xf32>
    %c0_12 = arith.constant 0 : index
    %c0_13 = arith.constant 0 : index
    %32 = vector.load %arg2[%c0_12, %c0_13] : memref<128x256xbf16, #tpu.memory_space<vmem>>, vector<128x256xbf16>
    %33 = arith.truncf %31 : vector<8x128xf32> to vector<8x128xbf16>
    %cst_14 = arith.constant dense<0.000000e+00> : vector<8x256xf32>
    %34 = tpu.matmul %33, %32, %cst_14 {dimension_numbers = #tpu.dot_dimension_numbers<[1], [0], [0], [1], [0, 0, 1, 1], [], []>} : vector<8x128xbf16>, vector<128x256xbf16>, vector<8x256xf32> -> vector<8x256xf32>
    %cst_15 = arith.constant dense<0.000000e+00> : vector<256xf32>
    %35 = vector.multi_reduction <add>, %34, %cst_15 [0] : vector<8x256xf32> to vector<256xf32>
    %36 = vector.shape_cast %35 : vector<256xf32> to vector<1x256xf32>
    %cst_16 = arith.constant 8.000000e+00 : f32
    %37 = vector.broadcast %cst_16 : f32 to vector<1x256xf32>
    %38 = arith.divf %36, %37 : vector<1x256xf32>
    %39 = vector.broadcast %38 : vector<1x256xf32> to vector<8x256xf32>
    %40 = arith.subf %34, %39 : vector<8x256xf32>
    %41 = vector.broadcast %38 : vector<1x256xf32> to vector<8x256xf32>
    %42 = arith.subf %34, %41 : vector<8x256xf32>
    %43 = arith.mulf %40, %42 : vector<8x256xf32>
    %cst_17 = arith.constant dense<0.000000e+00> : vector<256xf32>
    %44 = vector.multi_reduction <add>, %43, %cst_17 [0] : vector<8x256xf32> to vector<256xf32>
    %45 = vector.shape_cast %44 : vector<256xf32> to vector<1x256xf32>
    %cst_18 = arith.constant 8.000000e+00 : f32
    %46 = vector.broadcast %cst_18 : f32 to vector<1x256xf32>
    %47 = arith.divf %45, %46 : vector<1x256xf32>
    %48 = vector.broadcast %38 : vector<1x256xf32> to vector<8x256xf32>
    %49 = arith.subf %34, %48 : vector<8x256xf32>
    %cst_19 = arith.constant 9.99999974E-6 : f32
    %50 = vector.broadcast %cst_19 : f32 to vector<1x256xf32>
    %51 = arith.addf %47, %50 : vector<1x256xf32>
    %52 = math.rsqrt %51 : vector<1x256xf32>
    %53 = vector.broadcast %52 : vector<1x256xf32> to vector<8x256xf32>
    %54 = arith.mulf %49, %53 : vector<8x256xf32>
    %c0_20 = arith.constant 0 : index
    %c256 = arith.constant 256 : index
    %55 = vector.load %arg6[%c0_20, %c256] : memref<1x6656xf32, #tpu.memory_space<vmem>>, vector<1x256xf32>
    %56 = vector.broadcast %55 : vector<1x256xf32> to vector<8x256xf32>
    %57 = arith.mulf %54, %56 : vector<8x256xf32>
    %c0_21 = arith.constant 0 : index
    %c512 = arith.constant 512 : index
    %58 = vector.load %arg6[%c0_21, %c512] : memref<1x6656xf32, #tpu.memory_space<vmem>>, vector<1x256xf32>
    %59 = vector.broadcast %58 : vector<1x256xf32> to vector<8x256xf32>
    %60 = arith.addf %57, %59 : vector<8x256xf32>
    %cst_22 = arith.constant 0.000000e+00 : f32
    %61 = vector.broadcast %cst_22 : f32 to vector<8x256xf32>
    %62 = arith.maximumf %60, %61 : vector<8x256xf32>
    %c0_23 = arith.constant 0 : index
    %c0_24 = arith.constant 0 : index
    %63 = vector.load %arg3[%c0_23, %c0_24] : memref<256x512xbf16, #tpu.memory_space<vmem>>, vector<256x512xbf16>
    %64 = arith.truncf %62 : vector<8x256xf32> to vector<8x256xbf16>
    %cst_25 = arith.constant dense<0.000000e+00> : vector<8x512xf32>
    %65 = tpu.matmul %64, %63, %cst_25 {dimension_numbers = #tpu.dot_dimension_numbers<[1], [0], [0], [1], [0, 0, 1, 1], [], []>} : vector<8x256xbf16>, vector<256x512xbf16>, vector<8x512xf32> -> vector<8x512xf32>
    %cst_26 = arith.constant dense<0.000000e+00> : vector<512xf32>
    %66 = vector.multi_reduction <add>, %65, %cst_26 [0] : vector<8x512xf32> to vector<512xf32>
    %67 = vector.shape_cast %66 : vector<512xf32> to vector<1x512xf32>
    %cst_27 = arith.constant 8.000000e+00 : f32
    %68 = vector.broadcast %cst_27 : f32 to vector<1x512xf32>
    %69 = arith.divf %67, %68 : vector<1x512xf32>
    %70 = vector.broadcast %69 : vector<1x512xf32> to vector<8x512xf32>
    %71 = arith.subf %65, %70 : vector<8x512xf32>
    %72 = vector.broadcast %69 : vector<1x512xf32> to vector<8x512xf32>
    %73 = arith.subf %65, %72 : vector<8x512xf32>
    %74 = arith.mulf %71, %73 : vector<8x512xf32>
    %cst_28 = arith.constant dense<0.000000e+00> : vector<512xf32>
    %75 = vector.multi_reduction <add>, %74, %cst_28 [0] : vector<8x512xf32> to vector<512xf32>
    %76 = vector.shape_cast %75 : vector<512xf32> to vector<1x512xf32>
    %cst_29 = arith.constant 8.000000e+00 : f32
    %77 = vector.broadcast %cst_29 : f32 to vector<1x512xf32>
    %78 = arith.divf %76, %77 : vector<1x512xf32>
    %79 = vector.broadcast %69 : vector<1x512xf32> to vector<8x512xf32>
    %80 = arith.subf %65, %79 : vector<8x512xf32>
    %cst_30 = arith.constant 9.99999974E-6 : f32
    %81 = vector.broadcast %cst_30 : f32 to vector<1x512xf32>
    %82 = arith.addf %78, %81 : vector<1x512xf32>
    %83 = math.rsqrt %82 : vector<1x512xf32>
    %84 = vector.broadcast %83 : vector<1x512xf32> to vector<8x512xf32>
    %85 = arith.mulf %80, %84 : vector<8x512xf32>
    %c0_31 = arith.constant 0 : index
    %c768 = arith.constant 768 : index
    %86 = vector.load %arg6[%c0_31, %c768] : memref<1x6656xf32, #tpu.memory_space<vmem>>, vector<1x512xf32>
    %87 = vector.broadcast %86 : vector<1x512xf32> to vector<8x512xf32>
    %88 = arith.mulf %85, %87 : vector<8x512xf32>
    %c0_32 = arith.constant 0 : index
    %c1280 = arith.constant 1280 : index
    %89 = vector.load %arg6[%c0_32, %c1280] : memref<1x6656xf32, #tpu.memory_space<vmem>>, vector<1x512xf32>
    %90 = vector.broadcast %89 : vector<1x512xf32> to vector<8x512xf32>
    %91 = arith.addf %88, %90 : vector<8x512xf32>
    %cst_33 = arith.constant 0.000000e+00 : f32
    %92 = vector.broadcast %cst_33 : f32 to vector<8x512xf32>
    %93 = arith.maximumf %91, %92 : vector<8x512xf32>
    %c0_34 = arith.constant 0 : index
    %c0_35 = arith.constant 0 : index
    %94 = vector.load %arg4[%c0_34, %c0_35] : memref<512x1024xi8, #tpu.memory_space<vmem>>, vector<512x1024xi8>
    %95 = arith.sitofp %94 : vector<512x1024xi8> to vector<512x1024xbf16>
    %c0_36 = arith.constant 0 : index
    %c3840 = arith.constant 3840 : index
    %96 = vector.load %arg6[%c0_36, %c3840] : memref<1x6656xf32, #tpu.memory_space<vmem>>, vector<1x1024xf32>
    %97 = arith.truncf %93 : vector<8x512xf32> to vector<8x512xbf16>
    %cst_37 = arith.constant dense<0.000000e+00> : vector<8x1024xf32>
    %98 = tpu.matmul %97, %95, %cst_37 {dimension_numbers = #tpu.dot_dimension_numbers<[1], [0], [0], [1], [0, 0, 1, 1], [], []>} : vector<8x512xbf16>, vector<512x1024xbf16>, vector<8x1024xf32> -> vector<8x1024xf32>
    %99 = vector.broadcast %96 : vector<1x1024xf32> to vector<8x1024xf32>
    %100 = arith.mulf %98, %99 : vector<8x1024xf32>
    %cst_38 = arith.constant dense<0.000000e+00> : vector<1024xf32>
    %101 = vector.multi_reduction <add>, %100, %cst_38 [0] : vector<8x1024xf32> to vector<1024xf32>
    %102 = vector.shape_cast %101 : vector<1024xf32> to vector<1x1024xf32>
    %cst_39 = arith.constant 8.000000e+00 : f32
    %103 = vector.broadcast %cst_39 : f32 to vector<1x1024xf32>
    %104 = arith.divf %102, %103 : vector<1x1024xf32>
    %105 = vector.broadcast %104 : vector<1x1024xf32> to vector<8x1024xf32>
    %106 = arith.subf %100, %105 : vector<8x1024xf32>
    %107 = vector.broadcast %104 : vector<1x1024xf32> to vector<8x1024xf32>
    %108 = arith.subf %100, %107 : vector<8x1024xf32>
    %109 = arith.mulf %106, %108 : vector<8x1024xf32>
    %cst_40 = arith.constant dense<0.000000e+00> : vector<1024xf32>
    %110 = vector.multi_reduction <add>, %109, %cst_40 [0] : vector<8x1024xf32> to vector<1024xf32>
    %111 = vector.shape_cast %110 : vector<1024xf32> to vector<1x1024xf32>
    %cst_41 = arith.constant 8.000000e+00 : f32
    %112 = vector.broadcast %cst_41 : f32 to vector<1x1024xf32>
    %113 = arith.divf %111, %112 : vector<1x1024xf32>
    %114 = vector.broadcast %104 : vector<1x1024xf32> to vector<8x1024xf32>
    %115 = arith.subf %100, %114 : vector<8x1024xf32>
    %cst_42 = arith.constant 9.99999974E-6 : f32
    %116 = vector.broadcast %cst_42 : f32 to vector<1x1024xf32>
    %117 = arith.addf %113, %116 : vector<1x1024xf32>
    %118 = math.rsqrt %117 : vector<1x1024xf32>
    %119 = vector.broadcast %118 : vector<1x1024xf32> to vector<8x1024xf32>
    %120 = arith.mulf %115, %119 : vector<8x1024xf32>
    %c0_43 = arith.constant 0 : index
    %c1792 = arith.constant 1792 : index
    %121 = vector.load %arg6[%c0_43, %c1792] : memref<1x6656xf32, #tpu.memory_space<vmem>>, vector<1x1024xf32>
    %122 = vector.broadcast %121 : vector<1x1024xf32> to vector<8x1024xf32>
    %123 = arith.mulf %120, %122 : vector<8x1024xf32>
    %c0_44 = arith.constant 0 : index
    %c2816 = arith.constant 2816 : index
    %124 = vector.load %arg6[%c0_44, %c2816] : memref<1x6656xf32, #tpu.memory_space<vmem>>, vector<1x1024xf32>
    %125 = vector.broadcast %124 : vector<1x1024xf32> to vector<8x1024xf32>
    %126 = arith.addf %123, %125 : vector<8x1024xf32>
    %cst_45 = arith.constant 0.000000e+00 : f32
    %127 = vector.broadcast %cst_45 : f32 to vector<8x1024xf32>
    %128 = arith.maximumf %126, %127 : vector<8x1024xf32>
    %129 = arith.truncf %128 : vector<8x1024xf32> to vector<8x1024xbf16>
    %c0_46 = arith.constant 0 : index
    %c0_47 = arith.constant 0 : index
    %130 = vector.load %arg5[%c0_46, %c0_47] : memref<1024x784xi8, #tpu.memory_space<vmem>>, vector<1024x784xi8>
    %131 = arith.sitofp %130 : vector<1024x784xi8> to vector<1024x784xbf16>
    %cst_48 = arith.constant dense<0.000000e+00> : vector<8x784xf32>
    %132 = tpu.matmul %129, %131, %cst_48 {dimension_numbers = #tpu.dot_dimension_numbers<[1], [0], [0], [1], [0, 0, 1, 1], [], []>} : vector<8x1024xbf16>, vector<1024x784xbf16>, vector<8x784xf32> -> vector<8x784xf32>
    %c0_49 = arith.constant 0 : index
    %c4864 = arith.constant 4864 : index
    %133 = vector.load %arg6[%c0_49, %c4864] : memref<1x6656xf32, #tpu.memory_space<vmem>>, vector<1x784xf32>
    %134 = vector.broadcast %133 : vector<1x784xf32> to vector<8x784xf32>
    %135 = arith.mulf %132, %134 : vector<8x784xf32>
    %c0_50 = arith.constant 0 : index
    %c5760 = arith.constant 5760 : index
    %136 = vector.load %arg6[%c0_50, %c5760] : memref<1x6656xf32, #tpu.memory_space<vmem>>, vector<1x784xf32>
    %137 = vector.broadcast %136 : vector<1x784xf32> to vector<8x784xf32>
    %138 = arith.addf %135, %137 : vector<8x784xf32>
    %c0_51 = arith.constant 0 : index
    %c0_52 = arith.constant 0 : index
    %139 = vector.load %arg7[%c0_51, %c0_52] : memref<8x784xf32, #tpu.memory_space<vmem>>, vector<8x784xf32>
    tpu.vector_store %arg7[%c0_51, %c0_52], %138 {strides = array<i32>} : memref<8x784xf32, #tpu.memory_space<vmem>>, vector<8x784xf32>,
    return
  }
}

</mosaic_0001>

<bundles_post_ra>
// kernel: tpu_custom_call.1
= control target key start
LH: loop header
LB: loop body
LE: loop exit
PB: predicated region body
PF: predicated region fallthrough
CT: control target
= control target key end

     0   :  { %vm41_vm0 = vcmask 1044480   ;;  %v3754_v0 = vmov 0.0   ;;  %vm3755_vm1 = vmmov 0   ;;  %vm37_vm2 = vcmask 80896   ;;  %s5437_s0 = inlined_call_operand.vmem [shape: f32[8,10], index: 0, kind: input, shape index: {}]   ;;  %s5438_s1 = inlined_call_operand.vmem [shape: bf16[10,128], index: 1, kind: input, shape index: {}]   ;;  %s5439_s2 = inlined_call_operand.vmem [shape: bf16[128,256], index: 2, kind: input, shape index: {}]   ;;  %s5440_s3 = inlined_call_operand.vmem [shape: bf16[256,512], index: 3, kind: input, shape index: {}]   ;;  %s5441_s4 = inlined_call_operand.vmem [shape: s8[512,1024], index: 4, kind: input, shape index: {}]   ;;  %s5442_s5 = inlined_call_operand.vmem [shape: s8[1024,784], index: 5, kind: input, shape index: {}]   ;;  %s5443_s6 = inlined_call_operand.vmem [shape: f32[1,6656], index: 6, kind: input, shape index: {}]   ;;  %s5444_s7 = inlined_call_operand.hbm [shape: f32[8,784], index: 7, kind: output, shape index: {}]  }
   0x1   :  { %3570 = vmatprep.subr.bf16.mxu0 %v3754_v0  ;;  %v3580_v1 = vld [vmem:[%s5438_s1] sm:$0x1f]   ;;  %3572 = vmatprep.mubr.msk.bf16.mxu0 %vm3755_vm1, %v3754_v0 }
   0x2   :  { %v28_v2 = vld [vmem:[%s5437_s0] sm:$0xff]  ;;  %v43_v3 = vsel %vm41_vm0, %v3580_v1, 0 }
   0x3   :  { %v31_v4 = vpack.c.bf16 %v28_v2, %v28_v2  ;;  %3571 = vmatpush3.bf16.msra.mxu0 %v43_v3 }
   0x6   :  { %3573 = vmatmul.mubr.msk.bf16.vlgmr.msra.gmra.mxu0 %vm37_vm2, %v31_v4 }
   0x7   :  { %12 = vsyncpa [#allocation3], 0  ;;  %v3581_v5 = vld [vmem:[%s5439_s2 + $0x74] ss:$8 sps:$4 sm:$0xff]   ;;  %v3583_v6 = vld [vmem:[%s5439_s2 + $0x70] ss:$8 sps:$4 sm:$0xff]  }
   0x8   :  { %219 = vmatprep.subr.bf16.mxu1 %v3581_v5  ;;  %v3584_v7 = vld [vmem:[%s5439_s2 + $0x64] ss:$8 sps:$4 sm:$0xff]   ;;  %v3586_v8 = vld [vmem:[%s5439_s2 + $0x60] ss:$8 sps:$4 sm:$0xff]   ;;  %v3587_v9 = vld [vmem:[%s5439_s2 + $0x54] ss:$8 sps:$4 sm:$0xff]  }
   0x9   :  { %220 = vmatpush1.bf16.msra.mxu1 %v3583_v6  ;;  %v3589_v10 = vld [vmem:[%s5439_s2 + $0x50] ss:$8 sps:$4 sm:$0xff]   ;;  %v3590_v11 = vld [vmem:[%s5439_s2 + $0x44] ss:$8 sps:$4 sm:$0xff]   ;;  %v3592_v12 = vld [vmem:[%s5439_s2 + $0x40] ss:$8 sps:$4 sm:$0xff]  }
   0xa   :  { %221 = vmatprep.subr.bf16.mxu1 %v3584_v7  ;;  %v3593_v13 = vld [vmem:[%s5439_s2 + $0x34] ss:$8 sps:$4 sm:$0xff]   ;;  %v3595_v14 = vld [vmem:[%s5439_s2 + $0x30] ss:$8 sps:$4 sm:$0xff]   ;;  %v3596_v15 = vld [vmem:[%s5439_s2 + $0x24] ss:$8 sps:$4 sm:$0xff]  }
   0xb   :  { %v3598_v16 = vld [vmem:[%s5439_s2 + $0x20] ss:$8 sps:$4 sm:$0xff]   ;;  %v3599_v17 = vld [vmem:[%s5439_s2 + $0x14] ss:$8 sps:$4 sm:$0xff]   ;;  %v3601_v18 = vld [vmem:[%s5439_s2 + $0x10] ss:$8 sps:$4 sm:$0xff]  }
   0xc   :  { %v3602_v19 = vld [vmem:[%s5439_s2 + $0x4] ss:$8 sps:$4 sm:$0xff]   ;;  %v3756_v20 = vmov 0   ;;  %v3604_v21 = vld [vmem:[%s5439_s2] ss:$8 sps:$4 sm:$0xff]   ;;  %vm3380_vm3 = vcmask 130048  }
   0xd   :  { %222 = vmatpush1.bf16.msra.mxu1 %v3586_v8  ;;  %251 = vmatprep.mubr.bf16.mxu1 %v3756_v20  ;;  %v3605_v22 = vld [vmem:[%s5440_s3 + $0xe0] ss:$16 sps:$4 sm:$0xff]   ;;  %v3607_v23 = vld [vmem:[%s5440_s3 + $0xe4] ss:$16 sps:$4 sm:$0xff]   ;;  %v3610_v24 = vld [vmem:[%s5440_s3 + $0xec] ss:$16 sps:$4 sm:$0xff]  }
   0xe   :  { %223 = vmatprep.subr.bf16.mxu1 %v3587_v9  ;;  %714 = vmatprep.subr.bf16.mxu0 %v3607_v23  ;;  %v3398_v47 = vld [vmem:[%s5443_s6] ss:$0 sm:$0xff]  ;;  %v3399_v49 = vld [vmem:[%s5443_s6 + $0x1] ss:$0 sm:$0xff]  ;;  %v3608_v53 = vld [vmem:[%s5440_s3 + $0xe8] ss:$16 sps:$4 sm:$0xff]  }
   0xf   :  { %715 = vmatpush1.bf16.msra.mxu0 %v3605_v22  ;;  %v3613_v55 = vld [vmem:[%s5440_s3 + $0xc4] ss:$16 sps:$4 sm:$0xff]   ;;  %v3616_v56 = vld [vmem:[%s5440_s3 + $0xcc] ss:$16 sps:$4 sm:$0xff]   ;;  %v3611_v57 = vld [vmem:[%s5440_s3 + $0xc0] ss:$16 sps:$4 sm:$0xff]  }
  0x10   :  { %v3614_v58 = vld [vmem:[%s5440_s3 + $0xc8] ss:$16 sps:$4 sm:$0xff]   ;;  %716 = vmatprep.subr.bf16.mxu0 %v3613_v55  ;;  %v3619_v59 = vld [vmem:[%s5440_s3 + $0xa4] ss:$16 sps:$4 sm:$0xff]   ;;  %v3622_v60 = vld [vmem:[%s5440_s3 + $0xac] ss:$16 sps:$4 sm:$0xff]  }
  0x11   :  { %224 = vmatpush1.bf16.msra.mxu1 %v3589_v10  ;;  %v3617_v61 = vld [vmem:[%s5440_s3 + $0xa0] ss:$16 sps:$4 sm:$0xff]   ;;  %v3620_v62 = vld [vmem:[%s5440_s3 + $0xa8] ss:$16 sps:$4 sm:$0xff]   ;;  %v3625_v63 = vld [vmem:[%s5440_s3 + $0x84] ss:$16 sps:$4 sm:$0xff]  }
  0x12   :  { %225 = vmatprep.subr.bf16.mxu1 %v3590_v11  ;;  %v3628_v0 = vld [vmem:[%s5440_s3 + $0x8c] ss:$16 sps:$4 sm:$0xff]   ;;  %v3623_v1 = vld [vmem:[%s5440_s3 + $0x80] ss:$16 sps:$4 sm:$0xff]   ;;  %v3626_v2 = vld [vmem:[%s5440_s3 + $0x88] ss:$16 sps:$4 sm:$0xff]  }
  0x13   :  { %717 = vmatpush1.bf16.msra.mxu0 %v3611_v57  ;;  %v3631_v3 = vld [vmem:[%s5440_s3 + $0x64] ss:$16 sps:$4 sm:$0xff]   ;;  %v3634_v4 = vld [vmem:[%s5440_s3 + $0x6c] ss:$16 sps:$4 sm:$0xff]   ;;  %v3629_v5 = vld [vmem:[%s5440_s3 + $0x60] ss:$16 sps:$4 sm:$0xff]  }
  0x14   :  { %718 = vmatprep.subr.bf16.mxu0 %v3619_v59  ;;  %v3632_v6 = vld [vmem:[%s5440_s3 + $0x68] ss:$16 sps:$4 sm:$0xff]   ;;  %v3637_v7 = vld [vmem:[%s5440_s3 + $0x44] ss:$16 sps:$4 sm:$0xff]   ;;  %v3640_v8 = vld [vmem:[%s5440_s3 + $0x4c] ss:$16 sps:$4 sm:$0xff]  }
  0x15   :  { %226 = vmatpush1.bf16.msra.mxu1 %v3592_v12  ;;  %v3635_v9 = vld [vmem:[%s5440_s3 + $0x40] ss:$16 sps:$4 sm:$0xff]   ;;  %v3638_v10 = vld [vmem:[%s5440_s3 + $0x48] ss:$16 sps:$4 sm:$0xff]   ;;  %v3643_v11 = vld [vmem:[%s5440_s3 + $0x24] ss:$16 sps:$4 sm:$0xff]  }
  0x16   :  { %227 = vmatprep.subr.bf16.mxu1 %v3593_v13  ;;  %v3646_v12 = vld [vmem:[%s5440_s3 + $0x2c] ss:$16 sps:$4 sm:$0xff]   ;;  %v3641_v13 = vld [vmem:[%s5440_s3 + $0x20] ss:$16 sps:$4 sm:$0xff]   ;;  %v3656_v22 = vld [vmem:[%s5440_s3 + $0x1e8] ss:$16 sps:$4 sm:$0xff]  }
  0x17   :  { %719 = vmatpush1.bf16.msra.mxu0 %v3617_v61  ;;  %v3658_v20 = vld [vmem:[%s5440_s3 + $0x1ec] ss:$16 sps:$4 sm:$0xff]   ;;  %v3661_v23 = vld [vmem:[%s5440_s3 + $0x1c4] ss:$16 sps:$4 sm:$0xff]  }
  0x18   :  { %720 = vmatprep.subr.bf16.mxu0 %v3625_v63 }
  0x19   :  { %228 = vmatpush1.bf16.msra.mxu1 %v3595_v14  ;;  %v3644_v14 = vld [vmem:[%s5440_s3 + $0x28] ss:$16 sps:$4 sm:$0xff]  }
  0x1a   :  { %229 = vmatprep.subr.bf16.mxu1 %v3596_v15  ;;  %v3649_v15 = vld [vmem:[%s5440_s3 + $0x4] ss:$16 sps:$4 sm:$0xff]  }
  0x1b   :  { %721 = vmatpush1.bf16.msra.mxu0 %v3623_v1 }
  0x1c   :  { %722 = vmatprep.subr.bf16.mxu0 %v3631_v3 }
  0x1d   :  { %230 = vmatpush1.bf16.msra.mxu1 %v3598_v16  ;;  %v3652_v16 = vld [vmem:[%s5440_s3 + $0xc] ss:$16 sps:$4 sm:$0xff]  }
  0x1e   :  { %231 = vmatprep.subr.bf16.mxu1 %v3599_v17  ;;  %v3647_v17 = vld [vmem:[%s5440_s3] ss:$16 sps:$4 sm:$0xff]  }
  0x1f   :  { %723 = vmatpush1.bf16.msra.mxu0 %v3629_v5 }
  0x20   :  { %724 = vmatprep.subr.bf16.mxu0 %v3637_v7 }
  0x21   :  { %232 = vmatpush1.bf16.msra.mxu1 %v3601_v18  ;;  %v3650_v18 = vld [vmem:[%s5440_s3 + $0x8] ss:$16 sps:$4 sm:$0xff]  }
  0x22   :  { %233 = vmatprep.subr.bf16.mxu1 %v3602_v19  ;;  %v3655_v19 = vld [vmem:[%s5440_s3 + $0x1e4] ss:$16 sps:$4 sm:$0xff]  }
  0x23   :  { %725 = vmatpush1.bf16.msra.mxu0 %v3635_v9 }
  0x24   :  { %726 = vmatprep.subr.bf16.mxu0 %v3643_v11 }
  0x25   :  { %234 = vmatpush1.bf16.msra.mxu1 %v3604_v21  ;;  %v3653_v21 = vld [vmem:[%s5440_s3 + $0x1e0] ss:$16 sps:$4 sm:$0xff]  }
  0x26   :  { %755 = vmatprep.subr.bf16.mxu1 %v3610_v24  ;;  %v3664_v24 = vld [vmem:[%s5440_s3 + $0x1cc] ss:$16 sps:$4 sm:$0xff]  }
  0x27   :  { %727 = vmatpush1.bf16.msra.mxu0 %v3641_v13 }
  0x28   :  { %728 = vmatprep.subr.bf16.mxu0 %v3649_v15 }
  0x2b   :  { %729 = vmatpush1.bf16.msra.mxu0 %v3647_v17 }
  0x2c   :  { %730 = vmatprep.subr.bf16.mxu0 %v3655_v19 }
  0x2f   :  { %731 = vmatpush2.bf16.msra.mxu0 %v3653_v21 }
  0x30   :  { %732 = vmatprep.subr.bf16.mxu0 %v3661_v23 }
  0xc6   :  { %v79_v25 = vpop.f32.mrf.mxu0 }
  0xc7   :  { %v85_v26 = vrot.slane %v79_v25, 4 }
  0xc8   :  { %v3574_v27 = vpop.f32.mrf.mxu0 }
  0xc9   :  { %v86_v28 = vadd.f32 %v85_v26, %v79_v25  ;;  %v3662_v26 = vld [vmem:[%s5440_s3 + $0x1c8] ss:$16 sps:$4 sm:$0xff]   ;;  %v3667_v27 = vld [vmem:[%s5440_s3 + $0x1a4] ss:$16 sps:$4 sm:$0xff]  }
  0xca   :  { %v82_v29 = vpop.f32.mrf.mxu0 }
  0xcb   :  { %v87_v30 = vrot.slane %v86_v28, 2  ;;  %v3665_v29 = vld [vmem:[%s5440_s3 + $0x1a0] ss:$16 sps:$4 sm:$0xff]  }
  0xcc   :  { %v3575_v31 = vpop.f32.mrf.mxu0 }
  0xcd   :  { %v88_v32 = vadd.f32 %v87_v30, %v86_v28  ;;  %v3670_v28 = vld [vmem:[%s5440_s3 + $0x1ac] ss:$16 sps:$4 sm:$0xff]   ;;  %v3668_v30 = vld [vmem:[%s5440_s3 + $0x1a8] ss:$16 sps:$4 sm:$0xff]   ;;  %v3673_v31 = vld [vmem:[%s5440_s3 + $0x184] ss:$16 sps:$4 sm:$0xff]  }
  0xcf   :  { %v89_v33 = vrot.slane %v88_v32, 1 }
  0xd1   :  { %v90_v34 = vadd.f32 %v89_v33, %v88_v32  ;;  %v3676_v32 = vld [vmem:[%s5440_s3 + $0x18c] ss:$16 sps:$4 sm:$0xff]   ;;  %v3671_v33 = vld [vmem:[%s5440_s3 + $0x180] ss:$16 sps:$4 sm:$0xff]  }
  0xd3   :  { %v92_v35 = vmul.f32 0.125, %v90_v34  ;;  %v3674_v34 = vld [vmem:[%s5440_s3 + $0x188] ss:$16 sps:$4 sm:$0xff]  }
  0xd5   :  { %v93_v36 = vsub.f32 %v79_v25, %v92_v35  ;;  %v3659_v25 = vld [vmem:[%s5440_s3 + $0x1c0] ss:$16 sps:$4 sm:$0xff]   ;;  %v3679_v35 = vld [vmem:[%s5440_s3 + $0x164] ss:$16 sps:$4 sm:$0xff]  }
  0xd6   :  { %733 = vmatpush2.bf16.msra.mxu0 %v3659_v25 }
  0xd7   :  { %v94_v37 = vmul.f32 %v93_v36, %v93_v36  ;;  %734 = vmatprep.subr.bf16.mxu0 %v3667_v27 }
  0xd9   :  { %v95_v38 = vrot.slane %v94_v37, 4 }
  0xda   :  { %735 = vmatpush2.bf16.msra.mxu0 %v3665_v29 }
  0xdb   :  { %v96_v39 = vadd.f32 %v95_v38, %v94_v37  ;;  %736 = vmatprep.subr.bf16.mxu0 %v3673_v31  ;;  %v3677_v37 = vld [vmem:[%s5440_s3 + $0x160] ss:$16 sps:$4 sm:$0xff]   ;;  %v3680_v38 = vld [vmem:[%s5440_s3 + $0x168] ss:$16 sps:$4 sm:$0xff]  }
  0xdd   :  { %v97_v40 = vrot.slane %v96_v39, 2 }
  0xde   :  { %737 = vmatpush2.bf16.msra.mxu0 %v3671_v33 }
  0xdf   :  { %v98_v41 = vadd.f32 %v97_v40, %v96_v39  ;;  %738 = vmatprep.subr.bf16.mxu0 %v3679_v35  ;;  %v3685_v39 = vld [vmem:[%s5440_s3 + $0x144] ss:$16 sps:$4 sm:$0xff]   ;;  %v3688_v40 = vld [vmem:[%s5440_s3 + $0x14c] ss:$16 sps:$4 sm:$0xff]  }
  0xe1   :  { %v99_v42 = vrot.slane %v98_v41, 1 }
  0xe2   :  { %739 = vmatpush2.bf16.msra.mxu0 %v3677_v37 }
  0xe3   :  { %v100_v43 = vadd.f32 %v99_v42, %v98_v41  ;;  %v3683_v41 = vld [vmem:[%s5440_s3 + $0x140] ss:$16 sps:$4 sm:$0xff]   ;;  %v3686_v42 = vld [vmem:[%s5440_s3 + $0x148] ss:$16 sps:$4 sm:$0xff]   ;;  %740 = vmatprep.subr.bf16.mxu0 %v3685_v39 }
  0xe5   :  { %v101_v44 = vmul.f32 0.125, %v100_v43  ;;  %v3689_v43 = vld [vmem:[%s5440_s3 + $0x120] ss:$16 sps:$4 sm:$0xff]  }
  0xe6   :  { %741 = vmatpush2.bf16.msra.mxu0 %v3683_v41 }
  0xe7   :  { %v102_v45 = vadd.f32 1e-05, %v101_v44  ;;  %v3691_v44 = vld [vmem:[%s5440_s3 + $0x124] ss:$16 sps:$4 sm:$0xff]  }
  0xe8   :  { %742 = vmatprep.subr.bf16.mxu0 %v3691_v44 }
  0xe9   :  { %3701 = vrsqrt.f32 %v102_v45  ;;  %v3692_v45 = vld [vmem:[%s5440_s3 + $0x128] ss:$16 sps:$4 sm:$0xff]  }
  0xea   :  { %743 = vmatpush2.bf16.msra.mxu0 %v3689_v43 }
  0xf6   :  { %v3702_v46 = vpop.eup %3701 }
  0xf7   :  { %v104_v48 = vmul.f32 %v3702_v46, %v93_v36  ;;  %v3682_v36 = vld [vmem:[%s5440_s3 + $0x16c] ss:$16 sps:$4 sm:$0xff]  }
  0xf8   :  { %v3694_v46 = vld [vmem:[%s5440_s3 + $0x12c] ss:$16 sps:$4 sm:$0xff]  }
  0xf9   :  { %v112_v50 = vmul.f32 %v3398_v47, %v104_v48  ;;  %v3697_v47 = vld [vmem:[%s5440_s3 + $0x104] ss:$16 sps:$4 sm:$0xff]   ;;  %v3700_v48 = vld [vmem:[%s5440_s3 + $0x10c] ss:$16 sps:$4 sm:$0xff]  }
  0xfa   :  { %744 = vmatprep.subr.bf16.mxu0 %v3697_v47 }
  0xfb   :  { %v120_v51 = vadd.f32 %v3399_v49, %v112_v50  ;;  %v3695_v49 = vld [vmem:[%s5440_s3 + $0x100] ss:$16 sps:$4 sm:$0xff]   ;;  %v3698_v50 = vld [vmem:[%s5440_s3 + $0x108] ss:$16 sps:$4 sm:$0xff]  }
  0xfc   :  { %745 = vmatpush2.bf16.msra.mxu0 %v3695_v49  ;;  %v1016_v49 = vld [vmem:[%s5441_s4 + $0x2c0] sm:$0xff] }
  0xfd   :  { %v121_v52 = vmax.f32 %v120_v51, 0.0  ;;  %v4053_v51 = vld [vmem:[%s5441_s4 + $0xc8] sm:$0xff] }
  0xff   :  { %v138_v54 = vpack.c.bf16 %v121_v52, %v121_v52  ;;  %v4058_v52 = vld [vmem:[%s5441_s4 + $0x2c8] sm:$0xff] }
 0x101   :  { %252 = vmatmul.mubr.bf16.vlgmr.msra.gmra.mxu1 %v138_v54  ;;  %v1241_v54 = vunpack.c.h.s8.bf16 %v4058_v52 }
 0x102   :  { %756 = vmatpush1.bf16.msra.mxu1 %v3608_v53  ;;  %v1113_v53 = vunpack.c.h.s8.bf16 %v4053_v51 }
 0x103   :  { %757 = vmatprep.subr.bf16.mxu1 %v3616_v56 }
 0x104   :  { %1317 = vmatprep.subr.bf16.mxu0 %v1113_v53 }
 0x106   :  { %758 = vmatpush1.bf16.msra.mxu1 %v3614_v58 }
 0x107   :  { %759 = vmatprep.subr.bf16.mxu1 %v3622_v60 }
 0x10a   :  { %760 = vmatpush1.bf16.msra.mxu1 %v3620_v62 }
 0x10b   :  { %761 = vmatprep.subr.bf16.mxu1 %v3628_v0 }
 0x10e   :  { %762 = vmatpush1.bf16.msra.mxu1 %v3626_v2 }
 0x10f   :  { %763 = vmatprep.subr.bf16.mxu1 %v3634_v4 }
 0x112   :  { %764 = vmatpush1.bf16.msra.mxu1 %v3632_v6 }
 0x113   :  { %765 = vmatprep.subr.bf16.mxu1 %v3640_v8 }
 0x116   :  { %766 = vmatpush1.bf16.msra.mxu1 %v3638_v10 }
 0x117   :  { %767 = vmatprep.subr.bf16.mxu1 %v3646_v12 }
 0x11a   :  { %768 = vmatpush1.bf16.msra.mxu1 %v3644_v14 }
 0x11b   :  { %769 = vmatprep.subr.bf16.mxu1 %v3652_v16 }
 0x11e   :  { %770 = vmatpush1.bf16.msra.mxu1 %v3650_v18 }
 0x11f   :  { %771 = vmatprep.subr.bf16.mxu1 %v3658_v20 }
 0x122   :  { %772 = vmatpush2.bf16.msra.mxu1 %v3656_v22 }
 0x123   :  { %773 = vmatprep.subr.bf16.mxu1 %v3664_v24 }
 0x126   :  { %774 = vmatpush2.bf16.msra.mxu1 %v3662_v26 }
 0x127   :  { %775 = vmatprep.subr.bf16.mxu1 %v3670_v28  ;;  %v300_v28 = vlaneseq }
 0x12a   :  { %776 = vmatpush2.bf16.msra.mxu1 %v3668_v30  ;;  %v4062_v30 = vshrl.u32 %v300_v28, 7 }
 0x12b   :  { %777 = vmatprep.subr.bf16.mxu1 %v3676_v32  ;;  %v298_v32 = vld [vmem:[%s5443_s6 + $0x2] sm:$0x3] }
 0x12c   :  { %v4065_v31 = vsub.s32 0, %v4062_v30  ;;  %v4071_v33 = vsub.s32 1, %v4062_v30 }
 0x12e   :  { %778 = vmatpush2.bf16.msra.mxu1 %v3674_v34  ;;  %v312_v34 = vld [vmem:[%s5443_s6 + $0x4] sm:$0x3]  ;;  %v303_v35 = vrot.slane %v298_v32, %v4065_v31 }
 0x12f   :  { %779 = vmatprep.subr.bf16.mxu1 %v3682_v36  ;;  %v317_v39 = vrot.slane %v312_v34, %v4065_v31  ;;  %v321_v43 = vrot.slane %v312_v34, %v4071_v33  ;;  %v985_v34 = vld [vmem:[%s5441_s4 + $0x1c8] sm:$0xff] }
 0x132   :  { %780 = vmatpush2.bf16.msra.mxu1 %v3680_v38  ;;  %v307_v38 = vrot.slane %v298_v32, %v4071_v33 }
 0x133   :  { %781 = vmatprep.subr.bf16.mxu1 %v3688_v40 }
 0x136   :  { %782 = vmatpush2.bf16.msra.mxu1 %v3686_v42 }
 0x137   :  { %783 = vmatprep.subr.bf16.mxu1 %v3694_v46 }
 0x13a   :  { %784 = vmatpush2.bf16.msra.mxu1 %v3692_v45 }
 0x13b   :  { %785 = vmatprep.subr.bf16.mxu1 %v3700_v48  ;;  %v952_v48 = vld [vmem:[%s5441_s4 + $0xc0] sm:$0xff] }
 0x13e   :  { %786 = vmatpush2.bf16.msra.mxu1 %v3698_v50 }
 0x13f   :  { %1358 = vmatprep.subr.bf16.mxu1 %v1241_v54  ;;  %v1112_v54 = vunpack.c.h.s8.bf16 %v952_v48 }
 0x1c1   :  { %v253_v55 = vpop.f32.mrf.mxu1 }
 0x1c2   :  { %v260_v56 = vrot.slane %v253_v55, 4 }
 0x1c3   :  { %v255_v57 = vpop.f32.mrf.mxu1 }
 0x1c4   :  { %v261_v58 = vadd.f32 %v260_v56, %v253_v55  ;;  %v266_v59 = vrot.slane %v255_v57, 4 }
 0x1c5   :  { %v257_v60 = vpop.f32.mrf.mxu1 }
 0x1c6   :  { %v262_v61 = vrot.slane %v261_v58, 2  ;;  %v267_v62 = vadd.f32 %v266_v59, %v255_v57  ;;  %v1104_v59 = vunpack.c.l.s8.bf16 %v952_v48  ;;  %v1232_v60 = vunpack.c.l.s8.bf16 %v1016_v49 }
 0x1c7   :  { %v258_v63 = vpop.f32.mrf.mxu1 }
 0x1c8   :  { %v263_v0 = vadd.f32 %v262_v61, %v261_v58  ;;  %v268_v1 = vrot.slane %v267_v62, 2  ;;  %v1233_v58 = vunpack.c.l.s8.bf16 %v4058_v52  ;;  %v945_v61 = vld [vmem:[%s5441_s4 + $0x88] sm:$0xff]  ;;  %v1008_v52 = vld [vmem:[%s5441_s4 + $0x280] sm:$0xff] }
 0x1c9   :  { %v1097_v63 = vunpack.c.h.s8.bf16 %v945_v61 }
 0x1ca   :  { %v264_v2 = vrot.slane %v263_v0, 1  ;;  %v269_v3 = vadd.f32 %v268_v1, %v267_v62  ;;  %v1009_v62 = vld [vmem:[%s5441_s4 + $0x288] sm:$0xff] }
 0x1cc   :  { %v265_v4 = vadd.f32 %v264_v2, %v263_v0  ;;  %v270_v5 = vrot.slane %v269_v3, 1  ;;  %v1225_v0 = vunpack.c.h.s8.bf16 %v1009_v62  ;;  %v1224_v2 = vunpack.c.h.s8.bf16 %v1008_v52 }
 0x1ce   :  { %v272_v6 = vmul.f32 0.125, %v265_v4  ;;  %v271_v7 = vadd.f32 %v270_v5, %v269_v3  ;;  %v1089_v3 = vunpack.c.l.s8.bf16 %v945_v61  ;;  %v1217_v4 = vunpack.c.l.s8.bf16 %v1009_v62  ;;  %v1033_v61 = vld [vmem:[%s5441_s4 + $0x348] sm:$0xff] }
 0x1d0   :  { %v274_v8 = vsub.f32 %v253_v55, %v272_v6  ;;  %v273_v9 = vmul.f32 0.125, %v271_v7  ;;  %v1240_v55 = vunpack.c.h.s8.bf16 %v1016_v49  ;;  %v1216_v6 = vunpack.c.l.s8.bf16 %v1008_v52  ;;  %v937_v7 = vld [vmem:[%s5441_s4 + $0x48] sm:$0xff] }
 0x1d2   :  { %v276_v10 = vmul.f32 %v274_v8, %v274_v8  ;;  %v275_v11 = vsub.f32 %v255_v57, %v273_v9  ;;  %v1105_v57 = vunpack.c.l.s8.bf16 %v4053_v51  ;;  %v944_v51 = vld [vmem:[%s5441_s4 + $0x80] sm:$0xff]  ;;  %v1081_v9 = vunpack.c.h.s8.bf16 %v937_v7 }
 0x1d3   :  { %v1096_v1 = vunpack.c.h.s8.bf16 %v944_v51  ;;  %v1088_v5 = vunpack.c.l.s8.bf16 %v944_v51  ;;  %v1032_v51 = vld [vmem:[%s5441_s4 + $0x340] sm:$0xff] }
 0x1d4   :  { %v278_v12 = vrot.slane %v276_v10, 4  ;;  %v277_v13 = vmul.f32 %v275_v11, %v275_v11 }
 0x1d6   :  { %v279_v14 = vadd.f32 %v278_v12, %v276_v10  ;;  %v284_v15 = vrot.slane %v277_v13, 4  ;;  %v1000_v12 = vld [vmem:[%s5441_s4 + $0x240] sm:$0xff] }
 0x1d8   :  { %v280_v16 = vrot.slane %v279_v14, 2  ;;  %v285_v17 = vadd.f32 %v284_v15, %v277_v13  ;;  %v1073_v15 = vunpack.c.l.s8.bf16 %v937_v7  ;;  %v1025_v7 = vld [vmem:[%s5441_s4 + $0x308] sm:$0xff] }
 0x1da   :  { %v281_v18 = vadd.f32 %v280_v16, %v279_v14  ;;  %v286_v19 = vrot.slane %v285_v17, 2  ;;  %v1208_v14 = vunpack.c.h.s8.bf16 %v1000_v12 }
 0x1dc   :  { %v282_v20 = vrot.slane %v281_v18, 1  ;;  %v287_v21 = vadd.f32 %v286_v19, %v285_v17  ;;  %v929_v19 = vld [vmem:[%s5441_s4 + $0x8] sm:$0xff] }
 0x1de   :  { %v283_v22 = vadd.f32 %v282_v20, %v281_v18  ;;  %v288_v23 = vrot.slane %v287_v21, 1  ;;  %v1200_v18 = vunpack.c.l.s8.bf16 %v1000_v12  ;;  %v993_v20 = vld [vmem:[%s5441_s4 + $0x208] sm:$0xff] }
 0x1df   :  { %v1185_v28 = vunpack.c.l.s8.bf16 %v993_v20 }
 0x1e0   :  { %v290_v24 = vmul.f32 0.125, %v283_v22  ;;  %v289_v25 = vadd.f32 %v288_v23, %v287_v21  ;;  %v1065_v21 = vunpack.c.h.s8.bf16 %v929_v19  ;;  %v1193_v22 = vunpack.c.h.s8.bf16 %v993_v20  ;;  %v928_v23 = vld [vmem:[%s5441_s4] sm:$0xff] }
 0x1e2   :  { %v292_v26 = vadd.f32 1e-05, %v290_v24  ;;  %v291_v27 = vmul.f32 0.125, %v289_v25  ;;  %v992_v24 = vld [vmem:[%s5441_s4 + $0x200] sm:$0xff]  ;;  %v1064_v25 = vunpack.c.h.s8.bf16 %v928_v23 }
 0x1e3   :  { %v1184_v32 = vunpack.c.l.s8.bf16 %v992_v24 }
 0x1e4   :  { %3703 = vrsqrt.f32 %v292_v26  ;;  %v293_v29 = vadd.f32 1e-05, %v291_v27  ;;  %v1192_v26 = vunpack.c.h.s8.bf16 %v992_v24  ;;  %v1057_v27 = vunpack.c.l.s8.bf16 %v929_v19  ;;  %v4180_v19 = vld [vmem:[%s5441_s4 + $0x2d8] sm:$0xff] }
 0x1e6   :  { %3705 = vrsqrt.f32 %v293_v29  ;;  %v1056_v29 = vunpack.c.l.s8.bf16 %v928_v23 }
 0x1f1   :  { %v3704_v36 = vpop.eup %3703 }
 0x1f2   :  { %v296_v37 = vmul.f32 %v3704_v36, %v274_v8  ;;  %v1001_v8 = vld [vmem:[%s5441_s4 + $0x248] sm:$0xff]  ;;  %v1177_v36 = vunpack.c.h.s8.bf16 %v985_v34 }
 0x1f3   :  { %v3706_v40 = vpop.eup %3705  ;;  %v1209_v10 = vunpack.c.h.s8.bf16 %v1001_v8  ;;  %v1201_v16 = vunpack.c.l.s8.bf16 %v1001_v8 }
 0x1f4   :  { %v310_v41 = vmul.f32 %v303_v35, %v296_v37  ;;  %v297_v42 = vmul.f32 %v3706_v40, %v275_v11  ;;  %v936_v11 = vld [vmem:[%s5441_s4 + $0x40] sm:$0xff]  ;;  %v1049_v35 = vld [vmem:[%s5441_s4 + $0x3c8] sm:$0xff] }
 0x1f5   :  { %v1080_v13 = vunpack.c.h.s8.bf16 %v936_v11  ;;  %v1072_v17 = vunpack.c.l.s8.bf16 %v936_v11  ;;  %v1305_v37 = vunpack.c.h.s8.bf16 %v1049_v35  ;;  %v1024_v11 = vld [vmem:[%s5441_s4 + $0x300] sm:$0xff] }
 0x1f6   :  { %v311_v44 = vmul.f32 %v307_v38, %v297_v42  ;;  %v324_v45 = vadd.f32 %v317_v39, %v310_v41  ;;  %v984_v38 = vld [vmem:[%s5441_s4 + $0x1c0] sm:$0xff]  ;;  %v1169_v42 = vunpack.c.l.s8.bf16 %v985_v34 }
 0x1f7   :  { %v1048_v39 = vld [vmem:[%s5441_s4 + $0x3c0] sm:$0xff]  ;;  %v1176_v40 = vunpack.c.h.s8.bf16 %v984_v38 }
 0x1f8   :  { %v325_v46 = vadd.f32 %v321_v43, %v311_v44  ;;  %v326_v47 = vmax.f32 %v324_v45, 0.0  ;;  %v1304_v41 = vunpack.c.h.s8.bf16 %v1048_v39  ;;  %v1297_v43 = vunpack.c.l.s8.bf16 %v1049_v35 }
 0x1f9   :  { %v1168_v44 = vunpack.c.l.s8.bf16 %v984_v38  ;;  %v1296_v45 = vunpack.c.l.s8.bf16 %v1048_v39 }
 0x1fa   :  { %v327_v50 = vmax.f32 %v325_v46, 0.0  ;;  %v392_v56 = vpack.c.bf16 %v326_v47, %v326_v47  ;;  %v977_v46 = vld [vmem:[%s5441_s4 + $0x188] sm:$0xff] }
 0x1fb   :  { %v1041_v47 = vld [vmem:[%s5441_s4 + $0x388] sm:$0xff]  ;;  %v1161_v48 = vunpack.c.h.s8.bf16 %v977_v46 }
 0x1fc   :  { %v393_v53 = vpack.c.bf16 %v327_v50, %v327_v50  ;;  %v1289_v49 = vunpack.c.h.s8.bf16 %v1041_v47  ;;  %v976_v50 = vld [vmem:[%s5441_s4 + $0x180] sm:$0xff] }
 0x1fe   :  { %746 = vmatprep.mubr.bf16.mxu0 %v393_v53  ;;  %787 = vmatprep.mubr.bf16.mxu1 %v393_v53  ;;  %v1040_v53 = vld [vmem:[%s5441_s4 + $0x380] sm:$0xff] }
 0x1ff   :  { %747 = vmatmul.mubr.bf16.vlgmr.msra.gmra.mxu0 %v392_v56  ;;  %788 = vmatmul.mubr.bf16.vlgmr.msra.gmra.mxu1 %v392_v56  ;;  %v1153_v56 = vunpack.c.l.s8.bf16 %v977_v46 }
 0x200   :  { %1318 = vmatpush1.bf16.msra.mxu0 %v1112_v54  ;;  %1359 = vmatpush1.bf16.msra.mxu1 %v1240_v55  ;;  %v1160_v54 = vunpack.c.h.s8.bf16 %v976_v50  ;;  %v1288_v55 = vunpack.c.h.s8.bf16 %v1040_v53 }
 0x201   :  { %1319 = vmatprep.subr.bf16.mxu0 %v1105_v57  ;;  %1360 = vmatprep.subr.bf16.mxu1 %v1233_v58  ;;  %v1281_v57 = vunpack.c.l.s8.bf16 %v1041_v47  ;;  %v1152_v58 = vunpack.c.l.s8.bf16 %v976_v50 }
 0x204   :  { %1320 = vmatpush1.bf16.msra.mxu0 %v1104_v59  ;;  %1361 = vmatpush1.bf16.msra.mxu1 %v1232_v60  ;;  %v1280_v59 = vunpack.c.l.s8.bf16 %v1040_v53  ;;  %v969_v60 = vld [vmem:[%s5441_s4 + $0x148] sm:$0xff] }
 0x205   :  { %1321 = vmatprep.subr.bf16.mxu0 %v1097_v63  ;;  %1362 = vmatprep.subr.bf16.mxu1 %v1225_v0  ;;  %v1145_v62 = vunpack.c.h.s8.bf16 %v969_v60  ;;  %v1273_v63 = vunpack.c.h.s8.bf16 %v1033_v61  ;;  %v968_v0 = vld [vmem:[%s5441_s4 + $0x140] sm:$0xff] }
 0x206   :  { %v1144_v52 = vunpack.c.h.s8.bf16 %v968_v0 }
 0x208   :  { %1322 = vmatpush1.bf16.msra.mxu0 %v1096_v1  ;;  %1363 = vmatpush1.bf16.msra.mxu1 %v1224_v2  ;;  %v1272_v1 = vunpack.c.h.s8.bf16 %v1032_v51  ;;  %v1137_v2 = vunpack.c.l.s8.bf16 %v969_v60 }
 0x209   :  { %1323 = vmatprep.subr.bf16.mxu0 %v1089_v3  ;;  %1364 = vmatprep.subr.bf16.mxu1 %v1217_v4  ;;  %v1265_v3 = vunpack.c.l.s8.bf16 %v1033_v61  ;;  %v1136_v4 = vunpack.c.l.s8.bf16 %v968_v0 }
 0x20c   :  { %1324 = vmatpush1.bf16.msra.mxu0 %v1088_v5  ;;  %1365 = vmatpush1.bf16.msra.mxu1 %v1216_v6  ;;  %v1264_v5 = vunpack.c.l.s8.bf16 %v1032_v51  ;;  %v961_v6 = vld [vmem:[%s5441_s4 + $0x108] sm:$0xff] }
 0x20d   :  { %1325 = vmatprep.subr.bf16.mxu0 %v1081_v9  ;;  %1366 = vmatprep.subr.bf16.mxu1 %v1209_v10  ;;  %v1129_v8 = vunpack.c.h.s8.bf16 %v961_v6  ;;  %v1257_v9 = vunpack.c.h.s8.bf16 %v1025_v7  ;;  %v960_v10 = vld [vmem:[%s5441_s4 + $0x100] sm:$0xff] }
 0x20e   :  { %v1128_v12 = vunpack.c.h.s8.bf16 %v960_v10 }
 0x210   :  { %1326 = vmatpush1.bf16.msra.mxu0 %v1080_v13  ;;  %1367 = vmatpush1.bf16.msra.mxu1 %v1208_v14  ;;  %v1256_v13 = vunpack.c.h.s8.bf16 %v1024_v11  ;;  %v1121_v14 = vunpack.c.l.s8.bf16 %v961_v6 }
 0x211   :  { %1327 = vmatprep.subr.bf16.mxu0 %v1073_v15  ;;  %1368 = vmatprep.subr.bf16.mxu1 %v1201_v16  ;;  %v1249_v15 = vunpack.c.l.s8.bf16 %v1025_v7  ;;  %v1120_v16 = vunpack.c.l.s8.bf16 %v960_v10 }
 0x214   :  { %1328 = vmatpush1.bf16.msra.mxu0 %v1072_v17  ;;  %1369 = vmatpush1.bf16.msra.mxu1 %v1200_v18  ;;  %v1248_v17 = vunpack.c.l.s8.bf16 %v1024_v11  ;;  %v4175_v18 = vld [vmem:[%s5441_s4 + $0xd8] sm:$0xff] }
 0x215   :  { %1329 = vmatprep.subr.bf16.mxu0 %v1065_v21  ;;  %1370 = vmatprep.subr.bf16.mxu1 %v1193_v22  ;;  %v1115_v20 = vunpack.c.h.s8.bf16 %v4175_v18  ;;  %v1243_v21 = vunpack.c.h.s8.bf16 %v4180_v19 }
 0x218   :  { %1330 = vmatpush1.bf16.msra.mxu0 %v1064_v25  ;;  %1371 = vmatpush1.bf16.msra.mxu1 %v1192_v26 }
 0x219   :  { %1331 = vmatprep.subr.bf16.mxu0 %v1057_v27  ;;  %1372 = vmatprep.subr.bf16.mxu1 %v1185_v28 }
 0x21c   :  { %1332 = vmatpush1.bf16.msra.mxu0 %v1056_v29  ;;  %1373 = vmatpush1.bf16.msra.mxu1 %v1184_v32 }
 0x21d   :  { %1333 = vmatprep.subr.bf16.mxu0 %v1177_v36  ;;  %1374 = vmatprep.subr.bf16.mxu1 %v1305_v37 }
 0x220   :  { %1334 = vmatpush2.bf16.msra.mxu0 %v1176_v40  ;;  %1375 = vmatpush2.bf16.msra.mxu1 %v1304_v41 }
 0x221   :  { %1335 = vmatprep.subr.bf16.mxu0 %v1169_v42  ;;  %1376 = vmatprep.subr.bf16.mxu1 %v1297_v43 }
 0x224   :  { %1336 = vmatpush2.bf16.msra.mxu0 %v1168_v44  ;;  %1377 = vmatpush2.bf16.msra.mxu1 %v1296_v45 }
 0x225   :  { %1337 = vmatprep.subr.bf16.mxu0 %v1161_v48  ;;  %1378 = vmatprep.subr.bf16.mxu1 %v1289_v49 }
 0x228   :  { %1338 = vmatpush2.bf16.msra.mxu0 %v1160_v54  ;;  %1379 = vmatpush2.bf16.msra.mxu1 %v1288_v55 }
 0x229   :  { %1339 = vmatprep.subr.bf16.mxu0 %v1153_v56  ;;  %1380 = vmatprep.subr.bf16.mxu1 %v1281_v57 }
 0x22c   :  { %1340 = vmatpush2.bf16.msra.mxu0 %v1152_v58  ;;  %1381 = vmatpush2.bf16.msra.mxu1 %v1280_v59 }
 0x22d   :  { %1341 = vmatprep.subr.bf16.mxu0 %v1145_v62  ;;  %1382 = vmatprep.subr.bf16.mxu1 %v1273_v63 }
 0x230   :  { %1342 = vmatpush2.bf16.msra.mxu0 %v1144_v52  ;;  %1383 = vmatpush2.bf16.msra.mxu1 %v1272_v1 }
 0x231   :  { %1343 = vmatprep.subr.bf16.mxu0 %v1137_v2  ;;  %1384 = vmatprep.subr.bf16.mxu1 %v1265_v3 }
 0x234   :  { %1344 = vmatpush2.bf16.msra.mxu0 %v1136_v4  ;;  %1385 = vmatpush2.bf16.msra.mxu1 %v1264_v5 }
 0x235   :  { %1345 = vmatprep.subr.bf16.mxu0 %v1129_v8  ;;  %1386 = vmatprep.subr.bf16.mxu1 %v1257_v9 }
 0x238   :  { %1346 = vmatpush2.bf16.msra.mxu0 %v1128_v12  ;;  %1387 = vmatpush2.bf16.msra.mxu1 %v1256_v13 }
 0x239   :  { %1347 = vmatprep.subr.bf16.mxu0 %v1121_v14  ;;  %1388 = vmatprep.subr.bf16.mxu1 %v1249_v15 }
 0x23c   :  { %1348 = vmatpush2.bf16.msra.mxu0 %v1120_v16  ;;  %1389 = vmatpush2.bf16.msra.mxu1 %v1248_v17 }
 0x23d   :  { %1399 = vmatprep.subr.bf16.mxu0 %v1115_v20  ;;  %1440 = vmatprep.subr.bf16.mxu1 %v1243_v21 }
 0x2bf   :  { %v748_v22 = vpop.f32.mrf.mxu0  ;;  %v789_v23 = vpop.f32.mrf.mxu1 }
 0x2c0   :  { %v796_v24 = vrot.slane %v748_v22, 4  ;;  %v808_v25 = vrot.slane %v789_v23, 4 }
 0x2c1   :  { %v750_v26 = vpop.f32.mrf.mxu0  ;;  %v791_v27 = vpop.f32.mrf.mxu1 }
 0x2c2   :  { %v797_v28 = vadd.f32 %v796_v24, %v748_v22  ;;  %v809_v29 = vadd.f32 %v808_v25, %v789_v23  ;;  %v802_v32 = vrot.slane %v750_v26, 4  ;;  %v814_v34 = vrot.slane %v791_v27, 4 }
 0x2c3   :  { %v752_v35 = vpop.f32.mrf.mxu0  ;;  %v793_v36 = vpop.f32.mrf.mxu1 }
 0x2c4   :  { %v798_v37 = vrot.slane %v797_v28, 2  ;;  %v810_v38 = vrot.slane %v809_v29, 2  ;;  %v803_v39 = vadd.f32 %v802_v32, %v750_v26  ;;  %v815_v40 = vadd.f32 %v814_v34, %v791_v27 }
 0x2c5   :  { %v753_v41 = vpop.f32.mrf.mxu0  ;;  %v794_v42 = vpop.f32.mrf.mxu1 }
 0x2c6   :  { %v799_v43 = vadd.f32 %v798_v37, %v797_v28  ;;  %v811_v44 = vadd.f32 %v810_v38, %v809_v29  ;;  %v804_v45 = vrot.slane %v803_v39, 2  ;;  %v816_v46 = vrot.slane %v815_v40, 2  ;;  %v872_v42 = vld [vmem:[%s5443_s6 + $0x6] sm:$0xf] }
 0x2c8   :  { %v800_v47 = vrot.slane %v799_v43, 1  ;;  %v812_v48 = vrot.slane %v811_v44, 1  ;;  %v805_v49 = vadd.f32 %v804_v45, %v803_v39  ;;  %v817_v50 = vadd.f32 %v816_v46, %v815_v40  ;;  %v898_v45 = vld [vmem:[%s5443_s6 + $0xa] sm:$0xf] }
 0x2c9   :  { %v877_v46 = vrot.slane %v872_v42, %v4065_v31 }
 0x2ca   :  { %v801_v53 = vadd.f32 %v800_v47, %v799_v43  ;;  %v813_v54 = vadd.f32 %v812_v48, %v811_v44  ;;  %v806_v55 = vrot.slane %v805_v49, 1  ;;  %v818_v56 = vrot.slane %v817_v50, 1 }
 0x2cb   :  { %v4188_v43 = vsub.s32 2, %v4062_v30  ;;  %v4191_v44 = vsub.s32 3, %v4062_v30 }
 0x2cc   :  { %v820_v57 = vmul.f32 0.125, %v801_v53  ;;  %v822_v58 = vmul.f32 0.125, %v813_v54  ;;  %v807_v59 = vadd.f32 %v806_v55, %v805_v49  ;;  %v819_v60 = vadd.f32 %v818_v56, %v817_v50 }
 0x2cd   :  { %v885_v48 = vrot.slane %v872_v42, %v4188_v43  ;;  %v881_v53 = vrot.slane %v872_v42, %v4071_v33  ;;  %v903_v54 = vrot.slane %v898_v45, %v4065_v31 }
 0x2ce   :  { %v824_v61 = vsub.f32 %v748_v22, %v820_v57  ;;  %v826_v62 = vsub.f32 %v789_v23, %v822_v58  ;;  %v821_v63 = vmul.f32 0.125, %v807_v59  ;;  %v823_v0 = vmul.f32 0.125, %v819_v60 }
 0x2cf   :  { %v889_v57 = vrot.slane %v872_v42, %v4191_v44  ;;  %v911_v58 = vrot.slane %v898_v45, %v4188_v43  ;;  %v1002_v42 = vld [vmem:[%s5441_s4 + $0x250] sm:$0xff] }
 0x2d0   :  { %v828_v51 = vmul.f32 %v824_v61, %v824_v61  ;;  %v830_v52 = vmul.f32 %v826_v62, %v826_v62  ;;  %v825_v1 = vsub.f32 %v750_v26, %v821_v63  ;;  %v827_v2 = vsub.f32 %v791_v27, %v823_v0 }
 0x2d1   :  { %v907_v0 = vrot.slane %v898_v45, %v4071_v33 }
 0x2d2   :  { %v832_v3 = vrot.slane %v828_v51, 4  ;;  %v844_v4 = vrot.slane %v830_v52, 4  ;;  %v829_v5 = vmul.f32 %v825_v1, %v825_v1  ;;  %v831_v6 = vmul.f32 %v827_v2, %v827_v2 }
 0x2d4   :  { %v833_v7 = vadd.f32 %v832_v3, %v828_v51  ;;  %v845_v8 = vadd.f32 %v844_v4, %v830_v52  ;;  %v838_v9 = vrot.slane %v829_v5, 4  ;;  %v850_v10 = vrot.slane %v831_v6, 4 }
 0x2d5   :  { %v915_v3 = vrot.slane %v898_v45, %v4191_v44 }
 0x2d6   :  { %v834_v11 = vrot.slane %v833_v7, 2  ;;  %v846_v12 = vrot.slane %v845_v8, 2  ;;  %v839_v13 = vadd.f32 %v838_v9, %v829_v5  ;;  %v851_v14 = vadd.f32 %v850_v10, %v831_v6  ;;  %v954_v9 = vld [vmem:[%s5441_s4 + $0xd0] sm:$0xff] }
 0x2d8   :  { %v835_v15 = vadd.f32 %v834_v11, %v833_v7  ;;  %v847_v16 = vadd.f32 %v846_v12, %v845_v8  ;;  %v840_v17 = vrot.slane %v839_v13, 2  ;;  %v852_v20 = vrot.slane %v851_v14, 2 }
 0x2da   :  { %v836_v21 = vrot.slane %v835_v15, 1  ;;  %v848_v22 = vrot.slane %v847_v16, 1  ;;  %v841_v23 = vadd.f32 %v840_v17, %v839_v13  ;;  %v853_v24 = vadd.f32 %v852_v20, %v851_v14 }
 0x2db   :  { %v1114_v13 = vunpack.c.h.s8.bf16 %v954_v9  ;;  %v1107_v20 = vunpack.c.l.s8.bf16 %v4175_v18 }
 0x2dc   :  { %v837_v25 = vadd.f32 %v836_v21, %v835_v15  ;;  %v849_v26 = vadd.f32 %v848_v22, %v847_v16  ;;  %v842_v27 = vrot.slane %v841_v23, 1  ;;  %v854_v28 = vrot.slane %v853_v24, 1  ;;  %v947_v21 = vld [vmem:[%s5441_s4 + $0x98] sm:$0xff] }
 0x2dd   :  { %v1235_v22 = vunpack.c.l.s8.bf16 %v4180_v19 }
 0x2de   :  { %v856_v29 = vmul.f32 0.125, %v837_v25  ;;  %v858_v32 = vmul.f32 0.125, %v849_v26  ;;  %v843_v34 = vadd.f32 %v842_v27, %v841_v23  ;;  %v855_v35 = vadd.f32 %v854_v28, %v853_v24  ;;  %v1011_v23 = vld [vmem:[%s5441_s4 + $0x298] sm:$0xff]  ;;  %v946_v26 = vld [vmem:[%s5441_s4 + $0x90] sm:$0xff] }
 0x2df   :  { %v1106_v24 = vunpack.c.l.s8.bf16 %v954_v9  ;;  %v1099_v25 = vunpack.c.h.s8.bf16 %v947_v21  ;;  %v1227_v19 = vunpack.c.h.s8.bf16 %v1011_v23  ;;  %v1010_v27 = vld [vmem:[%s5441_s4 + $0x290] sm:$0xff]  ;;  %v1098_v28 = vunpack.c.h.s8.bf16 %v946_v26 }
 0x2e0   :  { %v860_v36 = vadd.f32 1e-05, %v856_v29  ;;  %v862_v37 = vadd.f32 1e-05, %v858_v32  ;;  %v857_v38 = vmul.f32 0.125, %v843_v34  ;;  %v859_v39 = vmul.f32 0.125, %v855_v35 }
 0x2e1   :  { %v1226_v29 = vunpack.c.h.s8.bf16 %v1010_v27  ;;  %v1091_v32 = vunpack.c.l.s8.bf16 %v947_v21  ;;  %v1219_v34 = vunpack.c.l.s8.bf16 %v1011_v23  ;;  %v939_v35 = vld [vmem:[%s5441_s4 + $0x58] sm:$0xff] }
 0x2e2   :  { %3707 = vrsqrt.f32 %v860_v36  ;;  %v861_v40 = vadd.f32 1e-05, %v857_v38  ;;  %v863_v41 = vadd.f32 1e-05, %v859_v39  ;;  %v1003_v36 = vld [vmem:[%s5441_s4 + $0x258] sm:$0xff]  ;;  %v1218_v38 = vunpack.c.l.s8.bf16 %v1010_v27 }
 0x2e3   :  { %3709 = vrsqrt.f32 %v862_v37  ;;  %v1090_v37 = vunpack.c.l.s8.bf16 %v946_v26  ;;  %v1083_v39 = vunpack.c.h.s8.bf16 %v939_v35  ;;  %v971_v26 = vld [vmem:[%s5441_s4 + $0x158] sm:$0xff] }
 0x2e4   :  { %3711 = vrsqrt.f32 %v861_v40  ;;  %v938_v40 = vld [vmem:[%s5441_s4 + $0x50] sm:$0xff] }
 0x2e5   :  { %3713 = vrsqrt.f32 %v863_v41  ;;  %v1211_v41 = vunpack.c.h.s8.bf16 %v1003_v36  ;;  %v1082_v45 = vunpack.c.h.s8.bf16 %v938_v40 }
 0x2ef   :  { %v3708_v47 = vpop.eup %3707 }
 0x2f0   :  { %v3710_v49 = vpop.eup %3709  ;;  %v868_v50 = vmul.f32 %v3708_v47, %v824_v61  ;;  %v1075_v47 = vunpack.c.l.s8.bf16 %v939_v35  ;;  %v1034_v35 = vld [vmem:[%s5441_s4 + $0x350] sm:$0xff] }
 0x2f1   :  { %v3712_v55 = vpop.eup %3711  ;;  %v870_v56 = vmul.f32 %v3710_v49, %v826_v62  ;;  %v931_v49 = vld [vmem:[%s5441_s4 + $0x18] sm:$0xff] }
 0x2f2   :  { %v3714_v59 = vpop.eup %3713  ;;  %v894_v60 = vmul.f32 %v877_v46, %v868_v50  ;;  %v869_v63 = vmul.f32 %v3712_v55, %v825_v1  ;;  %v1018_v1 = vld [vmem:[%s5441_s4 + $0x2d0] sm:$0xff]  ;;  %v1210_v46 = vunpack.c.h.s8.bf16 %v1002_v42  ;;  %v995_v50 = vld [vmem:[%s5441_s4 + $0x218] sm:$0xff]  ;;  %v1067_v55 = vunpack.c.h.s8.bf16 %v931_v49 }
 0x2f3   :  { %v896_v51 = vmul.f32 %v885_v48, %v870_v56  ;;  %v871_v52 = vmul.f32 %v3714_v59, %v827_v2  ;;  %v1242_v16 = vunpack.c.h.s8.bf16 %v1018_v1  ;;  %v1234_v18 = vunpack.c.l.s8.bf16 %v1018_v1  ;;  %v930_v56 = vld [vmem:[%s5441_s4 + $0x10] sm:$0xff]  ;;  %v1043_v1 = vld [vmem:[%s5441_s4 + $0x398] sm:$0xff] }
 0x2f4   :  { %v895_v61 = vmul.f32 %v881_v53, %v869_v63  ;;  %v920_v4 = vadd.f32 %v903_v54, %v894_v60  ;;  %v1203_v48 = vunpack.c.l.s8.bf16 %v1003_v36  ;;  %v1074_v53 = vunpack.c.l.s8.bf16 %v938_v40  ;;  %v963_v40 = vld [vmem:[%s5441_s4 + $0x118] sm:$0xff] }
 0x2f5   :  { %v897_v5 = vmul.f32 %v889_v57, %v871_v52  ;;  %v922_v6 = vadd.f32 %v911_v58, %v896_v51  ;;  %v1202_v54 = vunpack.c.l.s8.bf16 %v1002_v42  ;;  %v1195_v57 = vunpack.c.h.s8.bf16 %v995_v50  ;;  %v994_v58 = vld [vmem:[%s5441_s4 + $0x210] sm:$0xff]  ;;  %v987_v51 = vld [vmem:[%s5441_s4 + $0x1d8] sm:$0xff] }
 0x2f6   :  { %v921_v7 = vadd.f32 %v907_v0, %v895_v61  ;;  %v924_v62 = vmax.f32 %v920_v4, 0.0  ;;  %v1066_v59 = vunpack.c.h.s8.bf16 %v930_v56  ;;  %v1194_v60 = vunpack.c.h.s8.bf16 %v994_v58  ;;  %v1051_v52 = vld [vmem:[%s5441_s4 + $0x3d8] sm:$0xff] }
 0x2f7   :  { %v923_v8 = vadd.f32 %v915_v3, %v897_v5  ;;  %v926_v11 = vmax.f32 %v922_v6, 0.0  ;;  %v1059_v63 = vunpack.c.l.s8.bf16 %v931_v49  ;;  %v1187_v0 = vunpack.c.l.s8.bf16 %v995_v50  ;;  %v986_v5 = vld [vmem:[%s5441_s4 + $0x1d0] sm:$0xff] }
 0x2f8   :  { %v925_v10 = vmax.f32 %v921_v7, 0.0  ;;  %v4214_v15 = vpack.c.bf16 %v924_v62, %v924_v62  ;;  %v1058_v3 = vunpack.c.l.s8.bf16 %v930_v56  ;;  %v1186_v61 = vunpack.c.l.s8.bf16 %v994_v58  ;;  %v1050_v7 = vld [vmem:[%s5441_s4 + $0x3d0] sm:$0xff]  ;;  %v957_v56 = vld [vmem:[%s5441_s4 + $0xe8] sm:$0xff] }
 0x2f9   :  { %v927_v2 = vmax.f32 %v923_v8, 0.0  ;;  %v4217_v17 = vpack.c.bf16 %v926_v11, %v926_v11  ;;  %v1179_v4 = vunpack.c.h.s8.bf16 %v987_v51  ;;  %v1307_v6 = vunpack.c.h.s8.bf16 %v1051_v52  ;;  %v979_v11 = vld [vmem:[%s5441_s4 + $0x198] sm:$0xff]  ;;  %v1026_v49 = vld [vmem:[%s5441_s4 + $0x310] sm:$0xff] }
 0x2fa   :  { %v4210_v12 = vpack.c.bf16 %v925_v10, %v925_v10  ;;  %v1178_v8 = vunpack.c.h.s8.bf16 %v986_v5  ;;  %v1306_v62 = vunpack.c.h.s8.bf16 %v1050_v7  ;;  %v1171_v9 = vunpack.c.l.s8.bf16 %v987_v51  ;;  %v1020_v51 = vld [vmem:[%s5441_s4 + $0x2e0] sm:$0xff] }
 0x2fb   :  { %v4212_v14 = vpack.c.bf16 %v927_v2, %v927_v2  ;;  %v1299_v10 = vunpack.c.l.s8.bf16 %v1051_v52  ;;  %v1170_v2 = vunpack.c.l.s8.bf16 %v986_v5  ;;  %v1291_v21 = vunpack.c.h.s8.bf16 %v1043_v1 }
 0x2fc   :  { %1349 = vmatprep.mubr.bf16.mxu0 %v4210_v12 }
 0x2fd   :  { %1390 = vmatprep.mubr.bf16.mxu1 %v4212_v14  ;;  %1350 = vmatmul.mubr.bf16.vlgmr.msra.gmra.mxu0 %v4214_v15 }
 0x2fe   :  { %1391 = vmatmul.mubr.bf16.vlgmr.msra.gmra.mxu1 %v4217_v17  ;;  %1400 = vmatpush1.bf16.msra.mxu0 %v1114_v13  ;;  %v1298_v13 = vunpack.c.l.s8.bf16 %v1050_v7 }
 0x2ff   :  { %1441 = vmatpush1.bf16.msra.mxu1 %v1242_v16  ;;  %1431 = vmatprep.mubr.bf16.mxu0 %v4210_v12  ;;  %v1163_v16 = vunpack.c.h.s8.bf16 %v979_v11 }
 0x300   :  { %1472 = vmatprep.mubr.bf16.mxu1 %v4212_v14  ;;  %1401 = vmatprep.subr.bf16.mxu0 %v1107_v20  ;;  %v978_v20 = vld [vmem:[%s5441_s4 + $0x190] sm:$0xff] }
 0x301   :  { %1442 = vmatprep.subr.bf16.mxu1 %v1235_v22  ;;  %v1042_v22 = vld [vmem:[%s5441_s4 + $0x390] sm:$0xff]  ;;  %v1162_v23 = vunpack.c.h.s8.bf16 %v978_v20  ;;  %v1154_v27 = vunpack.c.l.s8.bf16 %v978_v20  ;;  %v941_v20 = vld [vmem:[%s5441_s4 + $0x68] sm:$0xff] }
 0x302   :  { %1402 = vmatpush1.bf16.msra.mxu0 %v1106_v24  ;;  %v1290_v24 = vunpack.c.h.s8.bf16 %v1042_v22 }
 0x303   :  { %1443 = vmatpush1.bf16.msra.mxu1 %v1234_v18  ;;  %1403 = vmatprep.subr.bf16.mxu0 %v1099_v25  ;;  %v1155_v18 = vunpack.c.l.s8.bf16 %v979_v11  ;;  %v1283_v25 = vunpack.c.l.s8.bf16 %v1043_v1  ;;  %v1012_v11 = vld [vmem:[%s5441_s4 + $0x2a0] sm:$0xff] }
 0x304   :  { %1444 = vmatprep.subr.bf16.mxu1 %v1227_v19  ;;  %v1035_v19 = vld [vmem:[%s5441_s4 + $0x358] sm:$0xff] }
 0x306   :  { %1404 = vmatpush1.bf16.msra.mxu0 %v1098_v28  ;;  %v1282_v28 = vunpack.c.l.s8.bf16 %v1042_v22 }
 0x307   :  { %1445 = vmatpush1.bf16.msra.mxu1 %v1226_v29  ;;  %1405 = vmatprep.subr.bf16.mxu0 %v1091_v32  ;;  %v1147_v29 = vunpack.c.h.s8.bf16 %v971_v26  ;;  %v970_v32 = vld [vmem:[%s5441_s4 + $0x150] sm:$0xff] }
 0x308   :  { %1446 = vmatprep.subr.bf16.mxu1 %v1219_v34  ;;  %v1275_v34 = vunpack.c.h.s8.bf16 %v1035_v19  ;;  %v1146_v36 = vunpack.c.h.s8.bf16 %v970_v32  ;;  %v1138_v42 = vunpack.c.l.s8.bf16 %v970_v32  ;;  %v933_v32 = vld [vmem:[%s5441_s4 + $0x28] sm:$0xff] }
 0x30a   :  { %1406 = vmatpush1.bf16.msra.mxu0 %v1090_v37  ;;  %v1274_v37 = vunpack.c.h.s8.bf16 %v1034_v35 }
 0x30b   :  { %1447 = vmatpush1.bf16.msra.mxu1 %v1218_v38  ;;  %1407 = vmatprep.subr.bf16.mxu0 %v1083_v39  ;;  %v1139_v38 = vunpack.c.l.s8.bf16 %v971_v26  ;;  %v1267_v39 = vunpack.c.l.s8.bf16 %v1035_v19  ;;  %v1004_v26 = vld [vmem:[%s5441_s4 + $0x260] sm:$0xff] }
 0x30c   :  { %1448 = vmatprep.subr.bf16.mxu1 %v1211_v41  ;;  %v1027_v41 = vld [vmem:[%s5441_s4 + $0x318] sm:$0xff] }
 0x30e   :  { %1408 = vmatpush1.bf16.msra.mxu0 %v1082_v45  ;;  %v1266_v45 = vunpack.c.l.s8.bf16 %v1034_v35 }
 0x30f   :  { %1449 = vmatpush1.bf16.msra.mxu1 %v1210_v46  ;;  %1409 = vmatprep.subr.bf16.mxu0 %v1075_v47  ;;  %v1131_v46 = vunpack.c.h.s8.bf16 %v963_v40  ;;  %v962_v47 = vld [vmem:[%s5441_s4 + $0x110] sm:$0xff] }
 0x310   :  { %1450 = vmatprep.subr.bf16.mxu1 %v1203_v48  ;;  %v1259_v48 = vunpack.c.h.s8.bf16 %v1027_v41  ;;  %v1130_v50 = vunpack.c.h.s8.bf16 %v962_v47  ;;  %v1122_v58 = vunpack.c.l.s8.bf16 %v962_v47  ;;  %v989_v47 = vld [vmem:[%s5441_s4 + $0x1e8] sm:$0xff] }
 0x312   :  { %1410 = vmatpush1.bf16.msra.mxu0 %v1074_v53  ;;  %v1258_v53 = vunpack.c.h.s8.bf16 %v1026_v49 }
 0x313   :  { %1451 = vmatpush1.bf16.msra.mxu1 %v1202_v54  ;;  %1411 = vmatprep.subr.bf16.mxu0 %v1067_v55  ;;  %v1123_v54 = vunpack.c.l.s8.bf16 %v963_v40  ;;  %v1251_v55 = vunpack.c.l.s8.bf16 %v1027_v41  ;;  %v996_v40 = vld [vmem:[%s5441_s4 + $0x220] sm:$0xff] }
 0x314   :  { %1452 = vmatprep.subr.bf16.mxu1 %v1195_v57  ;;  %v1021_v57 = vld [vmem:[%s5441_s4 + $0x2e8] sm:$0xff] }
 0x315   :  { %v1237_v5 = vunpack.c.l.s8.bf16 %v1021_v57 }
 0x316   :  { %1412 = vmatpush1.bf16.msra.mxu0 %v1066_v59  ;;  %v1250_v59 = vunpack.c.l.s8.bf16 %v1026_v49 }
 0x317   :  { %1453 = vmatpush1.bf16.msra.mxu1 %v1194_v60  ;;  %1413 = vmatprep.subr.bf16.mxu0 %v1059_v63  ;;  %v1117_v60 = vunpack.c.h.s8.bf16 %v957_v56  ;;  %v956_v63 = vld [vmem:[%s5441_s4 + $0xe0] sm:$0xff] }
 0x318   :  { %1454 = vmatprep.subr.bf16.mxu1 %v1187_v0  ;;  %v1245_v0 = vunpack.c.h.s8.bf16 %v1021_v57  ;;  %v1116_v52 = vunpack.c.h.s8.bf16 %v956_v63  ;;  %v1108_v7 = vunpack.c.l.s8.bf16 %v956_v63  ;;  %v981_v63 = vld [vmem:[%s5441_s4 + $0x1a8] sm:$0xff] }
 0x31a   :  { %1414 = vmatpush1.bf16.msra.mxu0 %v1058_v3  ;;  %v1244_v3 = vunpack.c.h.s8.bf16 %v1020_v51 }
 0x31b   :  { %1455 = vmatpush1.bf16.msra.mxu1 %v1186_v61  ;;  %1415 = vmatprep.subr.bf16.mxu0 %v1179_v4  ;;  %v1109_v61 = vunpack.c.l.s8.bf16 %v957_v56  ;;  %v949_v4 = vld [vmem:[%s5441_s4 + $0xa8] sm:$0xff]  ;;  %v1052_v56 = vld [vmem:[%s5441_s4 + $0x3e0] sm:$0xff] }
 0x31c   :  { %1456 = vmatprep.subr.bf16.mxu1 %v1307_v6  ;;  %v1013_v6 = vld [vmem:[%s5441_s4 + $0x2a8] sm:$0xff] }
 0x31e   :  { %1416 = vmatpush2.bf16.msra.mxu0 %v1178_v8  ;;  %v1236_v8 = vunpack.c.l.s8.bf16 %v1020_v51 }
 0x31f   :  { %1457 = vmatpush2.bf16.msra.mxu1 %v1306_v62  ;;  %1417 = vmatprep.subr.bf16.mxu0 %v1171_v9  ;;  %v1101_v62 = vunpack.c.h.s8.bf16 %v949_v4  ;;  %v948_v9 = vld [vmem:[%s5441_s4 + $0xa0] sm:$0xff] }
 0x320   :  { %1458 = vmatprep.subr.bf16.mxu1 %v1299_v10  ;;  %v1229_v10 = vunpack.c.h.s8.bf16 %v1013_v6  ;;  %v1100_v1 = vunpack.c.h.s8.bf16 %v948_v9  ;;  %v1092_v22 = vunpack.c.l.s8.bf16 %v948_v9  ;;  %v973_v9 = vld [vmem:[%s5441_s4 + $0x168] sm:$0xff] }
 0x322   :  { %1418 = vmatpush2.bf16.msra.mxu0 %v1170_v2  ;;  %v1228_v2 = vunpack.c.h.s8.bf16 %v1012_v11 }
 0x323   :  { %1459 = vmatpush2.bf16.msra.mxu1 %v1298_v13  ;;  %1419 = vmatprep.subr.bf16.mxu0 %v1163_v16  ;;  %v1093_v13 = vunpack.c.l.s8.bf16 %v949_v4  ;;  %v1221_v16 = vunpack.c.l.s8.bf16 %v1013_v6 }
 0x324   :  { %1460 = vmatprep.subr.bf16.mxu1 %v1291_v21  ;;  %v1005_v21 = vld [vmem:[%s5441_s4 + $0x268] sm:$0xff] }
 0x326   :  { %1420 = vmatpush2.bf16.msra.mxu0 %v1162_v23  ;;  %v1220_v23 = vunpack.c.l.s8.bf16 %v1012_v11 }
 0x327   :  { %1461 = vmatpush2.bf16.msra.mxu1 %v1290_v24  ;;  %1421 = vmatprep.subr.bf16.mxu0 %v1155_v18  ;;  %v1085_v24 = vunpack.c.h.s8.bf16 %v941_v20  ;;  %v940_v18 = vld [vmem:[%s5441_s4 + $0x60] sm:$0xff] }
 0x328   :  { %1462 = vmatprep.subr.bf16.mxu1 %v1283_v25  ;;  %v1213_v25 = vunpack.c.h.s8.bf16 %v1005_v21  ;;  %v1084_v19 = vunpack.c.h.s8.bf16 %v940_v18  ;;  %v1076_v35 = vunpack.c.l.s8.bf16 %v940_v18  ;;  %v965_v18 = vld [vmem:[%s5441_s4 + $0x128] sm:$0xff] }
 0x32a   :  { %1422 = vmatpush2.bf16.msra.mxu0 %v1154_v27  ;;  %v1212_v27 = vunpack.c.h.s8.bf16 %v1004_v26 }
 0x32b   :  { %1463 = vmatpush2.bf16.msra.mxu1 %v1282_v28  ;;  %1423 = vmatprep.subr.bf16.mxu0 %v1147_v29  ;;  %v1077_v28 = vunpack.c.l.s8.bf16 %v941_v20  ;;  %v1205_v29 = vunpack.c.l.s8.bf16 %v1005_v21  ;;  %v1036_v20 = vld [vmem:[%s5441_s4 + $0x360] sm:$0xff] }
 0x32c   :  { %1464 = vmatprep.subr.bf16.mxu1 %v1275_v34  ;;  %v997_v34 = vld [vmem:[%s5441_s4 + $0x228] sm:$0xff] }
 0x32e   :  { %1424 = vmatpush2.bf16.msra.mxu0 %v1146_v36  ;;  %v1204_v36 = vunpack.c.l.s8.bf16 %v1004_v26 }
 0x32f   :  { %1465 = vmatpush2.bf16.msra.mxu1 %v1274_v37  ;;  %1425 = vmatprep.subr.bf16.mxu0 %v1139_v38  ;;  %v1069_v37 = vunpack.c.h.s8.bf16 %v933_v32  ;;  %v932_v38 = vld [vmem:[%s5441_s4 + $0x20] sm:$0xff] }
 0x330   :  { %1466 = vmatprep.subr.bf16.mxu1 %v1267_v39  ;;  %v1197_v39 = vunpack.c.h.s8.bf16 %v997_v34  ;;  %v1068_v41 = vunpack.c.h.s8.bf16 %v932_v38  ;;  %v1060_v49 = vunpack.c.l.s8.bf16 %v932_v38  ;;  %v959_v38 = vld [vmem:[%s5441_s4 + $0xf8] sm:$0xff] }
 0x332   :  { %1426 = vmatpush2.bf16.msra.mxu0 %v1138_v42  ;;  %v1196_v42 = vunpack.c.h.s8.bf16 %v996_v40 }
 0x333   :  { %1467 = vmatpush2.bf16.msra.mxu1 %v1266_v45  ;;  %1427 = vmatprep.subr.bf16.mxu0 %v1131_v46  ;;  %v1061_v45 = vunpack.c.l.s8.bf16 %v933_v32  ;;  %v1189_v46 = vunpack.c.l.s8.bf16 %v997_v34  ;;  %v1028_v32 = vld [vmem:[%s5441_s4 + $0x320] sm:$0xff] }
 0x334   :  { %1468 = vmatprep.subr.bf16.mxu1 %v1259_v48  ;;  %v1053_v48 = vld [vmem:[%s5441_s4 + $0x3e8] sm:$0xff] }
 0x336   :  { %1428 = vmatpush2.bf16.msra.mxu0 %v1130_v50  ;;  %v1188_v50 = vunpack.c.l.s8.bf16 %v996_v40 }
 0x337   :  { %1469 = vmatpush2.bf16.msra.mxu1 %v1258_v53  ;;  %1429 = vmatprep.subr.bf16.mxu0 %v1123_v54  ;;  %v1181_v53 = vunpack.c.h.s8.bf16 %v989_v47  ;;  %v988_v54 = vld [vmem:[%s5441_s4 + $0x1e0] sm:$0xff] }
 0x338   :  { %1470 = vmatprep.subr.bf16.mxu1 %v1251_v55  ;;  %v1309_v55 = vunpack.c.h.s8.bf16 %v1053_v48  ;;  %v1180_v57 = vunpack.c.h.s8.bf16 %v988_v54  ;;  %v1172_v51 = vunpack.c.l.s8.bf16 %v988_v54 }
 0x33a   :  { %1430 = vmatpush2.bf16.msra.mxu0 %v1122_v58  ;;  %v1308_v58 = vunpack.c.h.s8.bf16 %v1052_v56 }
 0x33b   :  { %1471 = vmatpush2.bf16.msra.mxu1 %v1250_v59  ;;  %1481 = vmatprep.subr.bf16.mxu0 %v1117_v60  ;;  %v1173_v59 = vunpack.c.l.s8.bf16 %v989_v47  ;;  %v1301_v60 = vunpack.c.l.s8.bf16 %v1053_v48  ;;  %v1022_v47 = vld [vmem:[%s5441_s4 + $0x2f0] sm:$0xff] }
 0x33c   :  { %1522 = vmatprep.subr.bf16.mxu1 %v1245_v0  ;;  %v1045_v0 = vld [vmem:[%s5441_s4 + $0x3a8] sm:$0xff] }
 0x33d   :  { %1432 = vmatmul.mubr.bf16.vlgmr.msra.gmra.mxu0 %v4214_v15  ;;  %v1293_v4 = vunpack.c.h.s8.bf16 %v1045_v0 }
 0x33e   :  { %1473 = vmatmul.mubr.bf16.vlgmr.msra.gmra.mxu1 %v4217_v17  ;;  %1482 = vmatpush1.bf16.msra.mxu0 %v1116_v52  ;;  %v1300_v52 = vunpack.c.l.s8.bf16 %v1052_v56 }
 0x33f   :  { %1513 = vmatprep.mubr.bf16.mxu0 %v4210_v12  ;;  %1523 = vmatpush1.bf16.msra.mxu1 %v1244_v3  ;;  %v1165_v3 = vunpack.c.h.s8.bf16 %v981_v63 }
 0x340   :  { %1554 = vmatprep.mubr.bf16.mxu1 %v4212_v14  ;;  %1483 = vmatprep.subr.bf16.mxu0 %v1109_v61  ;;  %v980_v61 = vld [vmem:[%s5441_s4 + $0x1a0] sm:$0xff] }
 0x341   :  { %1524 = vmatprep.subr.bf16.mxu1 %v1237_v5  ;;  %v1044_v5 = vld [vmem:[%s5441_s4 + $0x3a0] sm:$0xff]  ;;  %v1164_v6 = vunpack.c.h.s8.bf16 %v980_v61  ;;  %v1156_v11 = vunpack.c.l.s8.bf16 %v980_v61 }
 0x342   :  { %1484 = vmatpush1.bf16.msra.mxu0 %v1108_v7  ;;  %v1292_v7 = vunpack.c.h.s8.bf16 %v1044_v5 }
 0x343   :  { %1525 = vmatpush1.bf16.msra.mxu1 %v1236_v8  ;;  %1485 = vmatprep.subr.bf16.mxu0 %v1101_v62  ;;  %v1157_v8 = vunpack.c.l.s8.bf16 %v981_v63  ;;  %v1285_v62 = vunpack.c.l.s8.bf16 %v1045_v0  ;;  %v1014_v63 = vld [vmem:[%s5441_s4 + $0x2b0] sm:$0xff] }
 0x344   :  { %1526 = vmatprep.subr.bf16.mxu1 %v1229_v10  ;;  %v1037_v10 = vld [vmem:[%s5441_s4 + $0x368] sm:$0xff] }
 0x346   :  { %1486 = vmatpush1.bf16.msra.mxu0 %v1100_v1  ;;  %v1284_v1 = vunpack.c.l.s8.bf16 %v1044_v5 }
 0x347   :  { %1527 = vmatpush1.bf16.msra.mxu1 %v1228_v2  ;;  %1487 = vmatprep.subr.bf16.mxu0 %v1093_v13  ;;  %v1149_v2 = vunpack.c.h.s8.bf16 %v973_v9  ;;  %v972_v13 = vld [vmem:[%s5441_s4 + $0x160] sm:$0xff] }
 0x348   :  { %1528 = vmatprep.subr.bf16.mxu1 %v1221_v16  ;;  %v1277_v16 = vunpack.c.h.s8.bf16 %v1037_v10  ;;  %v1148_v21 = vunpack.c.h.s8.bf16 %v972_v13  ;;  %v1140_v26 = vunpack.c.l.s8.bf16 %v972_v13 }
 0x34a   :  { %1488 = vmatpush1.bf16.msra.mxu0 %v1092_v22  ;;  %v1276_v22 = vunpack.c.h.s8.bf16 %v1036_v20 }
 0x34b   :  { %1529 = vmatpush1.bf16.msra.mxu1 %v1220_v23  ;;  %1489 = vmatprep.subr.bf16.mxu0 %v1085_v24  ;;  %v1141_v23 = vunpack.c.l.s8.bf16 %v973_v9  ;;  %v1269_v24 = vunpack.c.l.s8.bf16 %v1037_v10 }
 0x34c   :  { %1530 = vmatprep.subr.bf16.mxu1 %v1213_v25  ;;  %v1029_v25 = vld [vmem:[%s5441_s4 + $0x328] sm:$0xff] }
 0x34e   :  { %1490 = vmatpush1.bf16.msra.mxu0 %v1084_v19  ;;  %v1268_v19 = vunpack.c.l.s8.bf16 %v1036_v20 }
 0x34f   :  { %1531 = vmatpush1.bf16.msra.mxu1 %v1212_v27  ;;  %1491 = vmatprep.subr.bf16.mxu0 %v1077_v28  ;;  %v1133_v27 = vunpack.c.h.s8.bf16 %v965_v18  ;;  %v964_v28 = vld [vmem:[%s5441_s4 + $0x120] sm:$0xff] }
 0x350   :  { %1532 = vmatprep.subr.bf16.mxu1 %v1205_v29  ;;  %v1261_v29 = vunpack.c.h.s8.bf16 %v1029_v25  ;;  %v1132_v34 = vunpack.c.h.s8.bf16 %v964_v28  ;;  %v1124_v40 = vunpack.c.l.s8.bf16 %v964_v28 }
 0x352   :  { %1492 = vmatpush1.bf16.msra.mxu0 %v1076_v35  ;;  %v1260_v35 = vunpack.c.h.s8.bf16 %v1028_v32 }
 0x353   :  { %1533 = vmatpush1.bf16.msra.mxu1 %v1204_v36  ;;  %1493 = vmatprep.subr.bf16.mxu0 %v1069_v37  ;;  %v1125_v36 = vunpack.c.l.s8.bf16 %v965_v18  ;;  %v1253_v37 = vunpack.c.l.s8.bf16 %v1029_v25 }
 0x354   :  { %1534 = vmatprep.subr.bf16.mxu1 %v1197_v39  ;;  %v1023_v39 = vld [vmem:[%s5441_s4 + $0x2f8] sm:$0xff] }
 0x355   :  { %v1239_v54 = vunpack.c.l.s8.bf16 %v1023_v39 }
 0x356   :  { %1494 = vmatpush1.bf16.msra.mxu0 %v1068_v41  ;;  %v1252_v41 = vunpack.c.l.s8.bf16 %v1028_v32 }
 0x357   :  { %1535 = vmatpush1.bf16.msra.mxu1 %v1196_v42  ;;  %1495 = vmatprep.subr.bf16.mxu0 %v1061_v45  ;;  %v1119_v42 = vunpack.c.h.s8.bf16 %v959_v38  ;;  %v958_v45 = vld [vmem:[%s5441_s4 + $0xf0] sm:$0xff] }
 0x358   :  { %1536 = vmatprep.subr.bf16.mxu1 %v1189_v46  ;;  %v1247_v46 = vunpack.c.h.s8.bf16 %v1023_v39  ;;  %v1118_v48 = vunpack.c.h.s8.bf16 %v958_v45  ;;  %v1110_v56 = vunpack.c.l.s8.bf16 %v958_v45 }
 0x35a   :  { %1496 = vmatpush1.bf16.msra.mxu0 %v1060_v49  ;;  %v1246_v49 = vunpack.c.h.s8.bf16 %v1022_v47 }
 0x35b   :  { %1537 = vmatpush1.bf16.msra.mxu1 %v1188_v50  ;;  %1497 = vmatprep.subr.bf16.mxu0 %v1181_v53  ;;  %v1111_v50 = vunpack.c.l.s8.bf16 %v959_v38  ;;  %v951_v53 = vld [vmem:[%s5441_s4 + $0xb8] sm:$0xff] }
 0x35c   :  { %1538 = vmatprep.subr.bf16.mxu1 %v1309_v55  ;;  %v1015_v55 = vld [vmem:[%s5441_s4 + $0x2b8] sm:$0xff] }
 0x35e   :  { %1498 = vmatpush2.bf16.msra.mxu0 %v1180_v57  ;;  %v1238_v57 = vunpack.c.l.s8.bf16 %v1022_v47 }
 0x35f   :  { %1539 = vmatpush2.bf16.msra.mxu1 %v1308_v58  ;;  %1499 = vmatprep.subr.bf16.mxu0 %v1173_v59  ;;  %v1103_v58 = vunpack.c.h.s8.bf16 %v951_v53  ;;  %v950_v59 = vld [vmem:[%s5441_s4 + $0xb0] sm:$0xff] }
 0x360   :  { %1540 = vmatprep.subr.bf16.mxu1 %v1301_v60  ;;  %v1231_v60 = vunpack.c.h.s8.bf16 %v1015_v55  ;;  %v1102_v0 = vunpack.c.h.s8.bf16 %v950_v59  ;;  %v1094_v61 = vunpack.c.l.s8.bf16 %v950_v59 }
 0x362   :  { %1500 = vmatpush2.bf16.msra.mxu0 %v1172_v51  ;;  %v1095_v51 = vunpack.c.l.s8.bf16 %v951_v53 }
 0x363   :  { %1541 = vmatpush2.bf16.msra.mxu1 %v1300_v52  ;;  %1501 = vmatprep.subr.bf16.mxu0 %v1165_v3  ;;  %v1223_v52 = vunpack.c.l.s8.bf16 %v1015_v55  ;;  %v943_v3 = vld [vmem:[%s5441_s4 + $0x78] sm:$0xff] }
 0x364   :  { %1542 = vmatprep.subr.bf16.mxu1 %v1293_v4  ;;  %v1222_v4 = vunpack.c.l.s8.bf16 %v1014_v63  ;;  %v1087_v5 = vunpack.c.h.s8.bf16 %v943_v3  ;;  %v1079_v10 = vunpack.c.l.s8.bf16 %v943_v3 }
 0x366   :  { %1502 = vmatpush2.bf16.msra.mxu0 %v1164_v6  ;;  %v942_v6 = vld [vmem:[%s5441_s4 + $0x70] sm:$0xff] }
 0x367   :  { %1543 = vmatpush2.bf16.msra.mxu1 %v1292_v7  ;;  %1503 = vmatprep.subr.bf16.mxu0 %v1157_v8  ;;  %v1006_v8 = vld [vmem:[%s5441_s4 + $0x270] sm:$0xff]  ;;  %v1078_v13 = vunpack.c.l.s8.bf16 %v942_v6 }
 0x368   :  { %1544 = vmatprep.subr.bf16.mxu1 %v1285_v62  ;;  %v1086_v62 = vunpack.c.h.s8.bf16 %v942_v6  ;;  %v1214_v9 = vunpack.c.h.s8.bf16 %v1006_v8 }
 0x36a   :  { %1504 = vmatpush2.bf16.msra.mxu0 %v1156_v11 }
 0x36b   :  { %1545 = vmatpush2.bf16.msra.mxu1 %v1284_v1  ;;  %1505 = vmatprep.subr.bf16.mxu0 %v1149_v2  ;;  %v935_v1 = vld [vmem:[%s5441_s4 + $0x38] sm:$0xff] }
 0x36c   :  { %1546 = vmatprep.subr.bf16.mxu1 %v1277_v16  ;;  %v999_v2 = vld [vmem:[%s5441_s4 + $0x238] sm:$0xff]  ;;  %v1206_v16 = vunpack.c.l.s8.bf16 %v1006_v8  ;;  %v1071_v20 = vunpack.c.h.s8.bf16 %v935_v1  ;;  %v1063_v25 = vunpack.c.l.s8.bf16 %v935_v1 }
 0x36e   :  { %1506 = vmatpush2.bf16.msra.mxu0 %v1148_v21  ;;  %v934_v21 = vld [vmem:[%s5441_s4 + $0x30] sm:$0xff] }
 0x36f   :  { %1547 = vmatpush2.bf16.msra.mxu1 %v1276_v22  ;;  %1507 = vmatprep.subr.bf16.mxu0 %v1141_v23  ;;  %v1199_v22 = vunpack.c.h.s8.bf16 %v999_v2  ;;  %v998_v23 = vld [vmem:[%s5441_s4 + $0x230] sm:$0xff]  ;;  %v1062_v28 = vunpack.c.l.s8.bf16 %v934_v21 }
 0x370   :  { %1548 = vmatprep.subr.bf16.mxu1 %v1269_v24  ;;  %v1070_v24 = vunpack.c.h.s8.bf16 %v934_v21  ;;  %v1198_v18 = vunpack.c.h.s8.bf16 %v998_v23 }
 0x372   :  { %1508 = vmatpush2.bf16.msra.mxu0 %v1140_v26  ;;  %v1191_v26 = vunpack.c.l.s8.bf16 %v999_v2 }
 0x373   :  { %1549 = vmatpush2.bf16.msra.mxu1 %v1268_v19  ;;  %1509 = vmatprep.subr.bf16.mxu0 %v1133_v27  ;;  %v991_v19 = vld [vmem:[%s5441_s4 + $0x1f8] sm:$0xff] }
 0x374   :  { %1550 = vmatprep.subr.bf16.mxu1 %v1261_v29  ;;  %v1055_v27 = vld [vmem:[%s5441_s4 + $0x3f8] sm:$0xff]  ;;  %v1190_v29 = vunpack.c.l.s8.bf16 %v998_v23  ;;  %v1183_v32 = vunpack.c.h.s8.bf16 %v991_v19  ;;  %v1175_v39 = vunpack.c.l.s8.bf16 %v991_v19 }
 0x376   :  { %1510 = vmatpush2.bf16.msra.mxu0 %v1132_v34  ;;  %v990_v34 = vld [vmem:[%s5441_s4 + $0x1f0] sm:$0xff] }
 0x377   :  { %1551 = vmatpush2.bf16.msra.mxu1 %v1260_v35  ;;  %1511 = vmatprep.subr.bf16.mxu0 %v1125_v36  ;;  %v1311_v35 = vunpack.c.h.s8.bf16 %v1055_v27  ;;  %v1054_v36 = vld [vmem:[%s5441_s4 + $0x3f0] sm:$0xff]  ;;  %v1174_v45 = vunpack.c.l.s8.bf16 %v990_v34 }
 0x378   :  { %1552 = vmatprep.subr.bf16.mxu1 %v1253_v37  ;;  %v1182_v37 = vunpack.c.h.s8.bf16 %v990_v34  ;;  %v1310_v38 = vunpack.c.h.s8.bf16 %v1054_v36 }
 0x37a   :  { %1512 = vmatpush2.bf16.msra.mxu0 %v1124_v40  ;;  %v1303_v40 = vunpack.c.l.s8.bf16 %v1055_v27 }
 0x37b   :  { %1553 = vmatpush2.bf16.msra.mxu1 %v1252_v41  ;;  %1563 = vmatprep.subr.bf16.mxu0 %v1119_v42  ;;  %v983_v41 = vld [vmem:[%s5441_s4 + $0x1b8] sm:$0xff] }
 0x37c   :  { %1604 = vmatprep.subr.bf16.mxu1 %v1247_v46  ;;  %v1047_v42 = vld [vmem:[%s5441_s4 + $0x3b8] sm:$0xff]  ;;  %v1302_v46 = vunpack.c.l.s8.bf16 %v1054_v36  ;;  %v1167_v47 = vunpack.c.h.s8.bf16 %v983_v41  ;;  %v1159_v55 = vunpack.c.l.s8.bf16 %v983_v41 }
 0x37d   :  { %1514 = vmatmul.mubr.bf16.vlgmr.msra.gmra.mxu0 %v4214_v15  ;;  %v2033_v36 = vld [vmem:[%s5442_s5 + $0x238] sm:$0xff] }
 0x37e   :  { %1555 = vmatmul.mubr.bf16.vlgmr.msra.gmra.mxu1 %v4217_v17  ;;  %1564 = vmatpush1.bf16.msra.mxu0 %v1118_v48  ;;  %v982_v48 = vld [vmem:[%s5441_s4 + $0x1b0] sm:$0xff] }
 0x37f   :  { %1595 = vmatprep.mubr.bf16.mxu0 %v4210_v12  ;;  %1605 = vmatpush1.bf16.msra.mxu1 %v1246_v49  ;;  %v1230_v12 = vunpack.c.h.s8.bf16 %v1014_v63  ;;  %v1295_v49 = vunpack.c.h.s8.bf16 %v1047_v42  ;;  %v1166_v53 = vunpack.c.h.s8.bf16 %v982_v48  ;;  %v1158_v59 = vunpack.c.l.s8.bf16 %v982_v48 }
 0x380   :  { %1636 = vmatprep.mubr.bf16.mxu1 %v4212_v14  ;;  %1565 = vmatprep.subr.bf16.mxu0 %v1111_v50  ;;  %v1007_v14 = vld [vmem:[%s5441_s4 + $0x278] sm:$0xff]  ;;  %v1046_v50 = vld [vmem:[%s5441_s4 + $0x3b0] sm:$0xff] }
 0x381   :  { %1606 = vmatprep.subr.bf16.mxu1 %v1239_v54  ;;  %v1215_v7 = vunpack.c.h.s8.bf16 %v1007_v14  ;;  %v1207_v11 = vunpack.c.l.s8.bf16 %v1007_v14  ;;  %v1294_v54 = vunpack.c.h.s8.bf16 %v1046_v50 }
 0x382   :  { %1566 = vmatpush1.bf16.msra.mxu0 %v1110_v56  ;;  %v1287_v56 = vunpack.c.l.s8.bf16 %v1047_v42  ;;  %v1976_v42 = vld [vmem:[%s5442_s5 + $0x70] sm:$0xff] }
 0x383   :  { %1607 = vmatpush1.bf16.msra.mxu1 %v1238_v57  ;;  %1567 = vmatprep.subr.bf16.mxu0 %v1103_v58  ;;  %v975_v57 = vld [vmem:[%s5441_s4 + $0x178] sm:$0xff] }
 0x384   :  { %1608 = vmatprep.subr.bf16.mxu1 %v1231_v60  ;;  %v1039_v58 = vld [vmem:[%s5441_s4 + $0x378] sm:$0xff]  ;;  %v1286_v60 = vunpack.c.l.s8.bf16 %v1046_v50  ;;  %v1151_v63 = vunpack.c.h.s8.bf16 %v975_v57  ;;  %v1143_v14 = vunpack.c.l.s8.bf16 %v975_v57 }
 0x386   :  { %1568 = vmatpush1.bf16.msra.mxu0 %v1102_v0  ;;  %v974_v0 = vld [vmem:[%s5441_s4 + $0x170] sm:$0xff] }
 0x387   :  { %1609 = vmatpush1.bf16.msra.mxu1 %v1230_v12  ;;  %1569 = vmatprep.subr.bf16.mxu0 %v1095_v51  ;;  %v1279_v12 = vunpack.c.h.s8.bf16 %v1039_v58  ;;  %v1038_v51 = vld [vmem:[%s5441_s4 + $0x370] sm:$0xff]  ;;  %v1142_v6 = vunpack.c.l.s8.bf16 %v974_v0 }
 0x388   :  { %1610 = vmatprep.subr.bf16.mxu1 %v1223_v52  ;;  %v1150_v52 = vunpack.c.h.s8.bf16 %v974_v0  ;;  %v1278_v3 = vunpack.c.h.s8.bf16 %v1038_v51  ;;  %v2327_v0 = vunpack.c.l.s8.bf16 %v2033_v36 }
 0x38a   :  { %1570 = vmatpush1.bf16.msra.mxu0 %v1094_v61  ;;  %v1271_v61 = vunpack.c.l.s8.bf16 %v1039_v58 }
 0x38b   :  { %1611 = vmatpush1.bf16.msra.mxu1 %v1222_v4  ;;  %1571 = vmatprep.subr.bf16.mxu0 %v1087_v5  ;;  %v967_v4 = vld [vmem:[%s5441_s4 + $0x138] sm:$0xff] }
 0x38c   :  { %1612 = vmatprep.subr.bf16.mxu1 %v1215_v7  ;;  %v1031_v5 = vld [vmem:[%s5441_s4 + $0x338] sm:$0xff]  ;;  %v1270_v7 = vunpack.c.l.s8.bf16 %v1038_v51  ;;  %v1135_v8 = vunpack.c.h.s8.bf16 %v967_v4  ;;  %v1127_v2 = vunpack.c.l.s8.bf16 %v967_v4 }
 0x38e   :  { %1572 = vmatpush1.bf16.msra.mxu0 %v1086_v62  ;;  %v966_v62 = vld [vmem:[%s5441_s4 + $0x130] sm:$0xff] }
 0x38f   :  { %1613 = vmatpush1.bf16.msra.mxu1 %v1214_v9  ;;  %1573 = vmatprep.subr.bf16.mxu0 %v1079_v10  ;;  %v1263_v9 = vunpack.c.h.s8.bf16 %v1031_v5  ;;  %v1030_v10 = vld [vmem:[%s5441_s4 + $0x330] sm:$0xff]  ;;  %v1126_v21 = vunpack.c.l.s8.bf16 %v966_v62 }
 0x390   :  { %1614 = vmatprep.subr.bf16.mxu1 %v1207_v11  ;;  %v1134_v11 = vunpack.c.h.s8.bf16 %v966_v62  ;;  %v1262_v1 = vunpack.c.h.s8.bf16 %v1030_v10 }
 0x392   :  { %1574 = vmatpush1.bf16.msra.mxu0 %v1078_v13  ;;  %v1255_v13 = vunpack.c.l.s8.bf16 %v1031_v5  ;;  %v1969_v5 = vld [vmem:[%s5442_s5 + $0x38] sm:$0xff] }
 0x393   :  { %1615 = vmatpush1.bf16.msra.mxu1 %v1206_v16  ;;  %1575 = vmatprep.subr.bf16.mxu0 %v1071_v20  ;;  %v1984_v16 = vld [vmem:[%s5442_s5 + $0xb0] sm:$0xff] }
 0x394   :  { %1616 = vmatprep.subr.bf16.mxu1 %v1199_v22  ;;  %v2040_v20 = vld [vmem:[%s5442_s5 + $0x270] sm:$0xff]  ;;  %v1254_v22 = vunpack.c.l.s8.bf16 %v1030_v10  ;;  %v2236_v23 = vunpack.c.h.s8.bf16 %v1984_v16  ;;  %v2229_v27 = vunpack.c.l.s8.bf16 %v1984_v16  ;;  %v2207_v10 = vunpack.c.h.s8.bf16 %v1969_v5  ;;  %v1963_v16 = vld [vmem:[%s5442_s5 + $0x8] sm:$0xff] }
 0x396   :  { %1576 = vmatpush1.bf16.msra.mxu0 %v1070_v24  ;;  %v1983_v24 = vld [vmem:[%s5442_s5 + $0xa8] sm:$0xff] }
 0x397   :  { %1617 = vmatpush1.bf16.msra.mxu1 %v1198_v18  ;;  %1577 = vmatprep.subr.bf16.mxu0 %v1063_v25  ;;  %v2348_v18 = vunpack.c.h.s8.bf16 %v2040_v20  ;;  %v2039_v25 = vld [vmem:[%s5442_s5 + $0x268] sm:$0xff]  ;;  %v2235_v19 = vunpack.c.h.s8.bf16 %v1983_v24 }
 0x398   :  { %1618 = vmatprep.subr.bf16.mxu1 %v1191_v26  ;;  %v4525_v26 = vld [vmem:[%s5443_s6 + $0x1e] sm:$0xff] }
 0x399   :  { %v1653_v41 = vrot.slane %v4525_v26, %v4071_v33 }
 0x39a   :  { %1578 = vmatpush1.bf16.msra.mxu0 %v1062_v28  ;;  %v2347_v28 = vunpack.c.h.s8.bf16 %v2039_v25 }
 0x39b   :  { %1619 = vmatpush1.bf16.msra.mxu1 %v1190_v29  ;;  %1579 = vmatprep.subr.bf16.mxu0 %v1183_v32  ;;  %v1977_v29 = vld [vmem:[%s5442_s5 + $0x78] sm:$0xff]  ;;  %v2341_v32 = vunpack.c.l.s8.bf16 %v2040_v20 }
 0x39c   :  { %1620 = vmatprep.subr.bf16.mxu1 %v1311_v35  ;;  %v1649_v35 = vrot.slane %v4525_v26, %v4065_v31  ;;  %v2215_v58 = vunpack.c.l.s8.bf16 %v1977_v29 }
 0x39e   :  { %1580 = vmatpush2.bf16.msra.mxu0 %v1182_v37 }
 0x39f   :  { %1621 = vmatpush2.bf16.msra.mxu1 %v1310_v38  ;;  %1581 = vmatprep.subr.bf16.mxu0 %v1175_v39  ;;  %v2228_v38 = vunpack.c.l.s8.bf16 %v1983_v24  ;;  %v2200_v24 = vunpack.c.l.s8.bf16 %v1969_v5 }
 0x3a0   :  { %1622 = vmatprep.subr.bf16.mxu1 %v1303_v40 }
 0x3a2   :  { %1582 = vmatpush2.bf16.msra.mxu0 %v1174_v45  ;;  %v2340_v45 = vunpack.c.l.s8.bf16 %v2039_v25 }
 0x3a3   :  { %1623 = vmatpush2.bf16.msra.mxu1 %v1302_v46  ;;  %1583 = vmatprep.subr.bf16.mxu0 %v1167_v47  ;;  %v2334_v47 = vunpack.c.h.s8.bf16 %v2033_v36 }
 0x3a4   :  { %1624 = vmatprep.subr.bf16.mxu1 %v1295_v49 }
 0x3a6   :  { %1584 = vmatpush2.bf16.msra.mxu0 %v1166_v53 }
 0x3a7   :  { %1625 = vmatpush2.bf16.msra.mxu1 %v1294_v54  ;;  %1585 = vmatprep.subr.bf16.mxu0 %v1159_v55  ;;  %v2221_v54 = vunpack.c.h.s8.bf16 %v1976_v42 }
 0x3a8   :  { %1626 = vmatprep.subr.bf16.mxu1 %v1287_v56 }
 0x3aa   :  { %1586 = vmatpush2.bf16.msra.mxu0 %v1158_v59 }
 0x3ab   :  { %1627 = vmatpush2.bf16.msra.mxu1 %v1286_v60  ;;  %1587 = vmatprep.subr.bf16.mxu0 %v1151_v63  ;;  %v1970_v63 = vld [vmem:[%s5442_s5 + $0x40] sm:$0xff] }
 0x3ac   :  { %1628 = vmatprep.subr.bf16.mxu1 %v1279_v12  ;;  %v2208_v4 = vunpack.c.h.s8.bf16 %v1970_v63 }
 0x3ae   :  { %1588 = vmatpush2.bf16.msra.mxu0 %v1150_v52  ;;  %v2026_v52 = vld [vmem:[%s5442_s5 + $0x200] sm:$0xff] }
 0x3af   :  { %1629 = vmatpush2.bf16.msra.mxu1 %v1278_v3  ;;  %1589 = vmatprep.subr.bf16.mxu0 %v1143_v14  ;;  %v2214_v3 = vunpack.c.l.s8.bf16 %v1976_v42  ;;  %v2313_v20 = vunpack.c.l.s8.bf16 %v2026_v52 }
 0x3b0   :  { %1630 = vmatprep.subr.bf16.mxu1 %v1271_v61 }
 0x3b2   :  { %1590 = vmatpush2.bf16.msra.mxu0 %v1142_v6 }
 0x3b3   :  { %1631 = vmatpush2.bf16.msra.mxu1 %v1270_v7  ;;  %1591 = vmatprep.subr.bf16.mxu0 %v1135_v8  ;;  %v2320_v7 = vunpack.c.h.s8.bf16 %v2026_v52  ;;  %v2025_v8 = vld [vmem:[%s5442_s5 + $0x1f8] sm:$0xff] }
 0x3b4   :  { %1632 = vmatprep.subr.bf16.mxu1 %v1263_v9 }
 0x3b6   :  { %1592 = vmatpush2.bf16.msra.mxu0 %v1134_v11 }
 0x3b7   :  { %1633 = vmatpush2.bf16.msra.mxu1 %v1262_v1  ;;  %1593 = vmatprep.subr.bf16.mxu0 %v1127_v2  ;;  %v2201_v2 = vunpack.c.l.s8.bf16 %v1970_v63 }
 0x3b8   :  { %1634 = vmatprep.subr.bf16.mxu1 %v1255_v13  ;;  %v2319_v13 = vunpack.c.h.s8.bf16 %v2025_v8 }
 0x3ba   :  { %1594 = vmatpush2.bf16.msra.mxu0 %v1126_v21 }
 0x3bb   :  { %1635 = vmatpush2.bf16.msra.mxu1 %v1254_v22  ;;  %2634 = vmatprep.subr.bf16.mxu0 %v2236_v23  ;;  %v2019_v23 = vld [vmem:[%s5442_s5 + $0x1c8] sm:$0xff] }
 0x3bc   :  { %2675 = vmatprep.subr.bf16.mxu1 %v2348_v18 }
 0x3bd   :  { %1596 = vmatmul.mubr.bf16.vlgmr.msra.gmra.mxu0 %v4214_v15  ;;  %v1351_v34 = vpop.f32.mrf.mxu0  ;;  %v2222_v15 = vunpack.c.h.s8.bf16 %v1977_v29  ;;  %v2306_v29 = vunpack.c.h.s8.bf16 %v2019_v23 }
 0x3be   :  { %1637 = vmatmul.mubr.bf16.vlgmr.msra.gmra.mxu1 %v4217_v17  ;;  %v1392_v37 = vpop.f32.mrf.mxu1  ;;  %2635 = vmatpush1.bf16.msra.mxu0 %v2235_v19  ;;  %v2032_v17 = vld [vmem:[%s5442_s5 + $0x230] sm:$0xff]  ;;  %v2194_v19 = vunpack.c.h.s8.bf16 %v1963_v16 }
 0x3bf   :  { %v1393_v39 = vadd.f32 %v1392_v37, %v1351_v34  ;;  %v1353_v40 = vpop.f32.mrf.mxu0  ;;  %2636 = vmatprep.subr.bf16.mxu0 %v2229_v27  ;;  %2676 = vmatpush1.bf16.msra.mxu1 %v2347_v28  ;;  %v2333_v59 = vunpack.c.h.s8.bf16 %v2032_v17  ;;  %v2326_v6 = vunpack.c.l.s8.bf16 %v2032_v17  ;;  %v1962_v27 = vld [vmem:[%s5442_s5] sm:$0xff]  ;;  %v2312_v28 = vunpack.c.l.s8.bf16 %v2025_v8 }
 0x3c0   :  { %v1394_v46 = vpop.f32.mrf.mxu1  ;;  %2677 = vmatprep.subr.bf16.mxu1 %v2341_v32  ;;  %v2018_v32 = vld [vmem:[%s5442_s5 + $0x1c0] sm:$0xff]  ;;  %v2193_v36 = vunpack.c.h.s8.bf16 %v1962_v27 }
 0x3c1   :  { %v1686_v48 = vmul.f32 %v1649_v35, %v1393_v39  ;;  %v1395_v49 = vadd.f32 %v1394_v46, %v1353_v40  ;;  %v1355_v50 = vpop.f32.mrf.mxu0  ;;  %v2187_v39 = vunpack.c.l.s8.bf16 %v1963_v16  ;;  %v2305_v40 = vunpack.c.h.s8.bf16 %v2018_v32  ;;  %v2068_v46 = vld [vmem:[%s5442_s5 + $0x350] sm:$0xff] }
 0x3c2   :  { %v1396_v53 = vpop.f32.mrf.mxu1  ;;  %2637 = vmatpush1.bf16.msra.mxu0 %v2228_v38  ;;  %v2011_v50 = vld [vmem:[%s5442_s5 + $0x188] sm:$0xff] }
 0x3c3   :  { %v1694_v55 = vrot.slane %v1686_v48, 4  ;;  %v1687_v56 = vmul.f32 %v1653_v41, %v1395_v49  ;;  %v1356_v57 = vpop.f32.mrf.mxu0  ;;  %2638 = vmatprep.subr.bf16.mxu0 %v2222_v15  ;;  %2678 = vmatpush1.bf16.msra.mxu1 %v2340_v45  ;;  %v2012_v41 = vld [vmem:[%s5442_s5 + $0x190] sm:$0xff]  ;;  %v2299_v15 = vunpack.c.l.s8.bf16 %v2019_v23  ;;  %v2298_v53 = vunpack.c.l.s8.bf16 %v2018_v32 }
 0x3c4   :  { %v1397_v60 = vpop.f32.mrf.mxu1  ;;  %2679 = vmatprep.subr.bf16.mxu1 %v2334_v47  ;;  %v2186_v47 = vunpack.c.l.s8.bf16 %v1962_v27  ;;  %v2292_v49 = vunpack.c.h.s8.bf16 %v2012_v41  ;;  %v2285_v63 = vunpack.c.l.s8.bf16 %v2012_v41 }
 0x3c5   :  { %v1695_v12 = vadd.f32 %v1694_v55, %v1686_v48  ;;  %v1700_v51 = vrot.slane %v1687_v56, 4  ;;  %v2067_v55 = vld [vmem:[%s5442_s5 + $0x348] sm:$0xff] }
 0x3c6   :  { %2639 = vmatpush1.bf16.msra.mxu0 %v2221_v54  ;;  %v2404_v54 = vunpack.c.h.s8.bf16 %v2068_v46  ;;  %v2396_v8 = vunpack.c.l.s8.bf16 %v2067_v55 }
 0x3c7   :  { %v1696_v14 = vrot.slane %v1695_v12, 2  ;;  %v1701_v61 = vadd.f32 %v1700_v51, %v1687_v56  ;;  %2640 = vmatprep.subr.bf16.mxu0 %v2215_v58  ;;  %2680 = vmatpush1.bf16.msra.mxu1 %v2333_v59  ;;  %v2291_v58 = vunpack.c.h.s8.bf16 %v2011_v50  ;;  %v2397_v51 = vunpack.c.l.s8.bf16 %v2068_v46 }
 0x3c8   :  { %2681 = vmatprep.subr.bf16.mxu1 %v2327_v0  ;;  %v2403_v0 = vunpack.c.h.s8.bf16 %v2067_v55 }
 0x3c9   :  { %v1697_v62 = vadd.f32 %v1696_v14, %v1695_v12  ;;  %v1702_v9 = vrot.slane %v1701_v61, 2  ;;  %v2005_v12 = vld [vmem:[%s5442_s5 + $0x158] sm:$0xff] }
 0x3ca   :  { %2641 = vmatpush1.bf16.msra.mxu0 %v2214_v3  ;;  %v2061_v14 = vld [vmem:[%s5442_s5 + $0x318] sm:$0xff]  ;;  %v2271_v16 = vunpack.c.l.s8.bf16 %v2005_v12 }
 0x3cb   :  { %v1698_v11 = vrot.slane %v1697_v62, 1  ;;  %v1703_v1 = vadd.f32 %v1702_v9, %v1701_v61  ;;  %2642 = vmatprep.subr.bf16.mxu0 %v2208_v4  ;;  %2682 = vmatpush1.bf16.msra.mxu1 %v2326_v6  ;;  %v2284_v61 = vunpack.c.l.s8.bf16 %v2011_v50  ;;  %v2278_v6 = vunpack.c.h.s8.bf16 %v2005_v12  ;;  %v2060_v9 = vld [vmem:[%s5442_s5 + $0x310] sm:$0xff] }
 0x3cc   :  { %2683 = vmatprep.subr.bf16.mxu1 %v2320_v7  ;;  %v2004_v7 = vld [vmem:[%s5442_s5 + $0x150] sm:$0xff]  ;;  %v2382_v27 = vunpack.c.l.s8.bf16 %v2060_v9 }
 0x3cd   :  { %v1699_v21 = vadd.f32 %v1698_v11, %v1697_v62  ;;  %v1704_v22 = vrot.slane %v1703_v1, 1  ;;  %v2390_v62 = vunpack.c.h.s8.bf16 %v2061_v14 }
 0x3ce   :  { %2643 = vmatpush1.bf16.msra.mxu0 %v2207_v10 }
 0x3cf   :  { %v1742_v18 = vmul.f32 0.125, %v1699_v21  ;;  %v1705_v25 = vadd.f32 %v1704_v22, %v1703_v1  ;;  %2644 = vmatprep.subr.bf16.mxu0 %v2201_v2  ;;  %2684 = vmatpush1.bf16.msra.mxu1 %v2319_v13  ;;  %v2277_v1 = vunpack.c.h.s8.bf16 %v2004_v7  ;;  %v1998_v21 = vld [vmem:[%s5442_s5 + $0x120] sm:$0xff]  ;;  %v2383_v22 = vunpack.c.l.s8.bf16 %v2061_v14 }
 0x3d0   :  { %2685 = vmatprep.subr.bf16.mxu1 %v2313_v20  ;;  %v2389_v20 = vunpack.c.h.s8.bf16 %v2060_v9 }
 0x3d1   :  { %v4569_v34 = vsub.f32 %v1686_v48, %v1742_v18  ;;  %v1743_v35 = vmul.f32 0.125, %v1705_v25  ;;  %v2270_v18 = vunpack.c.l.s8.bf16 %v2004_v7  ;;  %v2264_v25 = vunpack.c.h.s8.bf16 %v1998_v21 }
 0x3d2   :  { %2645 = vmatpush1.bf16.msra.mxu0 %v2200_v24  ;;  %v2054_v24 = vld [vmem:[%s5442_s5 + $0x2e0] sm:$0xff] }
 0x3d3   :  { %v1758_v37 = vmul.f32 %v4569_v34, %v4569_v34  ;;  %v4573_v38 = vsub.f32 %v1687_v56, %v1743_v35  ;;  %2646 = vmatprep.subr.bf16.mxu0 %v2194_v19  ;;  %2686 = vmatpush1.bf16.msra.mxu1 %v2312_v28  ;;  %v1997_v19 = vld [vmem:[%s5442_s5 + $0x118] sm:$0xff]  ;;  %v2376_v28 = vunpack.c.h.s8.bf16 %v2054_v24  ;;  %v2257_v35 = vunpack.c.l.s8.bf16 %v1998_v21 }
 0x3d4   :  { %2687 = vmatprep.subr.bf16.mxu1 %v2306_v29  ;;  %v2053_v29 = vld [vmem:[%s5442_s5 + $0x2d8] sm:$0xff]  ;;  %v2263_v32 = vunpack.c.h.s8.bf16 %v1997_v19  ;;  %v2256_v41 = vunpack.c.l.s8.bf16 %v1997_v19  ;;  %v1661_v21 = vrot.slane %v4525_v26, %v4191_v44 }
 0x3d5   :  { %v1766_v42 = vrot.slane %v1758_v37, 4  ;;  %v1759_v45 = vmul.f32 %v4573_v38, %v4573_v38  ;;  %v2368_v46 = vunpack.c.l.s8.bf16 %v2053_v29 }
 0x3d6   :  { %2647 = vmatpush1.bf16.msra.mxu0 %v2193_v36  ;;  %v2375_v36 = vunpack.c.h.s8.bf16 %v2053_v29  ;;  %v2088_v29 = vld [vmem:[%s5442_s5 + $0x3f0] sm:$0xff] }
 0x3d7   :  { %v1767_v17 = vadd.f32 %v1766_v42, %v1758_v37  ;;  %v1772_v48 = vrot.slane %v1759_v45, 4  ;;  %2648 = vmatprep.subr.bf16.mxu0 %v2187_v39  ;;  %2688 = vmatpush1.bf16.msra.mxu1 %v2305_v40  ;;  %v1991_v37 = vld [vmem:[%s5442_s5 + $0xe8] sm:$0xff]  ;;  %v2369_v39 = vunpack.c.l.s8.bf16 %v2054_v24 }
 0x3d8   :  { %2689 = vmatprep.subr.bf16.mxu1 %v2299_v15  ;;  %v2047_v40 = vld [vmem:[%s5442_s5 + $0x2a8] sm:$0xff]  ;;  %v2250_v42 = vunpack.c.h.s8.bf16 %v1991_v37 }
 0x3d9   :  { %v1768_v56 = vrot.slane %v1767_v17, 2  ;;  %v1773_v57 = vadd.f32 %v1772_v48, %v1759_v45  ;;  %v4622_v15 = vld [vmem:[%s5443_s6 + $0xe] sm:$0xff]  ;;  %v1990_v45 = vld [vmem:[%s5442_s5 + $0xe0] sm:$0xff] }
 0x3da   :  { %2649 = vmatpush1.bf16.msra.mxu0 %v2186_v47  ;;  %v4630_v47 = vld [vmem:[%s5443_s6 + $0x16] sm:$0xff]  ;;  %v2046_v48 = vld [vmem:[%s5442_s5 + $0x2a0] sm:$0xff] }
 0x3db   :  { %v1769_v59 = vadd.f32 %v1768_v56, %v1767_v17  ;;  %v1774_v60 = vrot.slane %v1773_v57, 2  ;;  %2650 = vmatprep.subr.bf16.mxu0 %v2292_v49  ;;  %2690 = vmatpush1.bf16.msra.mxu1 %v2298_v53  ;;  %v2362_v17 = vunpack.c.h.s8.bf16 %v2047_v40  ;;  %v1851_v49 = vrot.slane %v4622_v15, %v4065_v31 }
 0x3dc   :  { %2691 = vmatprep.subr.bf16.mxu1 %v2404_v54  ;;  %v2249_v53 = vunpack.c.h.s8.bf16 %v1990_v45  ;;  %v2243_v54 = vunpack.c.l.s8.bf16 %v1991_v37  ;;  %v1855_v56 = vrot.slane %v4622_v15, %v4071_v33  ;;  %v2354_v14 = vunpack.c.l.s8.bf16 %v2046_v48 }
 0x3dd   :  { %v1770_v52 = vrot.slane %v1769_v59, 1  ;;  %v1775_v3 = vadd.f32 %v1774_v60, %v1773_v57  ;;  %v1901_v57 = vrot.slane %v4630_v47, %v4065_v31  ;;  %v2355_v60 = vunpack.c.l.s8.bf16 %v2047_v40 }
 0x3de   :  { %2651 = vmatpush2.bf16.msra.mxu0 %v2291_v58  ;;  %v2361_v58 = vunpack.c.h.s8.bf16 %v2046_v48 }
 0x3df   :  { %v1771_v4 = vadd.f32 %v1770_v52, %v1769_v59  ;;  %v1776_v5 = vrot.slane %v1775_v3, 1  ;;  %2652 = vmatprep.subr.bf16.mxu0 %v2285_v63  ;;  %2692 = vmatpush2.bf16.msra.mxu1 %v2403_v0  ;;  %v2096_v63 = vld [vmem:[%s5442_s5 + $0x430] sm:$0xff] }
 0x3e0   :  { %2693 = vmatprep.subr.bf16.mxu1 %v2397_v51  ;;  %v2242_v51 = vunpack.c.l.s8.bf16 %v1990_v45 }
 0x3e1   :  { %v1814_v10 = vmul.f32 0.125, %v1771_v4  ;;  %v1777_v11 = vadd.f32 %v1776_v5, %v1775_v3 }
 0x3e2   :  { %2653 = vmatpush2.bf16.msra.mxu0 %v2284_v61  ;;  %v2460_v61 = vunpack.c.h.s8.bf16 %v2096_v63 }
 0x3e3   :  { %v1822_v2 = vadd.f32 1e-05, %v1814_v10  ;;  %v1815_v13 = vmul.f32 0.125, %v1777_v11  ;;  %2654 = vmatprep.subr.bf16.mxu0 %v2278_v6  ;;  %2694 = vmatpush2.bf16.msra.mxu1 %v2396_v8  ;;  %v1657_v8 = vrot.slane %v4525_v26, %v4188_v43  ;;  %v4658_v10 = vld [vmem:[%s5442_s5 + $0x5f0] sm:$0xff] }
 0x3e4   :  { %2695 = vmatprep.subr.bf16.mxu1 %v2390_v62 }
 0x3e5   :  { %3715 = vrsqrt.f32 %v1822_v2  ;;  %v1823_v23 = vadd.f32 1e-05, %v1815_v13  ;;  %v2453_v2 = vunpack.c.l.s8.bf16 %v2096_v63  ;;  %v2572_v13 = vunpack.c.h.s8.bf16 %v4658_v10 }
 0x3e6   :  { %2655 = vmatpush2.bf16.msra.mxu0 %v2277_v1 }
 0x3e7   :  { %3717 = vrsqrt.f32 %v1823_v23  ;;  %2656 = vmatprep.subr.bf16.mxu0 %v2271_v16  ;;  %2696 = vmatpush2.bf16.msra.mxu1 %v2389_v20 }
 0x3e8   :  { %2697 = vmatprep.subr.bf16.mxu1 %v2383_v22  ;;  %v2089_v22 = vld [vmem:[%s5442_s5 + $0x3f8] sm:$0xff] }
 0x3ea   :  { %2657 = vmatpush2.bf16.msra.mxu0 %v2270_v18 }
 0x3eb   :  { %2658 = vmatprep.subr.bf16.mxu0 %v2264_v25  ;;  %2698 = vmatpush2.bf16.msra.mxu1 %v2382_v27 }
 0x3ec   :  { %2699 = vmatprep.subr.bf16.mxu1 %v2376_v28  ;;  %v2446_v28 = vunpack.c.h.s8.bf16 %v2089_v22 }
 0x3ee   :  { %2659 = vmatpush2.bf16.msra.mxu0 %v2263_v32 }
 0x3ef   :  { %2660 = vmatprep.subr.bf16.mxu0 %v2257_v35  ;;  %2700 = vmatpush2.bf16.msra.mxu1 %v2375_v36 }
 0x3f0   :  { %2701 = vmatprep.subr.bf16.mxu1 %v2369_v39 }
 0x3f2   :  { %v3716_v50 = vpop.eup %3715  ;;  %2661 = vmatpush2.bf16.msra.mxu0 %v2256_v41  ;;  %v2445_v41 = vunpack.c.h.s8.bf16 %v2088_v29 }
 0x3f3   :  { %v1838_v55 = vmul.f32 %v3716_v50, %v4569_v34  ;;  %2662 = vmatprep.subr.bf16.mxu0 %v2250_v42  ;;  %2702 = vmatpush2.bf16.msra.mxu1 %v2368_v46  ;;  %v1905_v34 = vrot.slane %v4630_v47, %v4071_v33  ;;  %v2439_v42 = vunpack.c.l.s8.bf16 %v2089_v22  ;;  %v2438_v50 = vunpack.c.l.s8.bf16 %v2088_v29  ;;  %v2117_v29 = vld [vmem:[%s5442_s5 + $0x4d8] sm:$0xff] }
 0x3f4   :  { %v3718_v59 = vpop.eup %3717  ;;  %2703 = vmatprep.subr.bf16.mxu1 %v2362_v17  ;;  %v2082_v17 = vld [vmem:[%s5442_s5 + $0x3c0] sm:$0xff] }
 0x3f5   :  { %v1839_v0 = vmul.f32 %v3718_v59, %v4573_v38  ;;  %v1888_v12 = vmul.f32 %v1851_v49, %v1838_v55  ;;  %v2095_v38 = vld [vmem:[%s5442_s5 + $0x428] sm:$0xff] }
 0x3f6   :  { %2663 = vmatpush2.bf16.msra.mxu0 %v2249_v53  ;;  %v2459_v9 = vunpack.c.h.s8.bf16 %v2095_v38  ;;  %v2452_v19 = vunpack.c.l.s8.bf16 %v2095_v38  ;;  %v2432_v53 = vunpack.c.h.s8.bf16 %v2082_v17 }
 0x3f7   :  { %2664 = vmatprep.subr.bf16.mxu0 %v2243_v54  ;;  %v1889_v52 = vmul.f32 %v1855_v56, %v1839_v0  ;;  %v1938_v3 = vadd.f32 %v1901_v57, %v1888_v12  ;;  %2704 = vmatpush2.bf16.msra.mxu1 %v2361_v58  ;;  %v2081_v54 = vld [vmem:[%s5442_s5 + $0x3b8] sm:$0xff] }
 0x3f8   :  { %2705 = vmatprep.subr.bf16.mxu1 %v2355_v60  ;;  %v2431_v59 = vunpack.c.h.s8.bf16 %v2081_v54  ;;  %v2425_v60 = vunpack.c.l.s8.bf16 %v2082_v17  ;;  %v2110_v17 = vld [vmem:[%s5442_s5 + $0x4a0] sm:$0xff] }
 0x3f9   :  { %v1939_v4 = vadd.f32 %v1905_v34, %v1889_v52  ;;  %v1946_v5 = vmax.f32 %v1938_v3, 0.0  ;;  %v2075_v34 = vld [vmem:[%s5442_s5 + $0x388] sm:$0xff]  ;;  %v2424_v52 = vunpack.c.l.s8.bf16 %v2081_v54  ;;  %v2481_v54 = vunpack.c.l.s8.bf16 %v2110_v17 }
 0x3fa   :  { %2665 = vmatpush2.bf16.msra.mxu0 %v2242_v51  ;;  %v2418_v3 = vunpack.c.h.s8.bf16 %v2075_v34 }
 0x3fb   :  { %v1947_v6 = vmax.f32 %v1939_v4, 0.0  ;;  %2706 = vmatpush2.bf16.msra.mxu1 %v2354_v14  ;;  %2716 = vmatprep.subr.bf16.mxu0 %v2460_v61  ;;  %v4660_v1 = vpack.c.bf16 %v1946_v5, %v1946_v5  ;;  %v2074_v14 = vld [vmem:[%s5442_s5 + $0x380] sm:$0xff] }
 0x3fc   :  { %2757 = vmatprep.subr.bf16.mxu1 %v2572_v13 }
 0x3fd   :  { %v1433_v7 = vpop.f32.mrf.mxu0  ;;  %v4653_v62 = vpack.c.bf16 %v1947_v6, %v1947_v6  ;;  %v2417_v6 = vunpack.c.h.s8.bf16 %v2074_v14 }
 0x3fe   :  { %v1474_v11 = vpop.f32.mrf.mxu1 }
 0x3ff   :  { %v1475_v16 = vadd.f32 %v1474_v11, %v1433_v7  ;;  %v1435_v20 = vpop.f32.mrf.mxu0  ;;  %2666 = vmatprep.mubr.bf16.mxu0 %v4653_v62  ;;  %v2411_v7 = vunpack.c.l.s8.bf16 %v2075_v34  ;;  %v2124_v11 = vld [vmem:[%s5442_s5 + $0x510] sm:$0xff]  ;;  %v1909_v34 = vrot.slane %v4630_v47, %v4188_v43 }
 0x400   :  { %v1476_v23 = vpop.f32.mrf.mxu1  ;;  %2667 = vmatmul.mubr.bf16.vlgmr.msra.gmra.mxu0 %v4660_v1 }
 0x401   :  { %v1688_v24 = vmul.f32 %v1657_v8, %v1475_v16  ;;  %v1477_v18 = vadd.f32 %v1476_v23, %v1435_v20  ;;  %v1437_v25 = vpop.f32.mrf.mxu0  ;;  %2717 = vmatpush1.bf16.msra.mxu0 %v2459_v9  ;;  %v2410_v16 = vunpack.c.l.s8.bf16 %v2074_v14  ;;  %v2516_v20 = vunpack.c.h.s8.bf16 %v2124_v11 }
 0x402   :  { %v1478_v27 = vpop.f32.mrf.mxu1  ;;  %2718 = vmatprep.subr.bf16.mxu0 %v2453_v2 }
 0x403   :  { %v1706_v32 = vrot.slane %v1688_v24, 4  ;;  %v1689_v35 = vmul.f32 %v1661_v21, %v1477_v18  ;;  %v1438_v36 = vpop.f32.mrf.mxu0  ;;  %v2123_v21 = vld [vmem:[%s5442_s5 + $0x508] sm:$0xff] }
 0x404   :  { %v1479_v37 = vpop.f32.mrf.mxu1  ;;  %v2515_v25 = vunpack.c.h.s8.bf16 %v2123_v21  ;;  %v2508_v36 = vunpack.c.l.s8.bf16 %v2123_v21 }
 0x405   :  { %v1707_v39 = vadd.f32 %v1706_v32, %v1688_v24  ;;  %v1712_v40 = vrot.slane %v1689_v35, 4  ;;  %2719 = vmatpush1.bf16.msra.mxu0 %v2452_v19  ;;  %v2509_v19 = vunpack.c.l.s8.bf16 %v2124_v11  ;;  %v2502_v37 = vunpack.c.h.s8.bf16 %v2117_v29 }
 0x406   :  { %2720 = vmatprep.subr.bf16.mxu0 %v2446_v28 }
 0x407   :  { %v1708_v45 = vrot.slane %v1707_v39, 2  ;;  %v1713_v46 = vadd.f32 %v1712_v40, %v1689_v35 }
 0x409   :  { %v1709_v48 = vadd.f32 %v1708_v45, %v1707_v39  ;;  %v1714_v49 = vrot.slane %v1713_v46, 2  ;;  %2721 = vmatpush1.bf16.msra.mxu0 %v2445_v41  ;;  %v2116_v39 = vld [vmem:[%s5442_s5 + $0x4d0] sm:$0xff] }
 0x40a   :  { %2722 = vmatprep.subr.bf16.mxu0 %v2439_v42  ;;  %v2501_v45 = vunpack.c.h.s8.bf16 %v2116_v39 }
 0x40b   :  { %v1710_v55 = vrot.slane %v1709_v48, 1  ;;  %v1715_v56 = vadd.f32 %v1714_v49, %v1713_v46  ;;  %v2495_v46 = vunpack.c.l.s8.bf16 %v2117_v29  ;;  %v2488_v49 = vunpack.c.h.s8.bf16 %v2110_v17  ;;  %v2145_v29 = vld [vmem:[%s5442_s5 + $0x5b8] sm:$0xff] }
 0x40d   :  { %v1711_v57 = vadd.f32 %v1710_v55, %v1709_v48  ;;  %v1716_v58 = vrot.slane %v1715_v56, 1  ;;  %2723 = vmatpush1.bf16.msra.mxu0 %v2438_v50  ;;  %v2494_v48 = vunpack.c.l.s8.bf16 %v2116_v39  ;;  %v2109_v50 = vld [vmem:[%s5442_s5 + $0x498] sm:$0xff]  ;;  %v2103_v55 = vld [vmem:[%s5442_s5 + $0x468] sm:$0xff] }
 0x40e   :  { %2724 = vmatprep.subr.bf16.mxu0 %v2432_v53  ;;  %v2487_v53 = vunpack.c.h.s8.bf16 %v2109_v50 }
 0x40f   :  { %v1744_v63 = vmul.f32 0.125, %v1711_v57  ;;  %v1717_v0 = vadd.f32 %v1716_v58, %v1715_v56  ;;  %v1859_v56 = vrot.slane %v4622_v15, %v4188_v43  ;;  %v2480_v57 = vunpack.c.l.s8.bf16 %v2109_v50 }
 0x410   :  { %v2551_v50 = vunpack.c.l.s8.bf16 %v2145_v29 }
 0x411   :  { %v4682_v12 = vsub.f32 %v1688_v24, %v1744_v63  ;;  %v1745_v51 = vmul.f32 0.125, %v1717_v0  ;;  %2725 = vmatpush1.bf16.msra.mxu0 %v2431_v59  ;;  %v2474_v59 = vunpack.c.h.s8.bf16 %v2103_v55  ;;  %v1863_v0 = vrot.slane %v4622_v15, %v4191_v44 }
 0x412   :  { %2726 = vmatprep.subr.bf16.mxu0 %v2425_v60  ;;  %v2102_v60 = vld [vmem:[%s5442_s5 + $0x460] sm:$0xff] }
 0x413   :  { %v1760_v61 = vmul.f32 %v4682_v12, %v4682_v12  ;;  %v4689_v4 = vsub.f32 %v1689_v35, %v1745_v51 }
 0x415   :  { %v1778_v5 = vrot.slane %v1760_v61, 4  ;;  %v1761_v38 = vmul.f32 %v4689_v4, %v4689_v4  ;;  %2727 = vmatpush1.bf16.msra.mxu0 %v2424_v52 }
 0x416   :  { %2728 = vmatprep.subr.bf16.mxu0 %v2418_v3  ;;  %v1913_v3 = vrot.slane %v4630_v47, %v4191_v44 }
 0x417   :  { %v1779_v8 = vadd.f32 %v1778_v5, %v1760_v61  ;;  %v1784_v9 = vrot.slane %v1761_v38, 4  ;;  %v2473_v61 = vunpack.c.h.s8.bf16 %v2102_v60  ;;  %v2467_v5 = vunpack.c.l.s8.bf16 %v2103_v55  ;;  %v2138_v55 = vld [vmem:[%s5442_s5 + $0x580] sm:$0xff] }
 0x419   :  { %v1780_v2 = vrot.slane %v1779_v8, 2  ;;  %v1785_v13 = vadd.f32 %v1784_v9, %v1761_v38  ;;  %2729 = vmatpush1.bf16.msra.mxu0 %v2417_v6 }
 0x41a   :  { %2730 = vmatprep.subr.bf16.mxu0 %v2411_v7  ;;  %v4733_v7 = vsub.s32 4, %v4062_v30 }
 0x41b   :  { %v1781_v22 = vadd.f32 %v1780_v2, %v1779_v8  ;;  %v1786_v23 = vrot.slane %v1785_v13, 2  ;;  %v2151_v2 = vld [vmem:[%s5442_s5 + $0x5e8] sm:$0xff] }
 0x41c   :  { %v1665_v21 = vrot.slane %v4525_v26, %v4733_v7  ;;  %v2564_v39 = vunpack.c.l.s8.bf16 %v2151_v2 }
 0x41d   :  { %v1782_v24 = vrot.slane %v1781_v22, 1  ;;  %v1787_v18 = vadd.f32 %v1786_v23, %v1785_v13  ;;  %2731 = vmatpush1.bf16.msra.mxu0 %v2410_v16  ;;  %v4740_v16 = vsub.s32 5, %v4062_v30  ;;  %v2571_v23 = vunpack.c.h.s8.bf16 %v2151_v2 }
 0x41e   :  { %2732 = vmatprep.subr.bf16.mxu0 %v2516_v20 }
 0x41f   :  { %v1783_v27 = vadd.f32 %v1782_v24, %v1781_v22  ;;  %v1788_v28 = vrot.slane %v1787_v18, 1 }
 0x421   :  { %v1816_v32 = vmul.f32 0.125, %v1783_v27  ;;  %v1789_v35 = vadd.f32 %v1788_v28, %v1787_v18  ;;  %2733 = vmatpush2.bf16.msra.mxu0 %v2515_v25  ;;  %v2565_v25 = vunpack.c.l.s8.bf16 %v4658_v10  ;;  %v1669_v28 = vrot.slane %v4525_v26, %v4740_v16 }
 0x422   :  { %2734 = vmatprep.subr.bf16.mxu0 %v2509_v19 }
 0x423   :  { %v1824_v40 = vadd.f32 1e-05, %v1816_v32  ;;  %v1817_v41 = vmul.f32 0.125, %v1789_v35 }
 0x425   :  { %3719 = vrsqrt.f32 %v1824_v40  ;;  %v1825_v42 = vadd.f32 1e-05, %v1817_v41  ;;  %2735 = vmatpush2.bf16.msra.mxu0 %v2508_v36  ;;  %v2558_v40 = vunpack.c.h.s8.bf16 %v2145_v29  ;;  %v2144_v41 = vld [vmem:[%s5442_s5 + $0x5b0] sm:$0xff] }
 0x426   :  { %2736 = vmatprep.subr.bf16.mxu0 %v2502_v37 }
 0x427   :  { %3721 = vrsqrt.f32 %v1825_v42 }
 0x429   :  { %2737 = vmatpush2.bf16.msra.mxu0 %v2501_v45 }
 0x42a   :  { %2738 = vmatprep.subr.bf16.mxu0 %v2495_v46 }
 0x42d   :  { %2739 = vmatpush2.bf16.msra.mxu0 %v2494_v48 }
 0x42e   :  { %2740 = vmatprep.subr.bf16.mxu0 %v2488_v49  ;;  %v2557_v49 = vunpack.c.h.s8.bf16 %v2144_v41 }
 0x431   :  { %2741 = vmatpush2.bf16.msra.mxu0 %v2487_v53 }
 0x432   :  { %v3720_v58 = vpop.eup %3719  ;;  %2742 = vmatprep.subr.bf16.mxu0 %v2481_v54 }
 0x433   :  { %v1840_v63 = vmul.f32 %v3720_v58, %v4682_v12  ;;  %v4730_v12 = vld [vmem:[%s5442_s5 + $0xc0] sm:$0xff]  ;;  %v2550_v58 = vunpack.c.l.s8.bf16 %v2144_v41 }
 0x434   :  { %v3722_v51 = vpop.eup %3721  ;;  %v2238_v11 = vunpack.c.h.s8.bf16 %v4730_v12 }
 0x435   :  { %v1841_v52 = vmul.f32 %v3722_v51, %v4689_v4  ;;  %v1890_v14 = vmul.f32 %v1859_v56, %v1840_v63  ;;  %2743 = vmatpush2.bf16.msra.mxu0 %v2480_v57  ;;  %v2466_v4 = vunpack.c.l.s8.bf16 %v2102_v60  ;;  %v2137_v60 = vld [vmem:[%s5442_s5 + $0x578] sm:$0xff] }
 0x436   :  { %2744 = vmatprep.subr.bf16.mxu0 %v2474_v59  ;;  %v2544_v59 = vunpack.c.h.s8.bf16 %v2138_v55 }
 0x437   :  { %v1891_v38 = vmul.f32 %v1863_v0, %v1841_v52  ;;  %v1940_v6 = vadd.f32 %v1909_v34, %v1890_v14  ;;  %v2543_v52 = vunpack.c.h.s8.bf16 %v2137_v60 }
 0x439   :  { %v1941_v8 = vadd.f32 %v1913_v3, %v1891_v38  ;;  %2745 = vmatpush2.bf16.msra.mxu0 %v2473_v61  ;;  %v1948_v9 = vmax.f32 %v1940_v6, 0.0  ;;  %v2537_v3 = vunpack.c.l.s8.bf16 %v2138_v55 }
 0x43a   :  { %2746 = vmatprep.subr.bf16.mxu0 %v2467_v5  ;;  %v2131_v5 = vld [vmem:[%s5442_s5 + $0x548] sm:$0xff] }
 0x43b   :  { %v1949_v13 = vmax.f32 %v1941_v8, 0.0  ;;  %v4746_v18 = vpack.c.bf16 %v1948_v9, %v1948_v9  ;;  %v2536_v8 = vunpack.c.l.s8.bf16 %v2137_v60  ;;  %v2130_v9 = vld [vmem:[%s5442_s5 + $0x540] sm:$0xff] }
 0x43c   :  { %v2522_v29 = vunpack.c.l.s8.bf16 %v2130_v9 }
 0x43d   :  { %v1515_v20 = vpop.f32.mrf.mxu0  ;;  %v4744_v22 = vpack.c.bf16 %v1949_v13, %v1949_v13  ;;  %2747 = vmatpush2.bf16.msra.mxu0 %v2466_v4  ;;  %v2530_v4 = vunpack.c.h.s8.bf16 %v2131_v5 }
 0x43e   :  { %v1556_v24 = vpop.f32.mrf.mxu1  ;;  %2798 = vmatprep.subr.bf16.mxu0 %v2238_v11 }
 0x43f   :  { %v1557_v19 = vadd.f32 %v1556_v24, %v1515_v20  ;;  %2707 = vmatprep.mubr.bf16.mxu1 %v4744_v22  ;;  %v1517_v27 = vpop.f32.mrf.mxu0 }
 0x440   :  { %v1558_v32 = vpop.f32.mrf.mxu1  ;;  %2708 = vmatmul.mubr.bf16.vlgmr.msra.gmra.mxu1 %v4746_v18 }
 0x441   :  { %v1690_v35 = vmul.f32 %v1665_v21, %v1557_v19  ;;  %v1559_v36 = vadd.f32 %v1558_v32, %v1517_v27  ;;  %v1519_v37 = vpop.f32.mrf.mxu0  ;;  %2758 = vmatpush1.bf16.msra.mxu1 %v2571_v23  ;;  %v2529_v21 = vunpack.c.h.s8.bf16 %v2130_v9  ;;  %v2523_v23 = vunpack.c.l.s8.bf16 %v2131_v5  ;;  %v2180_v19 = vld [vmem:[%s5442_s5 + $0x6d0] sm:$0xff]  ;;  %v2158_v5 = vld [vmem:[%s5442_s5 + $0x620] sm:$0xff] }
 0x442   :  { %v1560_v10 = vpop.f32.mrf.mxu1  ;;  %2759 = vmatprep.subr.bf16.mxu1 %v2565_v25  ;;  %v2628_v32 = vunpack.c.h.s8.bf16 %v2180_v19  ;;  %v2621_v41 = vunpack.c.l.s8.bf16 %v2180_v19  ;;  %v4819_v19 = vsub.s32 6, %v4062_v30 }
 0x443   :  { %v1718_v26 = vrot.slane %v1690_v35, 4  ;;  %v1691_v42 = vmul.f32 %v1669_v28, %v1559_v36  ;;  %v1520_v45 = vpop.f32.mrf.mxu0 }
 0x444   :  { %v1561_v46 = vpop.f32.mrf.mxu1  ;;  %v2173_v45 = vld [vmem:[%s5442_s5 + $0x698] sm:$0xff] }
 0x445   :  { %v1719_v17 = vadd.f32 %v1718_v26, %v1690_v35  ;;  %v1724_v48 = vrot.slane %v1691_v42, 4  ;;  %2760 = vmatpush1.bf16.msra.mxu1 %v2564_v39 }
 0x446   :  { %2761 = vmatprep.subr.bf16.mxu1 %v2558_v40 }
 0x447   :  { %v1720_v53 = vrot.slane %v1719_v17, 2  ;;  %v1725_v54 = vadd.f32 %v1724_v48, %v1691_v42 }
 0x449   :  { %v1721_v56 = vadd.f32 %v1720_v53, %v1719_v17  ;;  %v1726_v57 = vrot.slane %v1725_v54, 2  ;;  %2762 = vmatpush1.bf16.msra.mxu1 %v2557_v49  ;;  %v2614_v49 = vunpack.c.h.s8.bf16 %v2173_v45 }
 0x44a   :  { %2763 = vmatprep.subr.bf16.mxu1 %v2551_v50  ;;  %v2172_v50 = vld [vmem:[%s5442_s5 + $0x690] sm:$0xff] }
 0x44b   :  { %v1722_v63 = vrot.slane %v1721_v56, 1  ;;  %v1727_v0 = vadd.f32 %v1726_v57, %v1725_v54  ;;  %v2607_v57 = vunpack.c.l.s8.bf16 %v2173_v45  ;;  %v2231_v45 = vunpack.c.l.s8.bf16 %v4730_v12 }
 0x44d   :  { %v1723_v34 = vadd.f32 %v1722_v63, %v1721_v56  ;;  %v1728_v51 = vrot.slane %v1727_v0, 1  ;;  %2764 = vmatpush1.bf16.msra.mxu1 %v2550_v58  ;;  %v2613_v56 = vunpack.c.h.s8.bf16 %v2172_v50  ;;  %v2166_v58 = vld [vmem:[%s5442_s5 + $0x660] sm:$0xff]  ;;  %v2165_v63 = vld [vmem:[%s5442_s5 + $0x658] sm:$0xff] }
 0x44e   :  { %2765 = vmatprep.subr.bf16.mxu1 %v2544_v59  ;;  %v2606_v59 = vunpack.c.l.s8.bf16 %v2172_v50  ;;  %v2600_v60 = vunpack.c.h.s8.bf16 %v2166_v58 }
 0x44f   :  { %v1746_v14 = vmul.f32 0.125, %v1723_v34  ;;  %v1729_v61 = vadd.f32 %v1728_v51, %v1727_v0  ;;  %v2599_v0 = vunpack.c.h.s8.bf16 %v2165_v63  ;;  %v2593_v34 = vunpack.c.l.s8.bf16 %v2166_v58  ;;  %v2159_v51 = vld [vmem:[%s5442_s5 + $0x628] sm:$0xff] }
 0x451   :  { %v4768_v38 = vsub.f32 %v1690_v35, %v1746_v14  ;;  %v1747_v6 = vmul.f32 0.125, %v1729_v61  ;;  %2766 = vmatpush1.bf16.msra.mxu1 %v2543_v52  ;;  %v2179_v35 = vld [vmem:[%s5442_s5 + $0x6c8] sm:$0xff]  ;;  %v1867_v52 = vrot.slane %v4622_v15, %v4733_v7  ;;  %v2586_v61 = vunpack.c.h.s8.bf16 %v2159_v51 }
 0x452   :  { %2767 = vmatprep.subr.bf16.mxu1 %v2537_v3  ;;  %v2627_v40 = vunpack.c.h.s8.bf16 %v2179_v35  ;;  %v2620_v48 = vunpack.c.l.s8.bf16 %v2179_v35  ;;  %v2592_v3 = vunpack.c.l.s8.bf16 %v2165_v63 }
 0x453   :  { %v1762_v11 = vmul.f32 %v4768_v38, %v4768_v38  ;;  %v4775_v2 = vsub.f32 %v1691_v42, %v1747_v6 }
 0x455   :  { %v1790_v13 = vrot.slane %v1762_v11, 4  ;;  %v1763_v20 = vmul.f32 %v4775_v2, %v4775_v2  ;;  %2768 = vmatpush1.bf16.msra.mxu1 %v2536_v8  ;;  %v1871_v8 = vrot.slane %v4622_v15, %v4740_v16 }
 0x456   :  { %2769 = vmatprep.subr.bf16.mxu1 %v2530_v4  ;;  %v1917_v4 = vrot.slane %v4630_v47, %v4733_v7 }
 0x457   :  { %v1791_v24 = vadd.f32 %v1790_v13, %v1762_v11  ;;  %v1796_v25 = vrot.slane %v1763_v20, 4  ;;  %v1921_v13 = vrot.slane %v4630_v47, %v4740_v16 }
 0x459   :  { %v1792_v27 = vrot.slane %v1791_v24, 2  ;;  %v1797_v28 = vadd.f32 %v1796_v25, %v1763_v20  ;;  %2770 = vmatpush1.bf16.msra.mxu1 %v2529_v21  ;;  %v2585_v21 = vunpack.c.h.s8.bf16 %v2158_v5 }
 0x45a   :  { %2771 = vmatprep.subr.bf16.mxu1 %v2523_v23  ;;  %v2579_v23 = vunpack.c.l.s8.bf16 %v2159_v51 }
 0x45b   :  { %v1793_v36 = vadd.f32 %v1792_v27, %v1791_v24  ;;  %v1798_v37 = vrot.slane %v1797_v28, 2 }
 0x45d   :  { %v1794_v39 = vrot.slane %v1793_v36, 1  ;;  %v1799_v10 = vadd.f32 %v1798_v37, %v1797_v28  ;;  %2772 = vmatpush1.bf16.msra.mxu1 %v2522_v29  ;;  %v1985_v29 = vld [vmem:[%s5442_s5 + $0xb8] sm:$0xff] }
 0x45e   :  { %2773 = vmatprep.subr.bf16.mxu1 %v2628_v32 }
 0x45f   :  { %v1795_v26 = vadd.f32 %v1794_v39, %v1793_v36  ;;  %v1800_v42 = vrot.slane %v1799_v10, 1  ;;  %v4826_v36 = vsub.s32 7, %v4062_v30  ;;  %v3731_v39 = vld [vmem:[%s5443_s6 + $0x1e] sm:$0xff] }
 0x461   :  { %v1818_v46 = vmul.f32 0.125, %v1795_v26  ;;  %v1801_v17 = vadd.f32 %v1800_v42, %v1799_v10  ;;  %2774 = vmatpush2.bf16.msra.mxu1 %v2627_v40  ;;  %v1673_v10 = vrot.slane %v3731_v39, %v4819_v19 }
 0x462   :  { %2775 = vmatprep.subr.bf16.mxu1 %v2621_v41  ;;  %v2237_v41 = vunpack.c.h.s8.bf16 %v1985_v29 }
 0x463   :  { %v1826_v53 = vadd.f32 1e-05, %v1818_v46  ;;  %v1819_v54 = vmul.f32 0.125, %v1801_v17  ;;  %v1677_v17 = vrot.slane %v3731_v39, %v4826_v36 }
 0x465   :  { %3723 = vrsqrt.f32 %v1826_v53  ;;  %v1827_v55 = vadd.f32 1e-05, %v1819_v54  ;;  %2776 = vmatpush2.bf16.msra.mxu1 %v2620_v48  ;;  %v1979_v48 = vld [vmem:[%s5442_s5 + $0x88] sm:$0xff]  ;;  %v2230_v54 = vunpack.c.l.s8.bf16 %v1985_v29 }
 0x466   :  { %2777 = vmatprep.subr.bf16.mxu1 %v2614_v49 }
 0x467   :  { %3725 = vrsqrt.f32 %v1827_v55 }
 0x469   :  { %2778 = vmatpush2.bf16.msra.mxu1 %v2613_v56  ;;  %v2224_v56 = vunpack.c.h.s8.bf16 %v1979_v48 }
 0x46a   :  { %2779 = vmatprep.subr.bf16.mxu1 %v2607_v57  ;;  %v1978_v57 = vld [vmem:[%s5442_s5 + $0x80] sm:$0xff] }
 0x46b   :  { %v2223_v51 = vunpack.c.h.s8.bf16 %v1978_v57 }
 0x46d   :  { %2780 = vmatpush2.bf16.msra.mxu1 %v2606_v59 }
 0x46e   :  { %2781 = vmatprep.subr.bf16.mxu1 %v2600_v60 }
 0x471   :  { %2782 = vmatpush2.bf16.msra.mxu1 %v2599_v0 }
 0x472   :  { %v3724_v14 = vpop.eup %3723  ;;  %2783 = vmatprep.subr.bf16.mxu1 %v2593_v34 }
 0x473   :  { %v1842_v6 = vmul.f32 %v3724_v14, %v4768_v38  ;;  %v4816_v38 = vld [vmem:[%s5442_s5 + $0x280] sm:$0xff] }
 0x474   :  { %v3726_v9 = vpop.eup %3725  ;;  %v2350_v32 = vunpack.c.h.s8.bf16 %v4816_v38 }
 0x475   :  { %v1843_v11 = vmul.f32 %v3726_v9, %v4775_v2  ;;  %v1892_v20 = vmul.f32 %v1867_v52, %v1842_v6  ;;  %2784 = vmatpush2.bf16.msra.mxu1 %v2592_v3  ;;  %v2578_v2 = vunpack.c.l.s8.bf16 %v2158_v5  ;;  %v2217_v52 = vunpack.c.l.s8.bf16 %v1979_v48  ;;  %v1971_v9 = vld [vmem:[%s5442_s5 + $0x48] sm:$0xff]  ;;  %v2014_v48 = vld [vmem:[%s5442_s5 + $0x1a0] sm:$0xff] }
 0x476   :  { %2785 = vmatprep.subr.bf16.mxu1 %v2586_v61  ;;  %v1972_v61 = vld [vmem:[%s5442_s5 + $0x50] sm:$0xff] }
 0x477   :  { %v1893_v24 = vmul.f32 %v1871_v8, %v1843_v11  ;;  %v1942_v25 = vadd.f32 %v1917_v4, %v1892_v20  ;;  %v2216_v8 = vunpack.c.l.s8.bf16 %v1978_v57  ;;  %v2210_v4 = vunpack.c.h.s8.bf16 %v1972_v61 }
 0x479   :  { %v1943_v27 = vadd.f32 %v1921_v13, %v1893_v24  ;;  %2786 = vmatpush2.bf16.msra.mxu1 %v2585_v21  ;;  %v1950_v28 = vmax.f32 %v1942_v25, 0.0  ;;  %v2203_v24 = vunpack.c.l.s8.bf16 %v1972_v61  ;;  %v2006_v61 = vld [vmem:[%s5442_s5 + $0x160] sm:$0xff] }
 0x47a   :  { %2787 = vmatprep.subr.bf16.mxu1 %v2579_v23  ;;  %v2209_v23 = vunpack.c.h.s8.bf16 %v1971_v9 }
 0x47b   :  { %v1951_v35 = vmax.f32 %v1943_v27, 0.0  ;;  %v4834_v42 = vpack.c.bf16 %v1950_v28, %v1950_v28 }
 0x47d   :  { %v1597_v37 = vpop.f32.mrf.mxu0  ;;  %v4832_v40 = vpack.c.bf16 %v1951_v35, %v1951_v35  ;;  %2788 = vmatpush2.bf16.msra.mxu1 %v2578_v2  ;;  %v1965_v2 = vld [vmem:[%s5442_s5 + $0x18] sm:$0xff] }
 0x47e   :  { %v1638_v26 = vpop.f32.mrf.mxu1  ;;  %2839 = vmatprep.subr.bf16.mxu1 %v2350_v32  ;;  %v2202_v32 = vunpack.c.l.s8.bf16 %v1971_v9  ;;  %v2196_v35 = vunpack.c.h.s8.bf16 %v1965_v2 }
 0x47f   :  { %v1639_v46 = vadd.f32 %v1638_v26, %v1597_v37  ;;  %2748 = vmatprep.mubr.bf16.mxu0 %v4832_v40  ;;  %v1599_v30 = vpop.f32.mrf.mxu0  ;;  %v1964_v37 = vld [vmem:[%s5442_s5 + $0x10] sm:$0xff] }
 0x480   :  { %v1640_v49 = vpop.f32.mrf.mxu1  ;;  %2749 = vmatmul.mubr.bf16.vlgmr.msra.gmra.mxu0 %v4834_v42 }
 0x481   :  { %v1692_v50 = vmul.f32 %v1673_v10, %v1639_v46  ;;  %v1641_v53 = vadd.f32 %v1640_v49, %v1599_v30  ;;  %2799 = vmatpush1.bf16.msra.mxu0 %v2237_v41  ;;  %2830 = vmatprep.mubr.bf16.mxu0 %v4653_v62  ;;  %v1601_v12 = vpop.f32.mrf.mxu0  ;;  %v2189_v46 = vunpack.c.l.s8.bf16 %v1965_v2  ;;  %v1875_v2 = vrot.slane %v4622_v15, %v4819_v19 }
 0x482   :  { %v1642_v55 = vpop.f32.mrf.mxu1  ;;  %2800 = vmatprep.subr.bf16.mxu0 %v2231_v45  ;;  %v2195_v45 = vunpack.c.h.s8.bf16 %v1964_v37  ;;  %v2294_v12 = vunpack.c.h.s8.bf16 %v2014_v48 }
 0x483   :  { %v1730_v58 = vrot.slane %v1692_v50, 4  ;;  %v1693_v59 = vmul.f32 %v1677_v17, %v1641_v53  ;;  %v1602_v60 = vpop.f32.mrf.mxu0  ;;  %v2188_v53 = vunpack.c.l.s8.bf16 %v1964_v37 }
 0x484   :  { %v1643_v63 = vpop.f32.mrf.mxu1  ;;  %v2287_v60 = vunpack.c.l.s8.bf16 %v2014_v48 }
 0x485   :  { %v1731_v0 = vadd.f32 %v1730_v58, %v1692_v50  ;;  %v1736_v34 = vrot.slane %v1693_v59, 4  ;;  %2801 = vmatpush1.bf16.msra.mxu0 %v2230_v54  ;;  %v2013_v54 = vld [vmem:[%s5442_s5 + $0x198] sm:$0xff] }
 0x486   :  { %2802 = vmatprep.subr.bf16.mxu0 %v2224_v56 }
 0x487   :  { %v1732_v3 = vrot.slane %v1731_v0, 2  ;;  %v1737_v14 = vadd.f32 %v1736_v34, %v1693_v59  ;;  %v2007_v34 = vld [vmem:[%s5442_s5 + $0x168] sm:$0xff] }
 0x488   :  { %v2273_v9 = vunpack.c.l.s8.bf16 %v2007_v34 }
 0x489   :  { %v1733_v5 = vadd.f32 %v1732_v3, %v1731_v0  ;;  %v1738_v6 = vrot.slane %v1737_v14, 2  ;;  %2803 = vmatpush1.bf16.msra.mxu0 %v2223_v51  ;;  %v2286_v3 = vunpack.c.l.s8.bf16 %v2013_v54 }
 0x48a   :  { %2804 = vmatprep.subr.bf16.mxu0 %v2217_v52 }
 0x48b   :  { %v1734_v11 = vrot.slane %v1733_v5, 1  ;;  %v1739_v13 = vadd.f32 %v1738_v6, %v1737_v14  ;;  %v2280_v14 = vunpack.c.h.s8.bf16 %v2007_v34 }
 0x48d   :  { %v1735_v20 = vadd.f32 %v1734_v11, %v1733_v5  ;;  %v1740_v21 = vrot.slane %v1739_v13, 1  ;;  %2805 = vmatpush1.bf16.msra.mxu0 %v2216_v8  ;;  %v2000_v11 = vld [vmem:[%s5442_s5 + $0x130] sm:$0xff] }
 0x48e   :  { %2806 = vmatprep.subr.bf16.mxu0 %v2210_v4  ;;  %v2279_v4 = vunpack.c.h.s8.bf16 %v2006_v61 }
 0x48f   :  { %v1748_v25 = vmul.f32 0.125, %v1735_v20  ;;  %v1741_v27 = vadd.f32 %v1740_v21, %v1739_v13  ;;  %v2272_v13 = vunpack.c.l.s8.bf16 %v2006_v61  ;;  %v2266_v20 = vunpack.c.h.s8.bf16 %v2000_v11  ;;  %v1999_v21 = vld [vmem:[%s5442_s5 + $0x128] sm:$0xff]  ;;  %v2034_v61 = vld [vmem:[%s5442_s5 + $0x240] sm:$0xff] }
 0x491   :  { %v4856_v28 = vsub.f32 %v1692_v50, %v1748_v25  ;;  %v1749_v29 = vmul.f32 0.125, %v1741_v27  ;;  %2807 = vmatpush1.bf16.msra.mxu0 %v2209_v23  ;;  %v2265_v23 = vunpack.c.h.s8.bf16 %v1999_v21  ;;  %v1993_v25 = vld [vmem:[%s5442_s5 + $0xf8] sm:$0xff]  ;;  %v2258_v27 = vunpack.c.l.s8.bf16 %v1999_v21  ;;  %v2084_v21 = vld [vmem:[%s5442_s5 + $0x3d0] sm:$0xff] }
 0x492   :  { %2808 = vmatprep.subr.bf16.mxu0 %v2203_v24  ;;  %v2259_v24 = vunpack.c.l.s8.bf16 %v2000_v11  ;;  %v2245_v48 = vunpack.c.l.s8.bf16 %v1993_v25 }
 0x493   :  { %v1764_v39 = vmul.f32 %v4856_v28, %v4856_v28  ;;  %v4863_v10 = vsub.f32 %v1693_v59, %v1749_v29  ;;  %v2293_v59 = vunpack.c.h.s8.bf16 %v2013_v54  ;;  %v2041_v54 = vld [vmem:[%s5442_s5 + $0x278] sm:$0xff] }
 0x495   :  { %v1802_v41 = vrot.slane %v1764_v39, 4  ;;  %v1765_v26 = vmul.f32 %v4863_v10, %v4863_v10  ;;  %2809 = vmatpush1.bf16.msra.mxu0 %v2202_v32  ;;  %v2252_v32 = vunpack.c.h.s8.bf16 %v1993_v25 }
 0x496   :  { %2810 = vmatprep.subr.bf16.mxu0 %v2196_v35  ;;  %v1992_v35 = vld [vmem:[%s5442_s5 + $0xf0] sm:$0xff] }
 0x497   :  { %v1803_v30 = vadd.f32 %v1802_v41, %v1764_v39  ;;  %v1808_v17 = vrot.slane %v1765_v26, 4  ;;  %v1879_v39 = vrot.slane %v4622_v15, %v4826_v36  ;;  %v1925_v41 = vrot.slane %v4630_v47, %v4819_v19 }
 0x499   :  { %v1804_v49 = vrot.slane %v1803_v30, 2  ;;  %v1809_v50 = vadd.f32 %v1808_v17, %v1765_v26  ;;  %2811 = vmatpush1.bf16.msra.mxu0 %v2195_v45 }
 0x49a   :  { %2812 = vmatprep.subr.bf16.mxu0 %v2189_v46  ;;  %v2251_v46 = vunpack.c.h.s8.bf16 %v1992_v35 }
 0x49b   :  { %v1805_v55 = vadd.f32 %v1804_v49, %v1803_v30  ;;  %v1810_v56 = vrot.slane %v1809_v50, 2  ;;  %v1929_v30 = vrot.slane %v4630_v47, %v4826_v36  ;;  %v2097_v47 = vld [vmem:[%s5442_s5 + $0x438] sm:$0xff] }
 0x49d   :  { %v1806_v57 = vrot.slane %v1805_v55, 1  ;;  %v1811_v58 = vadd.f32 %v1810_v56, %v1809_v50  ;;  %2813 = vmatpush1.bf16.msra.mxu0 %v2188_v53  ;;  %v2244_v50 = vunpack.c.l.s8.bf16 %v1992_v35  ;;  %v2349_v56 = vunpack.c.h.s8.bf16 %v2041_v54 }
 0x49e   :  { %2814 = vmatprep.subr.bf16.mxu0 %v2294_v12 }
 0x49f   :  { %v1807_v63 = vadd.f32 %v1806_v57, %v1805_v55  ;;  %v1812_v0 = vrot.slane %v1811_v58, 1  ;;  %v2461_v57 = vunpack.c.h.s8.bf16 %v2097_v47 }
 0x4a1   :  { %v1820_v51 = vmul.f32 0.125, %v1807_v63  ;;  %v1813_v52 = vadd.f32 %v1812_v0, %v1811_v58  ;;  %2815 = vmatpush2.bf16.msra.mxu0 %v2293_v59  ;;  %v2343_v59 = vunpack.c.l.s8.bf16 %v4816_v38  ;;  %v2035_v63 = vld [vmem:[%s5442_s5 + $0x248] sm:$0xff] }
 0x4a2   :  { %2816 = vmatprep.subr.bf16.mxu0 %v2287_v60  ;;  %v2091_v0 = vld [vmem:[%s5442_s5 + $0x408] sm:$0xff]  ;;  %v2329_v11 = vunpack.c.l.s8.bf16 %v2035_v63 }
 0x4a3   :  { %v1828_v5 = vadd.f32 1e-05, %v1820_v51  ;;  %v1821_v6 = vmul.f32 0.125, %v1813_v52  ;;  %v2342_v51 = vunpack.c.l.s8.bf16 %v2041_v54  ;;  %v2454_v52 = vunpack.c.l.s8.bf16 %v2097_v47 }
 0x4a5   :  { %3727 = vrsqrt.f32 %v1828_v5  ;;  %v1829_v8 = vadd.f32 1e-05, %v1821_v6  ;;  %2817 = vmatpush2.bf16.msra.mxu0 %v2286_v3  ;;  %v2336_v3 = vunpack.c.h.s8.bf16 %v2035_v63  ;;  %v2090_v5 = vld [vmem:[%s5442_s5 + $0x400] sm:$0xff] }
 0x4a6   :  { %2818 = vmatprep.subr.bf16.mxu0 %v2280_v14  ;;  %v2448_v14 = vunpack.c.h.s8.bf16 %v2091_v0 }
 0x4a7   :  { %3729 = vrsqrt.f32 %v1829_v8  ;;  %v2335_v8 = vunpack.c.h.s8.bf16 %v2034_v61 }
 0x4a9   :  { %2819 = vmatpush2.bf16.msra.mxu0 %v2279_v4  ;;  %v2447_v4 = vunpack.c.h.s8.bf16 %v2090_v5 }
 0x4aa   :  { %2820 = vmatprep.subr.bf16.mxu0 %v2273_v9 }
 0x4ad   :  { %2821 = vmatpush2.bf16.msra.mxu0 %v2272_v13  ;;  %v2441_v13 = vunpack.c.l.s8.bf16 %v2091_v0 }
 0x4ae   :  { %2822 = vmatprep.subr.bf16.mxu0 %v2266_v20  ;;  %v2028_v20 = vld [vmem:[%s5442_s5 + $0x210] sm:$0xff] }
 0x4af   :  { %v2322_v25 = vunpack.c.h.s8.bf16 %v2028_v20 }
 0x4b1   :  { %2823 = vmatpush2.bf16.msra.mxu0 %v2265_v23  ;;  %v2328_v23 = vunpack.c.l.s8.bf16 %v2034_v61 }
 0x4b2   :  { %v3728_v29 = vpop.eup %3727  ;;  %2824 = vmatprep.subr.bf16.mxu0 %v2259_v24  ;;  %v2440_v24 = vunpack.c.l.s8.bf16 %v2090_v5 }
 0x4b3   :  { %v1844_v37 = vmul.f32 %v3728_v29, %v4856_v28  ;;  %v2098_v28 = vld [vmem:[%s5442_s5 + $0x440] sm:$0xff]  ;;  %v2083_v29 = vld [vmem:[%s5442_s5 + $0x3c8] sm:$0xff] }
 0x4b4   :  { %v3730_v26 = vpop.eup %3729  ;;  %v2462_v12 = vunpack.c.h.s8.bf16 %v2098_v28  ;;  %v2455_v60 = vunpack.c.l.s8.bf16 %v2098_v28  ;;  %v2433_v35 = vunpack.c.h.s8.bf16 %v2083_v29 }
 0x4b5   :  { %v1845_v45 = vmul.f32 %v3730_v26, %v4863_v10  ;;  %2825 = vmatpush2.bf16.msra.mxu0 %v2258_v27  ;;  %v1894_v17 = vmul.f32 %v1875_v2, %v1844_v37  ;;  %v2434_v27 = vunpack.c.h.s8.bf16 %v2084_v21  ;;  %v2027_v2 = vld [vmem:[%s5442_s5 + $0x208] sm:$0xff]  ;;  %v2315_v37 = vunpack.c.l.s8.bf16 %v2028_v20  ;;  %v2077_v26 = vld [vmem:[%s5442_s5 + $0x398] sm:$0xff] }
 0x4b6   :  { %2826 = vmatprep.subr.bf16.mxu0 %v2252_v32  ;;  %v2321_v32 = vunpack.c.h.s8.bf16 %v2027_v2 }
 0x4b7   :  { %v1895_v49 = vmul.f32 %v1879_v39, %v1845_v45  ;;  %v1944_v15 = vadd.f32 %v1925_v41, %v1894_v17  ;;  %v2427_v39 = vunpack.c.l.s8.bf16 %v2084_v21  ;;  %v2021_v41 = vld [vmem:[%s5442_s5 + $0x1d8] sm:$0xff]  ;;  %v2314_v45 = vunpack.c.l.s8.bf16 %v2027_v2  ;;  %v2056_v21 = vld [vmem:[%s5442_s5 + $0x2f0] sm:$0xff] }
 0x4b8   :  { %v2420_v17 = vunpack.c.h.s8.bf16 %v2077_v26 }
 0x4b9   :  { %2827 = vmatpush2.bf16.msra.mxu0 %v2251_v46  ;;  %v1945_v53 = vadd.f32 %v1929_v30, %v1895_v49  ;;  %v1952_v10 = vmax.f32 %v1944_v15, 0.0  ;;  %v2426_v46 = vunpack.c.l.s8.bf16 %v2083_v29  ;;  %v2308_v30 = vunpack.c.h.s8.bf16 %v2021_v41  ;;  %v2076_v49 = vld [vmem:[%s5442_s5 + $0x390] sm:$0xff]  ;;  %v2055_v29 = vld [vmem:[%s5442_s5 + $0x2e8] sm:$0xff] }
 0x4ba   :  { %2828 = vmatprep.subr.bf16.mxu0 %v2245_v48  ;;  %v2020_v48 = vld [vmem:[%s5442_s5 + $0x1d0] sm:$0xff]  ;;  %v2419_v15 = vunpack.c.h.s8.bf16 %v2076_v49  ;;  %v2412_v47 = vunpack.c.l.s8.bf16 %v2076_v49 }
 0x4bb   :  { %v1953_v36 = vmax.f32 %v1945_v53, 0.0  ;;  %v4912_v58 = vpack.c.bf16 %v1952_v10, %v1952_v10  ;;  %v2307_v28 = vunpack.c.h.s8.bf16 %v2020_v48  ;;  %v2413_v53 = vunpack.c.l.s8.bf16 %v2077_v26  ;;  %v2126_v10 = vld [vmem:[%s5442_s5 + $0x520] sm:$0xff]  ;;  %v2049_v26 = vld [vmem:[%s5442_s5 + $0x2b8] sm:$0xff]  ;;  %v2048_v49 = vld [vmem:[%s5442_s5 + $0x2b0] sm:$0xff] }
 0x4bc   :  { %v2300_v54 = vunpack.c.l.s8.bf16 %v2020_v48 }
 0x4bd   :  { %2829 = vmatpush2.bf16.msra.mxu0 %v2244_v50  ;;  %v4910_v55 = vpack.c.bf16 %v1953_v36, %v1953_v36  ;;  %v2301_v50 = vunpack.c.l.s8.bf16 %v2021_v41 }
 0x4be   :  { %2880 = vmatprep.subr.bf16.mxu0 %v2462_v12  ;;  %v2070_v12 = vld [vmem:[%s5442_s5 + $0x360] sm:$0xff] }
 0x4bf   :  { %2789 = vmatprep.mubr.bf16.mxu1 %v4910_v55  ;;  %v2406_v36 = vunpack.c.h.s8.bf16 %v2070_v12  ;;  %v2399_v0 = vunpack.c.l.s8.bf16 %v2070_v12 }
 0x4c0   :  { %2831 = vmatmul.mubr.bf16.vlgmr.msra.gmra.mxu0 %v4660_v1  ;;  %2790 = vmatmul.mubr.bf16.vlgmr.msra.gmra.mxu1 %v4912_v58  ;;  %v4924_v34 = vpop.f32.mrf.mxu0 }
 0x4c1   :  { %2840 = vmatpush1.bf16.msra.mxu1 %v2349_v56  ;;  %2881 = vmatpush1.bf16.msra.mxu0 %v2461_v57  ;;  %v2518_v56 = vunpack.c.h.s8.bf16 %v2126_v10  ;;  %v2069_v57 = vld [vmem:[%s5442_s5 + $0x358] sm:$0xff] }
 0x4c2   :  { %2912 = vmatprep.mubr.bf16.mxu0 %v4832_v40  ;;  %2871 = vmatprep.mubr.bf16.mxu1 %v4744_v22  ;;  %v4928_v38 = vpop.f32.mrf.mxu0 }
 0x4c3   :  { %2841 = vmatprep.subr.bf16.mxu1 %v2343_v59  ;;  %2882 = vmatprep.subr.bf16.mxu0 %v2455_v60  ;;  %v2125_v59 = vld [vmem:[%s5442_s5 + $0x518] sm:$0xff]  ;;  %v2405_v60 = vunpack.c.h.s8.bf16 %v2069_v57 }
 0x4c4   :  { %v2672_v6 = vpop.f32.mrf.mxu0  ;;  %v2517_v63 = vunpack.c.h.s8.bf16 %v2125_v59  ;;  %v2510_v61 = vunpack.c.l.s8.bf16 %v2125_v59  ;;  %v2153_v59 = vld [vmem:[%s5442_s5 + $0x5f8] sm:$0xff] }
 0x4c5   :  { %2842 = vmatpush1.bf16.msra.mxu1 %v2342_v51  ;;  %2883 = vmatpush1.bf16.msra.mxu0 %v2454_v52  ;;  %v2511_v51 = vunpack.c.l.s8.bf16 %v2126_v10  ;;  %v2063_v52 = vld [vmem:[%s5442_s5 + $0x328] sm:$0xff]  ;;  %v2154_v10 = vld [vmem:[%s5442_s5 + $0x600] sm:$0xff] }
 0x4c6   :  { %v2673_v9 = vpop.f32.mrf.mxu0  ;;  %2843 = vmatprep.subr.bf16.mxu1 %v2336_v3  ;;  %2884 = vmatprep.subr.bf16.mxu0 %v2448_v14  ;;  %v2119_v3 = vld [vmem:[%s5442_s5 + $0x4e8] sm:$0xff]  ;;  %v2398_v14 = vunpack.c.l.s8.bf16 %v2069_v57  ;;  %v2392_v5 = vunpack.c.h.s8.bf16 %v2063_v52 }
 0x4c7   :  { %v2504_v6 = vunpack.c.h.s8.bf16 %v2119_v3  ;;  %v2497_v20 = vunpack.c.l.s8.bf16 %v2119_v3  ;;  %v2147_v3 = vld [vmem:[%s5442_s5 + $0x5c8] sm:$0xff] }
 0x4c9   :  { %2844 = vmatpush1.bf16.msra.mxu1 %v2335_v8  ;;  %2885 = vmatpush1.bf16.msra.mxu0 %v2447_v4  ;;  %v2062_v8 = vld [vmem:[%s5442_s5 + $0x320] sm:$0xff] }
 0x4ca   :  { %2845 = vmatprep.subr.bf16.mxu1 %v2329_v11  ;;  %2886 = vmatprep.subr.bf16.mxu0 %v2441_v13  ;;  %v2118_v4 = vld [vmem:[%s5442_s5 + $0x4e0] sm:$0xff]  ;;  %v2391_v9 = vunpack.c.h.s8.bf16 %v2062_v8  ;;  %v2385_v13 = vunpack.c.l.s8.bf16 %v2063_v52 }
 0x4cb   :  { %v2503_v11 = vunpack.c.h.s8.bf16 %v2118_v4 }
 0x4cd   :  { %2846 = vmatpush1.bf16.msra.mxu1 %v2328_v23  ;;  %2887 = vmatpush1.bf16.msra.mxu0 %v2440_v24  ;;  %v2112_v23 = vld [vmem:[%s5442_s5 + $0x4b0] sm:$0xff]  ;;  %v2384_v24 = vunpack.c.l.s8.bf16 %v2062_v8 }
 0x4ce   :  { %2847 = vmatprep.subr.bf16.mxu1 %v2322_v25  ;;  %2888 = vmatprep.subr.bf16.mxu0 %v2434_v27  ;;  %v2496_v25 = vunpack.c.l.s8.bf16 %v2118_v4  ;;  %v2378_v27 = vunpack.c.h.s8.bf16 %v2056_v21  ;;  %v2490_v2 = vunpack.c.h.s8.bf16 %v2112_v23  ;;  %v2483_v41 = vunpack.c.l.s8.bf16 %v2112_v23 }
 0x4d1   :  { %2848 = vmatpush1.bf16.msra.mxu1 %v2321_v32  ;;  %2889 = vmatpush1.bf16.msra.mxu0 %v2433_v35  ;;  %v2111_v32 = vld [vmem:[%s5442_s5 + $0x4a8] sm:$0xff]  ;;  %v2377_v35 = vunpack.c.h.s8.bf16 %v2055_v29 }
 0x4d2   :  { %2849 = vmatprep.subr.bf16.mxu1 %v2315_v37  ;;  %2890 = vmatprep.subr.bf16.mxu0 %v2427_v39  ;;  %v2489_v37 = vunpack.c.h.s8.bf16 %v2111_v32  ;;  %v2371_v39 = vunpack.c.l.s8.bf16 %v2056_v21 }
 0x4d5   :  { %2850 = vmatpush1.bf16.msra.mxu1 %v2314_v45  ;;  %2891 = vmatpush1.bf16.msra.mxu0 %v2426_v46  ;;  %v2105_v45 = vld [vmem:[%s5442_s5 + $0x478] sm:$0xff]  ;;  %v2370_v46 = vunpack.c.l.s8.bf16 %v2055_v29  ;;  %v1974_v29 = vld [vmem:[%s5442_s5 + $0x60] sm:$0xff] }
 0x4d6   :  { %2851 = vmatprep.subr.bf16.mxu1 %v2308_v30  ;;  %2892 = vmatprep.subr.bf16.mxu0 %v2420_v17  ;;  %v2482_v30 = vunpack.c.l.s8.bf16 %v2111_v32  ;;  %v2364_v17 = vunpack.c.h.s8.bf16 %v2049_v26  ;;  %v2476_v48 = vunpack.c.h.s8.bf16 %v2105_v45  ;;  %v2469_v12 = vunpack.c.l.s8.bf16 %v2105_v45 }
 0x4d9   :  { %2852 = vmatpush1.bf16.msra.mxu1 %v2307_v28  ;;  %2893 = vmatpush1.bf16.msra.mxu0 %v2419_v15  ;;  %v2104_v28 = vld [vmem:[%s5442_s5 + $0x470] sm:$0xff]  ;;  %v2363_v15 = vunpack.c.h.s8.bf16 %v2048_v49 }
 0x4da   :  { %2853 = vmatprep.subr.bf16.mxu1 %v2301_v50  ;;  %2894 = vmatprep.subr.bf16.mxu0 %v2413_v53  ;;  %v2475_v50 = vunpack.c.h.s8.bf16 %v2104_v28  ;;  %v2357_v53 = vunpack.c.l.s8.bf16 %v2049_v26  ;;  %v1973_v26 = vld [vmem:[%s5442_s5 + $0x58] sm:$0xff] }
 0x4dd   :  { %2854 = vmatpush1.bf16.msra.mxu1 %v2300_v54  ;;  %2895 = vmatpush1.bf16.msra.mxu0 %v2412_v47  ;;  %v1988_v54 = vld [vmem:[%s5442_s5 + $0xd0] sm:$0xff]  ;;  %v2356_v47 = vunpack.c.l.s8.bf16 %v2048_v49  ;;  %v1967_v49 = vld [vmem:[%s5442_s5 + $0x28] sm:$0xff] }
 0x4de   :  { %2855 = vmatprep.subr.bf16.mxu1 %v2406_v36  ;;  %2896 = vmatprep.subr.bf16.mxu0 %v2518_v56  ;;  %v2468_v36 = vunpack.c.l.s8.bf16 %v2104_v28  ;;  %v2574_v56 = vunpack.c.h.s8.bf16 %v2154_v10  ;;  %v2240_v57 = vunpack.c.h.s8.bf16 %v1988_v54  ;;  %v2233_v52 = vunpack.c.l.s8.bf16 %v1988_v54 }
 0x4e1   :  { %2856 = vmatpush2.bf16.msra.mxu1 %v2405_v60  ;;  %2897 = vmatpush2.bf16.msra.mxu0 %v2517_v63  ;;  %v1987_v60 = vld [vmem:[%s5442_s5 + $0xc8] sm:$0xff]  ;;  %v2573_v63 = vunpack.c.h.s8.bf16 %v2153_v59 }
 0x4e2   :  { %2857 = vmatprep.subr.bf16.mxu1 %v2399_v0  ;;  %2898 = vmatprep.subr.bf16.mxu0 %v2511_v51  ;;  %v2239_v0 = vunpack.c.h.s8.bf16 %v1987_v60  ;;  %v2567_v51 = vunpack.c.l.s8.bf16 %v2154_v10  ;;  %v2232_v4 = vunpack.c.l.s8.bf16 %v1987_v60  ;;  %v1966_v10 = vld [vmem:[%s5442_s5 + $0x20] sm:$0xff] }
 0x4e5   :  { %2858 = vmatpush2.bf16.msra.mxu1 %v2398_v14  ;;  %2899 = vmatpush2.bf16.msra.mxu0 %v2510_v61  ;;  %v1981_v61 = vld [vmem:[%s5442_s5 + $0x98] sm:$0xff] }
 0x4e6   :  { %2859 = vmatprep.subr.bf16.mxu1 %v2392_v5  ;;  %2900 = vmatprep.subr.bf16.mxu0 %v2504_v6  ;;  %v2566_v6 = vunpack.c.l.s8.bf16 %v2153_v59  ;;  %v2016_v59 = vld [vmem:[%s5442_s5 + $0x1b0] sm:$0xff] }
 0x4e9   :  { %2860 = vmatpush2.bf16.msra.mxu1 %v2391_v9  ;;  %2901 = vmatpush2.bf16.msra.mxu0 %v2503_v11  ;;  %v2560_v9 = vunpack.c.h.s8.bf16 %v2147_v3  ;;  %v2146_v11 = vld [vmem:[%s5442_s5 + $0x5c0] sm:$0xff] }
 0x4ea   :  { %2861 = vmatprep.subr.bf16.mxu1 %v2385_v13  ;;  %2902 = vmatprep.subr.bf16.mxu0 %v2497_v20  ;;  %v1980_v20 = vld [vmem:[%s5442_s5 + $0x90] sm:$0xff]  ;;  %v2559_v23 = vunpack.c.h.s8.bf16 %v2146_v11  ;;  %v2552_v32 = vunpack.c.l.s8.bf16 %v2146_v11 }
 0x4ed   :  { %2862 = vmatpush2.bf16.msra.mxu1 %v2384_v24  ;;  %2903 = vmatpush2.bf16.msra.mxu0 %v2496_v25  ;;  %v2225_v25 = vunpack.c.h.s8.bf16 %v1980_v20 }
 0x4ee   :  { %2863 = vmatprep.subr.bf16.mxu1 %v2378_v27  ;;  %2904 = vmatprep.subr.bf16.mxu0 %v2490_v2  ;;  %v2553_v27 = vunpack.c.l.s8.bf16 %v2147_v3  ;;  %v2219_v2 = vunpack.c.l.s8.bf16 %v1981_v61  ;;  %v2015_v3 = vld [vmem:[%s5442_s5 + $0x1a8] sm:$0xff] }
 0x4f1   :  { %2864 = vmatpush2.bf16.msra.mxu1 %v2377_v35  ;;  %2905 = vmatpush2.bf16.msra.mxu0 %v2489_v37  ;;  %v2218_v35 = vunpack.c.l.s8.bf16 %v1980_v20 }
 0x4f2   :  { %2865 = vmatprep.subr.bf16.mxu1 %v2371_v39  ;;  %2906 = vmatprep.subr.bf16.mxu0 %v2483_v41  ;;  %v2139_v39 = vld [vmem:[%s5442_s5 + $0x588] sm:$0xff]  ;;  %v2212_v41 = vunpack.c.h.s8.bf16 %v1974_v29 }
 0x4f3   :  { %v2545_v45 = vunpack.c.h.s8.bf16 %v2139_v39  ;;  %v2538_v28 = vunpack.c.l.s8.bf16 %v2139_v39 }
 0x4f5   :  { %2866 = vmatpush2.bf16.msra.mxu1 %v2370_v46  ;;  %2907 = vmatpush2.bf16.msra.mxu0 %v2482_v30  ;;  %v2211_v46 = vunpack.c.h.s8.bf16 %v1973_v26 }
 0x4f6   :  { %2867 = vmatprep.subr.bf16.mxu1 %v2364_v17  ;;  %2908 = vmatprep.subr.bf16.mxu0 %v2476_v48  ;;  %v2205_v17 = vunpack.c.l.s8.bf16 %v1974_v29  ;;  %v2133_v48 = vld [vmem:[%s5442_s5 + $0x558] sm:$0xff]  ;;  %v2168_v29 = vld [vmem:[%s5442_s5 + $0x670] sm:$0xff] }
 0x4f7   :  { %v2602_v39 = vunpack.c.h.s8.bf16 %v2168_v29 }
 0x4f9   :  { %2868 = vmatpush2.bf16.msra.mxu1 %v2363_v15  ;;  %2909 = vmatpush2.bf16.msra.mxu0 %v2475_v50  ;;  %v2204_v15 = vunpack.c.l.s8.bf16 %v1973_v26  ;;  %v2532_v50 = vunpack.c.h.s8.bf16 %v2133_v48 }
 0x4fa   :  { %2869 = vmatprep.subr.bf16.mxu1 %v2357_v53  ;;  %2910 = vmatprep.subr.bf16.mxu0 %v2469_v12  ;;  %v2132_v53 = vld [vmem:[%s5442_s5 + $0x550] sm:$0xff]  ;;  %v2198_v12 = vunpack.c.h.s8.bf16 %v1967_v49 }
 0x4fb   :  { %v2531_v54 = vunpack.c.h.s8.bf16 %v2132_v53  ;;  %v2524_v60 = vunpack.c.l.s8.bf16 %v2132_v53 }
 0x4fd   :  { %2870 = vmatpush2.bf16.msra.mxu1 %v2356_v47  ;;  %2911 = vmatpush2.bf16.msra.mxu0 %v2468_v36  ;;  %v2197_v47 = vunpack.c.h.s8.bf16 %v1966_v10  ;;  %v2525_v36 = vunpack.c.l.s8.bf16 %v2133_v48 }
 0x4fe   :  { %2921 = vmatprep.subr.bf16.mxu1 %v2574_v56  ;;  %2962 = vmatprep.subr.bf16.mxu0 %v2240_v57  ;;  %v2191_v56 = vunpack.c.l.s8.bf16 %v1967_v49  ;;  %v2182_v57 = vld [vmem:[%s5442_s5 + $0x6e0] sm:$0xff]  ;;  %v2161_v49 = vld [vmem:[%s5442_s5 + $0x638] sm:$0xff] }
 0x4ff   :  { %v2588_v53 = vunpack.c.h.s8.bf16 %v2161_v49 }
 0x500   :  { %2872 = vmatmul.mubr.bf16.vlgmr.msra.gmra.mxu1 %v4746_v18  ;;  %2913 = vmatmul.mubr.bf16.vlgmr.msra.gmra.mxu0 %v4834_v42  ;;  %v2709_v14 = vpop.f32.mrf.mxu1 }
 0x501   :  { %v5029_v5 = vadd.f32 %v2709_v14, %v4924_v34  ;;  %2922 = vmatpush1.bf16.msra.mxu1 %v2573_v63  ;;  %2953 = vmatprep.mubr.bf16.mxu1 %v4910_v55  ;;  %v2226_v34 = vunpack.c.h.s8.bf16 %v1981_v61  ;;  %v2190_v63 = vunpack.c.l.s8.bf16 %v1966_v10  ;;  %v2295_v61 = vunpack.c.h.s8.bf16 %v2015_v3 }
 0x502   :  { %2963 = vmatpush1.bf16.msra.mxu0 %v2239_v0  ;;  %2994 = vmatprep.mubr.bf16.mxu0 %v4653_v62  ;;  %v2711_v8 = vpop.f32.mrf.mxu1  ;;  %v2630_v0 = vunpack.c.h.s8.bf16 %v2182_v57 }
 0x503   :  { %v5037_v13 = vadd.f32 %v2711_v8, %v4928_v38  ;;  %2923 = vmatprep.subr.bf16.mxu1 %v2567_v51  ;;  %2964 = vmatprep.subr.bf16.mxu0 %v2233_v52  ;;  %v2140_v38 = vld [vmem:[%s5442_s5 + $0x590] sm:$0xff]  ;;  %v2181_v51 = vld [vmem:[%s5442_s5 + $0x6d8] sm:$0xff]  ;;  %v2296_v52 = vunpack.c.h.s8.bf16 %v2016_v59  ;;  %v2289_v8 = vunpack.c.l.s8.bf16 %v2016_v59 }
 0x504   :  { %v2713_v21 = vpop.f32.mrf.mxu1  ;;  %v2546_v37 = vunpack.c.h.s8.bf16 %v2140_v38  ;;  %v2539_v30 = vunpack.c.l.s8.bf16 %v2140_v38  ;;  %v2629_v14 = vunpack.c.h.s8.bf16 %v2181_v51  ;;  %v2622_v11 = vunpack.c.l.s8.bf16 %v2181_v51  ;;  %v2044_v59 = vld [vmem:[%s5442_s5 + $0x290] sm:$0xff] }
 0x505   :  { %2924 = vmatpush1.bf16.msra.mxu1 %v2566_v6  ;;  %v2623_v6 = vunpack.c.l.s8.bf16 %v2182_v57  ;;  %v2174_v21 = vld [vmem:[%s5442_s5 + $0x6a0] sm:$0xff]  ;;  %v2352_v51 = vunpack.c.h.s8.bf16 %v2044_v59 }
 0x506   :  { %2965 = vmatpush1.bf16.msra.mxu0 %v2232_v4  ;;  %v2714_v24 = vpop.f32.mrf.mxu1  ;;  %2925 = vmatprep.subr.bf16.mxu1 %v2560_v9  ;;  %v2175_v4 = vld [vmem:[%s5442_s5 + $0x6a8] sm:$0xff]  ;;  %v2009_v9 = vld [vmem:[%s5442_s5 + $0x178] sm:$0xff] }
 0x507   :  { %2966 = vmatprep.subr.bf16.mxu0 %v2226_v34  ;;  %v2288_v34 = vunpack.c.l.s8.bf16 %v2015_v3  ;;  %v2616_v20 = vunpack.c.h.s8.bf16 %v2175_v4  ;;  %v2008_v24 = vld [vmem:[%s5442_s5 + $0x170] sm:$0xff]  ;;  %v2275_v38 = vunpack.c.l.s8.bf16 %v2009_v9 }
 0x509   :  { %2926 = vmatpush1.bf16.msra.mxu1 %v2559_v23  ;;  %v2282_v23 = vunpack.c.h.s8.bf16 %v2009_v9 }
 0x50a   :  { %2967 = vmatpush1.bf16.msra.mxu0 %v2225_v25  ;;  %2927 = vmatprep.subr.bf16.mxu1 %v2553_v27  ;;  %v2615_v25 = vunpack.c.h.s8.bf16 %v2174_v21  ;;  %v2281_v27 = vunpack.c.h.s8.bf16 %v2008_v24 }
 0x50b   :  { %2968 = vmatprep.subr.bf16.mxu0 %v2219_v2  ;;  %v2609_v2 = vunpack.c.l.s8.bf16 %v2175_v4  ;;  %v2037_v4 = vld [vmem:[%s5442_s5 + $0x258] sm:$0xff] }
 0x50d   :  { %2928 = vmatpush1.bf16.msra.mxu1 %v2552_v32  ;;  %v2002_v32 = vld [vmem:[%s5442_s5 + $0x140] sm:$0xff] }
 0x50e   :  { %2969 = vmatpush1.bf16.msra.mxu0 %v2218_v35  ;;  %2929 = vmatprep.subr.bf16.mxu1 %v2546_v37  ;;  %v2608_v35 = vunpack.c.l.s8.bf16 %v2174_v21  ;;  %v2274_v37 = vunpack.c.l.s8.bf16 %v2008_v24  ;;  %v2268_v26 = vunpack.c.h.s8.bf16 %v2002_v32  ;;  %v2261_v48 = vunpack.c.l.s8.bf16 %v2002_v32 }
 0x50f   :  { %2970 = vmatprep.subr.bf16.mxu0 %v2212_v41  ;;  %v2167_v41 = vld [vmem:[%s5442_s5 + $0x668] sm:$0xff]  ;;  %v2338_v24 = vunpack.c.h.s8.bf16 %v2037_v4 }
 0x511   :  { %2930 = vmatpush1.bf16.msra.mxu1 %v2545_v45  ;;  %v2001_v45 = vld [vmem:[%s5442_s5 + $0x138] sm:$0xff] }
 0x512   :  { %2971 = vmatpush1.bf16.msra.mxu0 %v2211_v46  ;;  %2931 = vmatprep.subr.bf16.mxu1 %v2539_v30  ;;  %v2601_v46 = vunpack.c.h.s8.bf16 %v2167_v41  ;;  %v2267_v30 = vunpack.c.h.s8.bf16 %v2001_v45 }
 0x513   :  { %2972 = vmatprep.subr.bf16.mxu0 %v2205_v17  ;;  %v2595_v17 = vunpack.c.l.s8.bf16 %v2168_v29 }
 0x515   :  { %2932 = vmatpush1.bf16.msra.mxu1 %v2538_v28  ;;  %v1995_v28 = vld [vmem:[%s5442_s5 + $0x108] sm:$0xff] }
 0x516   :  { %2973 = vmatpush1.bf16.msra.mxu0 %v2204_v15  ;;  %2933 = vmatprep.subr.bf16.mxu1 %v2532_v50  ;;  %v2594_v15 = vunpack.c.l.s8.bf16 %v2167_v41  ;;  %v2260_v50 = vunpack.c.l.s8.bf16 %v2001_v45  ;;  %v2254_v10 = vunpack.c.h.s8.bf16 %v1995_v28  ;;  %v2247_v57 = vunpack.c.l.s8.bf16 %v1995_v28  ;;  %v2030_v41 = vld [vmem:[%s5442_s5 + $0x220] sm:$0xff] }
 0x517   :  { %2974 = vmatprep.subr.bf16.mxu0 %v2198_v12  ;;  %v2160_v12 = vld [vmem:[%s5442_s5 + $0x630] sm:$0xff] }
 0x519   :  { %2934 = vmatpush1.bf16.msra.mxu1 %v2531_v54  ;;  %v1994_v54 = vld [vmem:[%s5442_s5 + $0x100] sm:$0xff] }
 0x51a   :  { %2975 = vmatpush1.bf16.msra.mxu0 %v2197_v47  ;;  %2935 = vmatprep.subr.bf16.mxu1 %v2525_v36  ;;  %v2587_v47 = vunpack.c.h.s8.bf16 %v2160_v12  ;;  %v2253_v36 = vunpack.c.h.s8.bf16 %v1994_v54 }
 0x51b   :  { %2976 = vmatprep.subr.bf16.mxu0 %v2191_v56  ;;  %v2581_v56 = vunpack.c.l.s8.bf16 %v2161_v49  ;;  %v2085_v49 = vld [vmem:[%s5442_s5 + $0x3d8] sm:$0xff] }
 0x51d   :  { %2936 = vmatpush1.bf16.msra.mxu1 %v2524_v60  ;;  %v2100_v60 = vld [vmem:[%s5442_s5 + $0x450] sm:$0xff] }
 0x51e   :  { %2977 = vmatpush1.bf16.msra.mxu0 %v2190_v63  ;;  %2937 = vmatprep.subr.bf16.mxu1 %v2630_v0  ;;  %v2580_v63 = vunpack.c.l.s8.bf16 %v2160_v12  ;;  %v2246_v0 = vunpack.c.l.s8.bf16 %v1994_v54  ;;  %v2464_v3 = vunpack.c.h.s8.bf16 %v2100_v60  ;;  %v2023_v12 = vld [vmem:[%s5442_s5 + $0x1e8] sm:$0xff] }
 0x51f   :  { %2978 = vmatprep.subr.bf16.mxu0 %v2296_v52  ;;  %v2043_v52 = vld [vmem:[%s5442_s5 + $0x288] sm:$0xff] }
 0x521   :  { %2938 = vmatpush2.bf16.msra.mxu1 %v2629_v14  ;;  %v2099_v14 = vld [vmem:[%s5442_s5 + $0x448] sm:$0xff] }
 0x522   :  { %2979 = vmatpush2.bf16.msra.mxu0 %v2295_v61  ;;  %2939 = vmatprep.subr.bf16.mxu1 %v2623_v6  ;;  %v2351_v61 = vunpack.c.h.s8.bf16 %v2043_v52  ;;  %v2463_v6 = vunpack.c.h.s8.bf16 %v2099_v14 }
 0x523   :  { %2980 = vmatprep.subr.bf16.mxu0 %v2289_v8  ;;  %v2345_v8 = vunpack.c.l.s8.bf16 %v2044_v59  ;;  %v2078_v59 = vld [vmem:[%s5442_s5 + $0x3a0] sm:$0xff] }
 0x525   :  { %2940 = vmatpush2.bf16.msra.mxu1 %v2622_v11  ;;  %v2457_v11 = vunpack.c.l.s8.bf16 %v2100_v60 }
 0x526   :  { %2981 = vmatpush2.bf16.msra.mxu0 %v2288_v34  ;;  %2941 = vmatprep.subr.bf16.mxu1 %v2616_v20  ;;  %v2093_v34 = vld [vmem:[%s5442_s5 + $0x418] sm:$0xff]  ;;  %v2344_v20 = vunpack.c.l.s8.bf16 %v2043_v52  ;;  %v2072_v52 = vld [vmem:[%s5442_s5 + $0x370] sm:$0xff] }
 0x527   :  { %2982 = vmatprep.subr.bf16.mxu0 %v2282_v23  ;;  %v2456_v23 = vunpack.c.l.s8.bf16 %v2099_v14 }
 0x529   :  { %2942 = vmatpush2.bf16.msra.mxu1 %v2615_v25  ;;  %v2036_v25 = vld [vmem:[%s5442_s5 + $0x250] sm:$0xff] }
 0x52a   :  { %2983 = vmatpush2.bf16.msra.mxu0 %v2281_v27  ;;  %2943 = vmatprep.subr.bf16.mxu1 %v2609_v2  ;;  %v2450_v27 = vunpack.c.h.s8.bf16 %v2093_v34  ;;  %v2092_v2 = vld [vmem:[%s5442_s5 + $0x410] sm:$0xff]  ;;  %v2337_v29 = vunpack.c.h.s8.bf16 %v2036_v25  ;;  %v2330_v45 = vunpack.c.l.s8.bf16 %v2036_v25  ;;  %v2065_v25 = vld [vmem:[%s5442_s5 + $0x338] sm:$0xff] }
 0x52b   :  { %2984 = vmatprep.subr.bf16.mxu0 %v2275_v38 }
 0x52d   :  { %2944 = vmatpush2.bf16.msra.mxu1 %v2608_v35  ;;  %v2449_v35 = vunpack.c.h.s8.bf16 %v2092_v2 }
 0x52e   :  { %2985 = vmatpush2.bf16.msra.mxu0 %v2274_v37  ;;  %2945 = vmatprep.subr.bf16.mxu1 %v2602_v39  ;;  %v2331_v37 = vunpack.c.l.s8.bf16 %v2037_v4  ;;  %v2443_v39 = vunpack.c.l.s8.bf16 %v2093_v34 }
 0x52f   :  { %2986 = vmatprep.subr.bf16.mxu0 %v2268_v26  ;;  %v2086_v26 = vld [vmem:[%s5442_s5 + $0x3e0] sm:$0xff] }
 0x531   :  { %2946 = vmatpush2.bf16.msra.mxu1 %v2601_v46  ;;  %v2442_v46 = vunpack.c.l.s8.bf16 %v2092_v2 }
 0x532   :  { %2987 = vmatpush2.bf16.msra.mxu0 %v2267_v30  ;;  %2947 = vmatprep.subr.bf16.mxu1 %v2595_v17  ;;  %v2324_v30 = vunpack.c.h.s8.bf16 %v2030_v41  ;;  %v2029_v17 = vld [vmem:[%s5442_s5 + $0x218] sm:$0xff] }
 0x533   :  { %2988 = vmatprep.subr.bf16.mxu0 %v2261_v48  ;;  %v2436_v48 = vunpack.c.h.s8.bf16 %v2086_v26  ;;  %v2323_v28 = vunpack.c.h.s8.bf16 %v2029_v17  ;;  %v2316_v54 = vunpack.c.l.s8.bf16 %v2029_v17 }
 0x535   :  { %2948 = vmatpush2.bf16.msra.mxu1 %v2594_v15  ;;  %v2435_v15 = vunpack.c.h.s8.bf16 %v2085_v49 }
 0x536   :  { %2989 = vmatpush2.bf16.msra.mxu0 %v2260_v50  ;;  %2949 = vmatprep.subr.bf16.mxu1 %v2588_v53  ;;  %v2317_v50 = vunpack.c.l.s8.bf16 %v2030_v41  ;;  %v2429_v53 = vunpack.c.l.s8.bf16 %v2086_v26  ;;  %v2387_v26 = vunpack.c.l.s8.bf16 %v2065_v25 }
 0x537   :  { %2990 = vmatprep.subr.bf16.mxu0 %v2254_v10  ;;  %v2079_v10 = vld [vmem:[%s5442_s5 + $0x3a8] sm:$0xff] }
 0x539   :  { %2950 = vmatpush2.bf16.msra.mxu1 %v2587_v47  ;;  %v2428_v47 = vunpack.c.l.s8.bf16 %v2085_v49 }
 0x53a   :  { %2991 = vmatpush2.bf16.msra.mxu0 %v2253_v36  ;;  %2951 = vmatprep.subr.bf16.mxu1 %v2581_v56  ;;  %v2310_v36 = vunpack.c.h.s8.bf16 %v2023_v12  ;;  %v2022_v56 = vld [vmem:[%s5442_s5 + $0x1e0] sm:$0xff] }
 0x53b   :  { %2992 = vmatprep.subr.bf16.mxu0 %v2247_v57  ;;  %v2422_v57 = vunpack.c.h.s8.bf16 %v2079_v10  ;;  %v2309_v60 = vunpack.c.h.s8.bf16 %v2022_v56  ;;  %v2302_v14 = vunpack.c.l.s8.bf16 %v2022_v56 }
 0x53d   :  { %2952 = vmatpush2.bf16.msra.mxu1 %v2580_v63  ;;  %v2421_v63 = vunpack.c.h.s8.bf16 %v2078_v59 }
 0x53e   :  { %2993 = vmatpush2.bf16.msra.mxu0 %v2246_v0  ;;  %3003 = vmatprep.subr.bf16.mxu1 %v2352_v51  ;;  %v2303_v0 = vunpack.c.l.s8.bf16 %v2023_v12  ;;  %v2415_v51 = vunpack.c.l.s8.bf16 %v2079_v10 }
 0x53f   :  { %3044 = vmatprep.subr.bf16.mxu0 %v2464_v3  ;;  %v2128_v3 = vld [vmem:[%s5442_s5 + $0x530] sm:$0xff] }
 0x540   :  { %2954 = vmatmul.mubr.bf16.vlgmr.msra.gmra.mxu1 %v4912_v58  ;;  %v5130_v9 = vpop.f32.mrf.mxu0  ;;  %v2520_v4 = vunpack.c.h.s8.bf16 %v2128_v3 }
 0x541   :  { %2995 = vmatmul.mubr.bf16.vlgmr.msra.gmra.mxu0 %v4660_v1  ;;  %3004 = vmatpush1.bf16.msra.mxu1 %v2351_v61  ;;  %v2414_v61 = vunpack.c.l.s8.bf16 %v2078_v59 }
 0x542   :  { %3035 = vmatprep.mubr.bf16.mxu1 %v4744_v22  ;;  %3045 = vmatpush1.bf16.msra.mxu0 %v2463_v6  ;;  %v5137_v21 = vpop.f32.mrf.mxu0  ;;  %v2408_v6 = vunpack.c.h.s8.bf16 %v2072_v52 }
 0x543   :  { %3076 = vmatprep.mubr.bf16.mxu0 %v4832_v40  ;;  %3005 = vmatprep.subr.bf16.mxu1 %v2345_v8  ;;  %v2071_v8 = vld [vmem:[%s5442_s5 + $0x368] sm:$0xff] }
 0x544   :  { %3046 = vmatprep.subr.bf16.mxu0 %v2457_v11  ;;  %v2754_v38 = vpop.f32.mrf.mxu0  ;;  %v2127_v11 = vld [vmem:[%s5442_s5 + $0x528] sm:$0xff]  ;;  %v2407_v34 = vunpack.c.h.s8.bf16 %v2071_v8  ;;  %v2400_v2 = vunpack.c.l.s8.bf16 %v2071_v8 }
 0x545   :  { %3006 = vmatpush1.bf16.msra.mxu1 %v2344_v20  ;;  %v2519_v20 = vunpack.c.h.s8.bf16 %v2127_v11  ;;  %v2512_v38 = vunpack.c.l.s8.bf16 %v2127_v11 }
 0x546   :  { %3047 = vmatpush1.bf16.msra.mxu0 %v2456_v23  ;;  %v2755_v32 = vpop.f32.mrf.mxu0  ;;  %3007 = vmatprep.subr.bf16.mxu1 %v2338_v24  ;;  %v2401_v23 = vunpack.c.l.s8.bf16 %v2072_v52  ;;  %v2513_v24 = vunpack.c.l.s8.bf16 %v2128_v3 }
 0x547   :  { %3048 = vmatprep.subr.bf16.mxu0 %v2450_v27  ;;  %v2121_v27 = vld [vmem:[%s5442_s5 + $0x4f8] sm:$0xff]  ;;  %v2064_v32 = vld [vmem:[%s5442_s5 + $0x330] sm:$0xff] }
 0x548   :  { %v2386_v17 = vunpack.c.l.s8.bf16 %v2064_v32 }
 0x549   :  { %3008 = vmatpush1.bf16.msra.mxu1 %v2337_v29  ;;  %v2394_v29 = vunpack.c.h.s8.bf16 %v2065_v25  ;;  %v5238_v25 = vld [vmem:[%s5443_s6 + $0x2d] sm:$0x7f] }
 0x54a   :  { %3049 = vmatpush1.bf16.msra.mxu0 %v2449_v35  ;;  %3009 = vmatprep.subr.bf16.mxu1 %v2331_v37  ;;  %v2506_v35 = vunpack.c.h.s8.bf16 %v2121_v27  ;;  %v2120_v37 = vld [vmem:[%s5442_s5 + $0x4f0] sm:$0xff] }
 0x54b   :  { %3050 = vmatprep.subr.bf16.mxu0 %v2443_v39  ;;  %v2393_v39 = vunpack.c.h.s8.bf16 %v2064_v32  ;;  %v2505_v41 = vunpack.c.h.s8.bf16 %v2120_v37 }
 0x54d   :  { %3010 = vmatpush1.bf16.msra.mxu1 %v2330_v45  ;;  %v2499_v45 = vunpack.c.l.s8.bf16 %v2121_v27 }
 0x54e   :  { %3051 = vmatpush1.bf16.msra.mxu0 %v2442_v46  ;;  %3011 = vmatprep.subr.bf16.mxu1 %v2324_v30  ;;  %v2058_v46 = vld [vmem:[%s5442_s5 + $0x300] sm:$0xff] }
 0x54f   :  { %3052 = vmatprep.subr.bf16.mxu0 %v2436_v48  ;;  %v2114_v30 = vld [vmem:[%s5442_s5 + $0x4c0] sm:$0xff]  ;;  %v2498_v48 = vunpack.c.l.s8.bf16 %v2120_v37  ;;  %v2380_v49 = vunpack.c.h.s8.bf16 %v2058_v46  ;;  %v2373_v10 = vunpack.c.l.s8.bf16 %v2058_v46 }
 0x551   :  { %3012 = vmatpush1.bf16.msra.mxu1 %v2323_v28  ;;  %v2057_v28 = vld [vmem:[%s5442_s5 + $0x2f8] sm:$0xff] }
 0x552   :  { %3053 = vmatpush1.bf16.msra.mxu0 %v2435_v15  ;;  %3013 = vmatprep.subr.bf16.mxu1 %v2317_v50  ;;  %v2492_v15 = vunpack.c.h.s8.bf16 %v2114_v30  ;;  %v2113_v50 = vld [vmem:[%s5442_s5 + $0x4b8] sm:$0xff]  ;;  %v2372_v56 = vunpack.c.l.s8.bf16 %v2057_v28 }
 0x553   :  { %3054 = vmatprep.subr.bf16.mxu0 %v2429_v53  ;;  %v2379_v53 = vunpack.c.h.s8.bf16 %v2057_v28  ;;  %v2491_v12 = vunpack.c.h.s8.bf16 %v2113_v50 }
 0x555   :  { %3014 = vmatpush1.bf16.msra.mxu1 %v2316_v54  ;;  %v2485_v54 = vunpack.c.l.s8.bf16 %v2114_v30 }
 0x556   :  { %3055 = vmatpush1.bf16.msra.mxu0 %v2428_v47  ;;  %3015 = vmatprep.subr.bf16.mxu1 %v2310_v36  ;;  %v2051_v47 = vld [vmem:[%s5442_s5 + $0x2c8] sm:$0xff] }
 0x557   :  { %3056 = vmatprep.subr.bf16.mxu0 %v2422_v57  ;;  %v2107_v36 = vld [vmem:[%s5442_s5 + $0x488] sm:$0xff]  ;;  %v2484_v57 = vunpack.c.l.s8.bf16 %v2113_v50  ;;  %v2366_v59 = vunpack.c.h.s8.bf16 %v2051_v47  ;;  %v2359_v3 = vunpack.c.l.s8.bf16 %v2051_v47 }
 0x559   :  { %3016 = vmatpush1.bf16.msra.mxu1 %v2309_v60  ;;  %v2050_v60 = vld [vmem:[%s5442_s5 + $0x2c0] sm:$0xff] }
 0x55a   :  { %3057 = vmatpush1.bf16.msra.mxu0 %v2421_v63  ;;  %3017 = vmatprep.subr.bf16.mxu1 %v2303_v0  ;;  %v2478_v63 = vunpack.c.h.s8.bf16 %v2107_v36  ;;  %v2106_v0 = vld [vmem:[%s5442_s5 + $0x480] sm:$0xff]  ;;  %v2358_v8 = vunpack.c.l.s8.bf16 %v2050_v60 }
 0x55b   :  { %3058 = vmatprep.subr.bf16.mxu0 %v2415_v51  ;;  %v2365_v51 = vunpack.c.h.s8.bf16 %v2050_v60  ;;  %v2477_v52 = vunpack.c.h.s8.bf16 %v2106_v0 }
 0x55d   :  { %3018 = vmatpush1.bf16.msra.mxu1 %v2302_v14  ;;  %v2471_v14 = vunpack.c.l.s8.bf16 %v2107_v36 }
 0x55e   :  { %3059 = vmatpush1.bf16.msra.mxu0 %v2414_v61  ;;  %3019 = vmatprep.subr.bf16.mxu1 %v2408_v6  ;;  %v2156_v61 = vld [vmem:[%s5442_s5 + $0x610] sm:$0xff]  ;;  %v2017_v6 = vld [vmem:[%s5442_s5 + $0x1b8] sm:$0xff] }
 0x55f   :  { %3060 = vmatprep.subr.bf16.mxu0 %v2520_v4  ;;  %v2470_v4 = vunpack.c.l.s8.bf16 %v2106_v0  ;;  %v2576_v11 = vunpack.c.h.s8.bf16 %v2156_v61  ;;  %v2569_v32 = vunpack.c.l.s8.bf16 %v2156_v61  ;;  %v2003_v0 = vld [vmem:[%s5442_s5 + $0x148] sm:$0xff] }
 0x560   :  { %v2269_v61 = vunpack.c.h.s8.bf16 %v2003_v0 }
 0x561   :  { %3020 = vmatpush2.bf16.msra.mxu1 %v2407_v34  ;;  %v2155_v34 = vld [vmem:[%s5442_s5 + $0x608] sm:$0xff] }
 0x562   :  { %3061 = vmatpush2.bf16.msra.mxu0 %v2519_v20  ;;  %3021 = vmatprep.subr.bf16.mxu1 %v2401_v23  ;;  %v2297_v20 = vunpack.c.h.s8.bf16 %v2017_v6  ;;  %v1989_v23 = vld [vmem:[%s5442_s5 + $0xd8] sm:$0xff]  ;;  %v2575_v27 = vunpack.c.h.s8.bf16 %v2155_v34  ;;  %v2568_v30 = vunpack.c.l.s8.bf16 %v2155_v34  ;;  %v2262_v34 = vunpack.c.l.s8.bf16 %v2003_v0 }
 0x563   :  { %3062 = vmatprep.subr.bf16.mxu0 %v2513_v24  ;;  %v5233_v24 = vld [vmem:[%s5443_s6 + $0x26] sm:$0x7f] }
 0x564   :  { %v3295_v46 = vrot.slane %v5233_v24, %v4071_v33 }
 0x565   :  { %3022 = vmatpush2.bf16.msra.mxu1 %v2400_v2  ;;  %v2241_v2 = vunpack.c.h.s8.bf16 %v1989_v23 }
 0x566   :  { %3063 = vmatpush2.bf16.msra.mxu0 %v2512_v38  ;;  %3023 = vmatprep.subr.bf16.mxu1 %v2394_v29  ;;  %v2751_v38 = vadd.f32 %v5130_v9, %v5029_v5  ;;  %v3291_v29 = vrot.slane %v5233_v24, %v4065_v31  ;;  %v2010_v5 = vld [vmem:[%s5442_s5 + $0x180] sm:$0xff]  ;;  %v2753_v9 = vadd.f32 %v5137_v21, %v5037_v13  ;;  %v2148_v13 = vld [vmem:[%s5442_s5 + $0x5d0] sm:$0xff] }
 0x567   :  { %3064 = vmatprep.subr.bf16.mxu0 %v2506_v35  ;;  %v2149_v35 = vld [vmem:[%s5442_s5 + $0x5d8] sm:$0xff]  ;;  %v2283_v50 = vunpack.c.h.s8.bf16 %v2010_v5  ;;  %v2561_v36 = vunpack.c.h.s8.bf16 %v2148_v13  ;;  %v2276_v60 = vunpack.c.l.s8.bf16 %v2010_v5 }
 0x569   :  { %3024 = vmatpush2.bf16.msra.mxu1 %v2393_v39 }
 0x56a   :  { %3065 = vmatpush2.bf16.msra.mxu0 %v2505_v41  ;;  %3025 = vmatprep.subr.bf16.mxu1 %v2387_v26  ;;  %v3335_v41 = vrot.slane %v5238_v25, %v4065_v31  ;;  %v2290_v26 = vunpack.c.l.s8.bf16 %v2017_v6  ;;  %v1975_v6 = vld [vmem:[%s5442_s5 + $0x68] sm:$0xff] }
 0x56b   :  { %3066 = vmatprep.subr.bf16.mxu0 %v2499_v45 }
 0x56d   :  { %3026 = vmatpush2.bf16.msra.mxu1 %v2386_v17 }
 0x56e   :  { %3067 = vmatpush2.bf16.msra.mxu0 %v2498_v48  ;;  %3027 = vmatprep.subr.bf16.mxu1 %v2380_v49  ;;  %v2234_v48 = vunpack.c.l.s8.bf16 %v1989_v23  ;;  %v2562_v49 = vunpack.c.h.s8.bf16 %v2149_v35  ;;  %v1996_v23 = vld [vmem:[%s5442_s5 + $0x110] sm:$0xff] }
 0x56f   :  { %3068 = vmatprep.subr.bf16.mxu0 %v2492_v15  ;;  %v3339_v15 = vrot.slane %v5238_v25, %v4071_v33  ;;  %v2248_v5 = vunpack.c.l.s8.bf16 %v1996_v23 }
 0x571   :  { %3028 = vmatpush2.bf16.msra.mxu1 %v2379_v53  ;;  %v1982_v53 = vld [vmem:[%s5442_s5 + $0xa0] sm:$0xff] }
 0x572   :  { %3069 = vmatpush2.bf16.msra.mxu0 %v2491_v12  ;;  %3029 = vmatprep.subr.bf16.mxu1 %v2373_v10 }
 0x573   :  { %3070 = vmatprep.subr.bf16.mxu0 %v2485_v54 }
 0x575   :  { %3030 = vmatpush2.bf16.msra.mxu1 %v2372_v56 }
 0x576   :  { %3071 = vmatpush2.bf16.msra.mxu0 %v2484_v57  ;;  %3031 = vmatprep.subr.bf16.mxu1 %v2366_v59  ;;  %v2227_v57 = vunpack.c.h.s8.bf16 %v1982_v53  ;;  %v2555_v59 = vunpack.c.l.s8.bf16 %v2149_v35  ;;  %v1968_v35 = vld [vmem:[%s5442_s5 + $0x30] sm:$0xff] }
 0x577   :  { %3072 = vmatprep.subr.bf16.mxu0 %v2478_v63  ;;  %v2142_v63 = vld [vmem:[%s5442_s5 + $0x5a0] sm:$0xff] }
 0x579   :  { %3032 = vmatpush2.bf16.msra.mxu1 %v2365_v51  ;;  %v2554_v51 = vunpack.c.l.s8.bf16 %v2148_v13  ;;  %v2101_v13 = vld [vmem:[%s5442_s5 + $0x458] sm:$0xff] }
 0x57a   :  { %3073 = vmatpush2.bf16.msra.mxu0 %v2477_v52  ;;  %3033 = vmatprep.subr.bf16.mxu1 %v2359_v3  ;;  %v2220_v52 = vunpack.c.l.s8.bf16 %v1982_v53  ;;  %v2548_v3 = vunpack.c.h.s8.bf16 %v2142_v63  ;;  %v2177_v53 = vld [vmem:[%s5442_s5 + $0x6b8] sm:$0xff] }
 0x57b   :  { %3074 = vmatprep.subr.bf16.mxu0 %v2471_v14  ;;  %v2141_v14 = vld [vmem:[%s5442_s5 + $0x598] sm:$0xff] }
 0x57d   :  { %3034 = vmatpush2.bf16.msra.mxu1 %v2358_v8  ;;  %v2547_v8 = vunpack.c.h.s8.bf16 %v2141_v14 }
 0x57e   :  { %3075 = vmatpush2.bf16.msra.mxu0 %v2470_v4  ;;  %3085 = vmatprep.subr.bf16.mxu1 %v2576_v11  ;;  %v2213_v4 = vunpack.c.h.s8.bf16 %v1975_v6  ;;  %v2541_v11 = vunpack.c.l.s8.bf16 %v2142_v63 }
 0x57f   :  { %3482 = vmatprep.subr.bf16.mxu0 %v2297_v20  ;;  %v2135_v20 = vld [vmem:[%s5442_s5 + $0x568] sm:$0xff] }
 0x580   :  { %v5247_v37 = vpop.f32.mrf.mxu0  ;;  %3036 = vmatmul.mubr.bf16.vlgmr.msra.gmra.mxu1 %v4746_v18  ;;  %v2791_v39 = vpop.f32.mrf.mxu1 }
 0x581   :  { %3077 = vmatmul.mubr.bf16.vlgmr.msra.gmra.mxu0 %v4834_v42  ;;  %v2792_v45 = vadd.f32 %v2791_v39, %v2751_v38  ;;  %3086 = vmatpush1.bf16.msra.mxu1 %v2575_v27  ;;  %v2540_v27 = vunpack.c.l.s8.bf16 %v2141_v14  ;;  %v2534_v38 = vunpack.c.h.s8.bf16 %v2135_v20  ;;  %v2087_v14 = vld [vmem:[%s5442_s5 + $0x3e8] sm:$0xff] }
 0x582   :  { %3117 = vmatprep.mubr.bf16.mxu1 %v4910_v55  ;;  %3483 = vmatpush3.bf16.msra.mxu0 %v2241_v2  ;;  %v5261_v31 = vpop.f32.mrf.mxu0  ;;  %v2793_v17 = vpop.f32.mrf.mxu1  ;;  %v2206_v2 = vunpack.c.l.s8.bf16 %v1975_v6  ;;  %v2437_v6 = vunpack.c.h.s8.bf16 %v2087_v14 }
 0x583   :  { %v3323_v21 = vmul.f32 %v3291_v29, %v2792_v45  ;;  %3158 = vmatprep.mubr.bf16.mxu0 %v4653_v62  ;;  %v2794_v28 = vadd.f32 %v2793_v17, %v2753_v9  ;;  %3087 = vmatprep.subr.bf16.mxu1 %v2569_v32  ;;  %v2134_v29 = vld [vmem:[%s5442_s5 + $0x560] sm:$0xff]  ;;  %v2255_v32 = vunpack.c.h.s8.bf16 %v1996_v23  ;;  %v2184_v9 = vld [vmem:[%s5442_s5 + $0x6f0] sm:$0xff]  ;;  %v2129_v45 = vld [vmem:[%s5442_s5 + $0x538] sm:$0xff]  ;;  %v2430_v23 = vunpack.c.l.s8.bf16 %v2087_v14 }
 0x584   :  { %v2836_v12 = vpop.f32.mrf.mxu0  ;;  %3484 = vmatprep.subr.bf16.mxu0 %v2290_v26  ;;  %v2795_v10 = vpop.f32.mrf.mxu1  ;;  %v2533_v39 = vunpack.c.h.s8.bf16 %v2134_v29  ;;  %v2527_v26 = vunpack.c.l.s8.bf16 %v2135_v20  ;;  %v2632_v17 = vunpack.c.h.s8.bf16 %v2184_v9 }
 0x585   :  { %v3367_v54 = vadd.f32 %v3335_v41, %v3323_v21  ;;  %v3324_v47 = vmul.f32 %v3295_v46, %v2794_v28  ;;  %3088 = vmatpush1.bf16.msra.mxu1 %v2568_v30  ;;  %v2199_v41 = vunpack.c.h.s8.bf16 %v1968_v35  ;;  %v2526_v46 = vunpack.c.l.s8.bf16 %v2134_v29  ;;  %v2122_v12 = vld [vmem:[%s5442_s5 + $0x500] sm:$0xff]  ;;  %v2080_v29 = vld [vmem:[%s5442_s5 + $0x3b0] sm:$0xff] }
 0x586   :  { %3485 = vmatpush3.bf16.msra.mxu0 %v2234_v48  ;;  %v2837_v56 = vpop.f32.mrf.mxu0  ;;  %v2796_v62 = vpop.f32.mrf.mxu1  ;;  %3089 = vmatprep.subr.bf16.mxu1 %v2562_v49  ;;  %v2192_v30 = vunpack.c.l.s8.bf16 %v1968_v35  ;;  %v2183_v48 = vld [vmem:[%s5442_s5 + $0x6e8] sm:$0xff]  ;;  %v2521_v49 = vunpack.c.h.s8.bf16 %v2129_v45  ;;  %v2465_v28 = vunpack.c.h.s8.bf16 %v2101_v13  ;;  %v2423_v35 = vunpack.c.h.s8.bf16 %v2080_v29 }
 0x587   :  { %3374 = vst [vmem:[#allocation2] sm:$0xff] %v3367_v54  ;;  %v3368_v33 = vadd.f32 %v3339_v15, %v3324_v47  ;;  %3486 = vmatprep.subr.bf16.mxu0 %v2283_v50  ;;  %v2631_v21 = vunpack.c.h.s8.bf16 %v2183_v48  ;;  %v2625_v15 = vunpack.c.l.s8.bf16 %v2184_v9  ;;  %v2514_v50 = vunpack.c.l.s8.bf16 %v2129_v45  ;;  %v2094_v62 = vld [vmem:[%s5442_s5 + $0x420] sm:$0xff] }
 0x588   :  { %v2624_v10 = vunpack.c.l.s8.bf16 %v2183_v48  ;;  %v2458_v54 = vunpack.c.l.s8.bf16 %v2101_v13  ;;  %v2618_v47 = vunpack.c.h.s8.bf16 %v2177_v53  ;;  %v2507_v56 = vunpack.c.h.s8.bf16 %v2122_v12  ;;  %v2066_v48 = vld [vmem:[%s5442_s5 + $0x340] sm:$0xff] }
 0x589   :  { %3375 = vst [vmem:[#allocation2 + $0x8] sm:$0xff] %v3368_v33  ;;  %3090 = vmatpush1.bf16.msra.mxu1 %v2561_v36  ;;  %v2176_v36 = vld [vmem:[%s5442_s5 + $0x6b0] sm:$0xff]  ;;  %v2170_v33 = vld [vmem:[%s5442_s5 + $0x680] sm:$0xff]  ;;  %v2444_v0 = vunpack.c.l.s8.bf16 %v2094_v62  ;;  %v2416_v9 = vunpack.c.l.s8.bf16 %v2080_v29 }
 0x58a   :  { %3487 = vmatpush3.bf16.msra.mxu0 %v2227_v57  ;;  %3091 = vmatprep.subr.bf16.mxu1 %v2555_v59  ;;  %v2451_v57 = vunpack.c.h.s8.bf16 %v2094_v62  ;;  %v2611_v59 = vunpack.c.l.s8.bf16 %v2177_v53  ;;  %v2610_v63 = vunpack.c.l.s8.bf16 %v2176_v36  ;;  %v2038_v53 = vld [vmem:[%s5442_s5 + $0x260] sm:$0xff] }
 0x58b   :  { %3488 = vmatprep.subr.bf16.mxu0 %v2276_v60  ;;  %v2115_v60 = vld [vmem:[%s5442_s5 + $0x4c8] sm:$0xff] }
 0x58d   :  { %3092 = vmatpush1.bf16.msra.mxu1 %v2554_v51  ;;  %v2604_v51 = vunpack.c.h.s8.bf16 %v2170_v33 }
 0x58e   :  { %3489 = vmatpush3.bf16.msra.mxu0 %v2220_v52  ;;  %3093 = vmatprep.subr.bf16.mxu1 %v2548_v3  ;;  %v2169_v52 = vld [vmem:[%s5442_s5 + $0x678] sm:$0xff]  ;;  %v2493_v3 = vunpack.c.h.s8.bf16 %v2115_v60 }
 0x58f   :  { %3490 = vmatprep.subr.bf16.mxu0 %v2269_v61  ;;  %v2603_v61 = vunpack.c.h.s8.bf16 %v2169_v52  ;;  %v2596_v20 = vunpack.c.l.s8.bf16 %v2169_v52  ;;  %v2185_v52 = vld [vmem:[%s5442_s5 + $0x6f8] sm:$0xff] }
 0x590   :  { %v2633_v14 = vunpack.c.h.s8.bf16 %v2185_v52 }
 0x591   :  { %3094 = vmatpush1.bf16.msra.mxu1 %v2547_v8  ;;  %v2597_v8 = vunpack.c.l.s8.bf16 %v2170_v33 }
 0x592   :  { %3491 = vmatpush3.bf16.msra.mxu0 %v2213_v4  ;;  %3095 = vmatprep.subr.bf16.mxu1 %v2541_v11  ;;  %v2486_v4 = vunpack.c.l.s8.bf16 %v2115_v60  ;;  %v2163_v11 = vld [vmem:[%s5442_s5 + $0x648] sm:$0xff] }
 0x593   :  { %3492 = vmatprep.subr.bf16.mxu0 %v2262_v34  ;;  %v2108_v34 = vld [vmem:[%s5442_s5 + $0x490] sm:$0xff] }
 0x595   :  { %3096 = vmatpush1.bf16.msra.mxu1 %v2540_v27  ;;  %v2590_v27 = vunpack.c.h.s8.bf16 %v2163_v11 }
 0x596   :  { %3493 = vmatpush3.bf16.msra.mxu0 %v2206_v2  ;;  %3097 = vmatprep.subr.bf16.mxu1 %v2534_v38  ;;  %v2162_v2 = vld [vmem:[%s5442_s5 + $0x640] sm:$0xff]  ;;  %v2479_v38 = vunpack.c.h.s8.bf16 %v2108_v34 }
 0x597   :  { %3494 = vmatprep.subr.bf16.mxu0 %v2255_v32  ;;  %v2589_v32 = vunpack.c.h.s8.bf16 %v2162_v2 }
 0x599   :  { %3098 = vmatpush1.bf16.msra.mxu1 %v2533_v39  ;;  %v2583_v39 = vunpack.c.l.s8.bf16 %v2163_v11 }
 0x59a   :  { %3495 = vmatpush3.bf16.msra.mxu0 %v2199_v41  ;;  %3099 = vmatprep.subr.bf16.mxu1 %v2527_v26  ;;  %v2472_v41 = vunpack.c.l.s8.bf16 %v2108_v34  ;;  %v2073_v26 = vld [vmem:[%s5442_s5 + $0x378] sm:$0xff] }
 0x59b   :  { %3496 = vmatprep.subr.bf16.mxu0 %v2248_v5  ;;  %v2582_v5 = vunpack.c.l.s8.bf16 %v2162_v2  ;;  %v2409_v45 = vunpack.c.h.s8.bf16 %v2073_v26  ;;  %v2171_v2 = vld [vmem:[%s5442_s5 + $0x688] sm:$0xff] }
 0x59d   :  { %3100 = vmatpush1.bf16.msra.mxu1 %v2526_v46  ;;  %v2045_v46 = vld [vmem:[%s5442_s5 + $0x298] sm:$0xff] }
 0x59e   :  { %3497 = vmatpush3.bf16.msra.mxu0 %v2192_v30  ;;  %3101 = vmatprep.subr.bf16.mxu1 %v2632_v17  ;;  %v2353_v30 = vunpack.c.h.s8.bf16 %v2045_v46  ;;  %v2402_v17 = vunpack.c.l.s8.bf16 %v2073_v26  ;;  %v2136_v26 = vld [vmem:[%s5442_s5 + $0x570] sm:$0xff] }
 0x59f   :  { %3526 = vmatprep.subr.bf16.mxu0 %v2521_v49 }
 0x5a1   :  { %3159 = vmatmul.mubr.bf16.vlgmr.msra.gmra.mxu0 %v4660_v1  ;;  %3102 = vmatpush2.bf16.msra.mxu1 %v2631_v21  ;;  %v2617_v1 = vunpack.c.h.s8.bf16 %v2176_v36  ;;  %v2346_v21 = vunpack.c.l.s8.bf16 %v2045_v46  ;;  %v2388_v36 = vunpack.c.l.s8.bf16 %v2066_v48 }
 0x5a2   :  { %3527 = vmatpush3.bf16.msra.mxu0 %v2465_v28  ;;  %3238 = vmatprep.mubr.bf16.mxu0 %v4832_v40  ;;  %v2500_v40 = vunpack.c.l.s8.bf16 %v2122_v12 }
 0x5a3   :  { %3103 = vmatprep.subr.bf16.mxu1 %v2625_v15  ;;  %3528 = vmatprep.subr.bf16.mxu0 %v2514_v50  ;;  %v2395_v50 = vunpack.c.h.s8.bf16 %v2066_v48  ;;  %v3299_v48 = vrot.slane %v5233_v24, %v4188_v43 }
 0x5a5   :  { %3104 = vmatpush2.bf16.msra.mxu1 %v2624_v10 }
 0x5a6   :  { %3529 = vmatpush3.bf16.msra.mxu0 %v2458_v54  ;;  %3105 = vmatprep.subr.bf16.mxu1 %v2618_v47  ;;  %v2339_v54 = vunpack.c.h.s8.bf16 %v2038_v53 }
 0x5a7   :  { %3530 = vmatprep.subr.bf16.mxu0 %v2507_v56  ;;  %v2332_v56 = vunpack.c.l.s8.bf16 %v2038_v53 }
 0x5a9   :  { %3106 = vmatpush2.bf16.msra.mxu1 %v2617_v1  ;;  %v2031_v1 = vld [vmem:[%s5442_s5 + $0x228] sm:$0xff] }
 0x5aa   :  { %3531 = vmatpush3.bf16.msra.mxu0 %v2451_v57  ;;  %3107 = vmatprep.subr.bf16.mxu1 %v2611_v59  ;;  %v2325_v57 = vunpack.c.h.s8.bf16 %v2031_v1  ;;  %v2318_v33 = vunpack.c.l.s8.bf16 %v2031_v1 }
 0x5ab   :  { %3532 = vmatprep.subr.bf16.mxu0 %v2500_v40  ;;  %v2052_v40 = vld [vmem:[%s5442_s5 + $0x2d0] sm:$0xff] }
 0x5ac   :  { %v2367_v60 = vunpack.c.h.s8.bf16 %v2052_v40 }
 0x5ad   :  { %3108 = vmatpush2.bf16.msra.mxu1 %v2610_v63  ;;  %v2024_v63 = vld [vmem:[%s5442_s5 + $0x1f0] sm:$0xff] }
 0x5ae   :  { %3533 = vmatpush3.bf16.msra.mxu0 %v2444_v0  ;;  %3109 = vmatprep.subr.bf16.mxu1 %v2604_v51  ;;  %v2311_v0 = vunpack.c.h.s8.bf16 %v2024_v63  ;;  %v2360_v51 = vunpack.c.l.s8.bf16 %v2052_v40 }
 0x5af   :  { %3534 = vmatprep.subr.bf16.mxu0 %v2493_v3  ;;  %v2304_v3 = vunpack.c.l.s8.bf16 %v2024_v63 }
 0x5b1   :  { %3110 = vmatpush2.bf16.msra.mxu1 %v2603_v61  ;;  %v2157_v61 = vld [vmem:[%s5442_s5 + $0x618] sm:$0xff] }
 0x5b2   :  { %3535 = vmatpush3.bf16.msra.mxu0 %v2437_v6  ;;  %3111 = vmatprep.subr.bf16.mxu1 %v2597_v8  ;;  %v2577_v6 = vunpack.c.h.s8.bf16 %v2157_v61  ;;  %v2626_v8 = vunpack.c.l.s8.bf16 %v2185_v52  ;;  %v2570_v11 = vunpack.c.l.s8.bf16 %v2157_v61 }
 0x5b3   :  { %3536 = vmatprep.subr.bf16.mxu0 %v2486_v4  ;;  %v2178_v4 = vld [vmem:[%s5442_s5 + $0x6c0] sm:$0xff] }
 0x5b4   :  { %v2619_v34 = vunpack.c.h.s8.bf16 %v2178_v4 }
 0x5b5   :  { %3112 = vmatpush2.bf16.msra.mxu1 %v2596_v20  ;;  %v2150_v20 = vld [vmem:[%s5442_s5 + $0x5e0] sm:$0xff] }
 0x5b6   :  { %3537 = vmatpush3.bf16.msra.mxu0 %v2430_v23  ;;  %3113 = vmatprep.subr.bf16.mxu1 %v2590_v27  ;;  %v2563_v23 = vunpack.c.h.s8.bf16 %v2150_v20  ;;  %v2612_v27 = vunpack.c.l.s8.bf16 %v2178_v4 }
 0x5b7   :  { %3538 = vmatprep.subr.bf16.mxu0 %v2479_v38  ;;  %v2605_v38 = vunpack.c.h.s8.bf16 %v2171_v2 }
 0x5b9   :  { %3114 = vmatpush2.bf16.msra.mxu1 %v2589_v32  ;;  %v2598_v32 = vunpack.c.l.s8.bf16 %v2171_v2 }
 0x5ba   :  { %3539 = vmatpush3.bf16.msra.mxu0 %v2423_v35  ;;  %3115 = vmatprep.subr.bf16.mxu1 %v2583_v39  ;;  %v2164_v35 = vld [vmem:[%s5442_s5 + $0x650] sm:$0xff] }
 0x5bb   :  { %3540 = vmatprep.subr.bf16.mxu0 %v2472_v41  ;;  %v2591_v41 = vunpack.c.h.s8.bf16 %v2164_v35 }
 0x5bd   :  { %3116 = vmatpush2.bf16.msra.mxu1 %v2582_v5  ;;  %v2535_v5 = vunpack.c.h.s8.bf16 %v2136_v26 }
 0x5be   :  { %3541 = vmatpush3.bf16.msra.mxu0 %v2416_v9  ;;  %3504 = vmatprep.subr.bf16.mxu1 %v2409_v45  ;;  %v2584_v9 = vunpack.c.l.s8.bf16 %v2164_v35  ;;  %v2528_v45 = vunpack.c.l.s8.bf16 %v2136_v26 }
 0x5c0   :  { %v5355_v49 = vpop.f32.mrf.mxu1  ;;  %v5357_v13 = vpop.f32.mrf.mxu0  ;;  %3118 = vmatmul.mubr.bf16.vlgmr.msra.gmra.mxu1 %v4912_v58 }
 0x5c1   :  { %3239 = vmatmul.mubr.bf16.vlgmr.msra.gmra.mxu0 %v4834_v42  ;;  %3505 = vmatpush3.bf16.msra.mxu1 %v2353_v30  ;;  %v2874_v46 = vadd.f32 %v5355_v49, %v5247_v37  ;;  %v3303_v37 = vrot.slane %v5233_v24, %v4191_v44 }
 0x5c2   :  { %3198 = vmatprep.mubr.bf16.mxu1 %v4744_v22  ;;  %v5362_v28 = vpop.f32.mrf.mxu1  ;;  %v5364_v15 = vpop.f32.mrf.mxu0  ;;  %3506 = vmatprep.subr.bf16.mxu1 %v2402_v17  ;;  %v2059_v22 = vld [vmem:[%s5442_s5 + $0x308] sm:$0xff] }
 0x5c3   :  { %v2381_v62 = vunpack.c.h.s8.bf16 %v2059_v22  ;;  %v2374_v59 = vunpack.c.l.s8.bf16 %v2059_v22  ;;  %v2876_v30 = vadd.f32 %v5362_v28, %v5261_v31  ;;  %v2915_v17 = vadd.f32 %v5357_v13, %v2874_v46 }
 0x5c4   :  { %v2877_v12 = vpop.f32.mrf.mxu1  ;;  %v2918_v10 = vpop.f32.mrf.mxu0  ;;  %v3347_v13 = vrot.slane %v5238_v25, %v4191_v44 }
 0x5c5   :  { %3507 = vmatpush3.bf16.msra.mxu1 %v2346_v21  ;;  %v3343_v12 = vrot.slane %v5238_v25, %v4188_v43 }
 0x5c6   :  { %v2878_v47 = vpop.f32.mrf.mxu1  ;;  %v2919_v42 = vpop.f32.mrf.mxu0  ;;  %3508 = vmatprep.subr.bf16.mxu1 %v2395_v50  ;;  %v2917_v50 = vadd.f32 %v5364_v15, %v2876_v30 }
 0x5c9   :  { %3509 = vmatpush3.bf16.msra.mxu1 %v2339_v54 }
 0x5ca   :  { %3510 = vmatprep.subr.bf16.mxu1 %v2388_v36 }
 0x5cd   :  { %3511 = vmatpush3.bf16.msra.mxu1 %v2332_v56 }
 0x5ce   :  { %3512 = vmatprep.subr.bf16.mxu1 %v2381_v62 }
 0x5d1   :  { %3513 = vmatpush3.bf16.msra.mxu1 %v2325_v57 }
 0x5d2   :  { %3514 = vmatprep.subr.bf16.mxu1 %v2374_v59 }
 0x5d5   :  { %3515 = vmatpush3.bf16.msra.mxu1 %v2318_v33 }
 0x5d6   :  { %3516 = vmatprep.subr.bf16.mxu1 %v2367_v60 }
 0x5d9   :  { %3517 = vmatpush3.bf16.msra.mxu1 %v2311_v0 }
 0x5da   :  { %3518 = vmatprep.subr.bf16.mxu1 %v2360_v51 }
 0x5dd   :  { %3519 = vmatpush3.bf16.msra.mxu1 %v2304_v3 }
 0x5de   :  { %3548 = vmatprep.subr.bf16.mxu1 %v2633_v14 }
 0x5e0   :  { %3199 = vmatmul.mubr.bf16.vlgmr.msra.gmra.mxu1 %v4746_v18  ;;  %v2556_v18 = vunpack.c.l.s8.bf16 %v2150_v20 }
 0x5e1   :  { %3549 = vmatpush3.bf16.msra.mxu1 %v2577_v6  ;;  %3278 = vmatprep.mubr.bf16.mxu1 %v4910_v55  ;;  %v2143_v55 = vld [vmem:[%s5442_s5 + $0x5a8] sm:$0xff]  ;;  %v3307_v6 = vrot.slane %v5233_v24, %v4733_v7  ;;  %s3757_s5 = smov [#allocation2]  }
 0x5e2   :  { %3550 = vmatprep.subr.bf16.mxu1 %v2626_v8  ;;  %v2549_v29 = vunpack.c.h.s8.bf16 %v2143_v55  ;;  %v2542_v39 = vunpack.c.l.s8.bf16 %v2143_v55  ;;  %s3388_s14 = sshll.u32 %s3757_s5, 4  ;;  %s3389_s14 = int_to_ptr.vmem [resolvable:$true] %s3388_s14 }
 0x5e3   :  { %s3732_s6 = scalar_lea.vmem %s3389_s14, 896  ;;  %p3737_p1 = scmp.lt.s32.totalorder %s3389_s14, %s3389_s14 }
 0x5e4   :  { %p3733_p0 = scmp.ne.s32.totalorder %s3389_s14, %s3732_s6  ;;  %p3738_p2 = scmp.lt.s32.totalorder %s3732_s6, %s3732_s6 }
 0x5e5   :  { %3551 = vmatpush3.bf16.msra.mxu1 %v2570_v11 }
 0x5e6   :  { %3552 = vmatprep.subr.bf16.mxu1 %v2619_v34  ;;  %v3351_v34 = vrot.slane %v5238_v25, %v4733_v7  ;;  %p3739_p3 = por %p3738_p2, %p3737_p1 }
 0x5e8   :  { %p3740_p4 = pnand %p3739_p3, %p3733_p0 }
 0x5e9   :  { %3553 = vmatpush3.bf16.msra.mxu1 %v2563_v23  ;;  %v3311_v23 = vrot.slane %v5233_v24, %v4740_v16 }
 0x5ea   :  { %3554 = vmatprep.subr.bf16.mxu1 %v2612_v27 }
 0x5ed   :  { %3555 = vmatpush3.bf16.msra.mxu1 %v2556_v18 }
 0x5ee   :  { %3556 = vmatprep.subr.bf16.mxu1 %v2605_v38  ;;  %v3355_v38 = vrot.slane %v5238_v25, %v4740_v16 }
 0x5f1   :  { %3557 = vmatpush3.bf16.msra.mxu1 %v2549_v29 }
 0x5f2   :  { %3558 = vmatprep.subr.bf16.mxu1 %v2598_v32 }
 0x5f5   :  { %3559 = vmatpush3.bf16.msra.mxu1 %v2542_v39 }
 0x5f6   :  { %3560 = vmatprep.subr.bf16.mxu1 %v2591_v41 }
 0x5f9   :  { %3561 = vmatpush3.bf16.msra.mxu1 %v2535_v5 }
 0x5fa   :  { %3562 = vmatprep.subr.bf16.mxu1 %v2584_v9 }
 0x5fd   :  { %3563 = vmatpush3.bf16.msra.mxu1 %v2528_v45 }
 0x600   :  { %v2955_v21 = vpop.f32.mrf.mxu1  ;;  %3279 = vmatmul.mubr.bf16.vlgmr.msra.gmra.mxu1 %v4912_v58 }
 0x601   :  { %v2956_v53 = vadd.f32 %v2955_v21, %v2915_v17  ;;  %v2996_v10 = vpop.f32.mrf.mxu0 }
 0x602   :  { %v2957_v31 = vpop.f32.mrf.mxu1 }
 0x603   :  { %v3325_v49 = vmul.f32 %v3299_v48, %v2956_v53  ;;  %v2958_v28 = vadd.f32 %v2957_v31, %v2917_v50  ;;  %v2998_v54 = vpop.f32.mrf.mxu0  ;;  %v3359_v31 = vrot.slane %v5238_v25, %v4819_v19 }
 0x604   :  { %v2959_v47 = vpop.f32.mrf.mxu1 }
 0x605   :  { %v3369_v42 = vadd.f32 %v3343_v12, %v3325_v49  ;;  %v3326_v58 = vmul.f32 %v3303_v37, %v2958_v28  ;;  %v3000_v36 = vpop.f32.mrf.mxu0  ;;  %v3315_v12 = vrot.slane %v5233_v24, %v4819_v19 }
 0x606   :  { %v2960_v15 = vpop.f32.mrf.mxu1 }
 0x607   :  { %3376 = vst [vmem:[#allocation2 + $0x10] sm:$0xff] %v3369_v42  ;;  %v3370_v22 = vadd.f32 %v3347_v13, %v3326_v58  ;;  %v3001_v56 = vpop.f32.mrf.mxu0 }
 0x609   :  { %3377 = vst [vmem:[#allocation2 + $0x18] sm:$0xff] %v3370_v22 }
 0x640   :  { %v3037_v43 = vpop.f32.mrf.mxu1 }
 0x641   :  { %v3078_v62 = vpop.f32.mrf.mxu0  ;;  %v3038_v3 = vadd.f32 %v3037_v43, %v2996_v10 }
 0x642   :  { %v3039_v1 = vpop.f32.mrf.mxu1 }
 0x643   :  { %v3080_v57 = vpop.f32.mrf.mxu0  ;;  %v3040_v14 = vadd.f32 %v3039_v1, %v2998_v54  ;;  %v3079_v61 = vadd.f32 %v3078_v62, %v3038_v3 }
 0x644   :  { %v3041_v59 = vpop.f32.mrf.mxu1 }
 0x645   :  { %v3082_v40 = vpop.f32.mrf.mxu0  ;;  %v3081_v4 = vadd.f32 %v3080_v57, %v3040_v14 }
 0x646   :  { %v3042_v33 = vpop.f32.mrf.mxu1 }
 0x647   :  { %v3083_v60 = vpop.f32.mrf.mxu0 }
 0x661   :  { %v3498_v63 = vpop.f32.mrf.mxu0 }
 0x663   :  { %v3499_v44 = vpop.f32.mrf.mxu0 }
 0x664   :  { %v3500_v0 = vadd.f32 %v3499_v44, %v3498_v63 }
 0x665   :  { %v3501_v51 = vpop.f32.mrf.mxu0 }
 0x667   :  { %v3502_v52 = vpop.f32.mrf.mxu0 }
 0x680   :  { %v3119_v8 = vpop.f32.mrf.mxu1 }
 0x681   :  { %v3120_v11 = vadd.f32 %v3119_v8, %v3079_v61  ;;  %v3542_v20 = vpop.f32.mrf.mxu0 }
 0x682   :  { %v3121_v27 = vpop.f32.mrf.mxu1 }
 0x683   :  { %v3327_v2 = vmul.f32 %v3307_v6, %v3120_v11  ;;  %v3122_v18 = vadd.f32 %v3121_v27, %v3081_v4  ;;  %v3543_v55 = vpop.f32.mrf.mxu0 }
 0x684   :  { %v3123_v29 = vpop.f32.mrf.mxu1  ;;  %v3544_v21 = vadd.f32 %v3543_v55, %v3542_v20 }
 0x685   :  { %v3371_v32 = vadd.f32 %v3351_v34, %v3327_v2  ;;  %v3328_v35 = vmul.f32 %v3311_v23, %v3122_v18  ;;  %v3545_v39 = vpop.f32.mrf.mxu0 }
 0x686   :  { %v3124_v41 = vpop.f32.mrf.mxu1 }
 0x687   :  { %3378 = vst [vmem:[#allocation2 + $0x20] sm:$0xff] %v3371_v32  ;;  %v3372_v26 = vadd.f32 %v3355_v38, %v3328_v35  ;;  %v3546_v5 = vpop.f32.mrf.mxu0 }
 0x689   :  { %3379 = vst [vmem:[#allocation2 + $0x28] sm:$0xff] %v3372_v26 }
 0x6a0   :  { %v3520_v7 = vpop.f32.mrf.mxu1 }
 0x6a2   :  { %v3521_v9 = vpop.f32.mrf.mxu1 }
 0x6a3   :  { %v3522_v30 = vadd.f32 %v3521_v9, %v3520_v7 }
 0x6a4   :  { %v3523_v45 = vpop.f32.mrf.mxu1 }
 0x6a5   :  { %v3201_v17 = vadd.f32 %v3522_v30, %v3500_v0 }
 0x6a6   :  { %v3524_v46 = vpop.f32.mrf.mxu1 }
 0x6a7   :  { %v3241_v16 = vadd.f32 %v3544_v21, %v3201_v17 }
 0x6c0   :  { %v3564_v48 = vpop.f32.mrf.mxu1 }
 0x6c2   :  { %v3565_v50 = vpop.f32.mrf.mxu1 }
 0x6c3   :  { %v3566_v53 = vadd.f32 %v3565_v50, %v3564_v48 }
 0x6c4   :  { %v3567_v10 = vpop.f32.mrf.mxu1 }
 0x6c5   :  { %v3281_v37 = vadd.f32 %v3566_v53, %v3241_v16 }
 0x6c6   :  { %v3568_v49 = vpop.f32.mrf.mxu1 }
 0x6c7   :  { %v3329_v28 = vmul.f32 %v3315_v12, %v3281_v37 }
 0x6c9   :  { %v3373_v13 = vadd.f32 %v3359_v31, %v3329_v28 }
 0x6cb   :  { %3381 = vst.msk [vmem:[#allocation2 + $0x30] sm:$0xff] %vm3380_vm3, %v3373_v13 }
 0x6cc   :  { %3743 = shalt.err (!%p3740_p4)
}
 0x6cd   :  { %3391 = dma.vmem_to_hbm [thread:$0]  %s3389_s14, 896, %s5444_s7, [#allocation3]  }
 0x6ce   :  { %3752 = dma.done.wait [#allocation3], 896  }
 0x6cf   :  { %3753 = vsyncadd [#allocation3], 4294966400 }
 0x6d0   :  { %3395 = vsyncpa [#allocation3], 1 }

</bundles_post_ra>
